<compile_context>
chip_gen: v7x
topology: tpu7x:2x2x1
jax: 0.10.0
libtpu: 0.0.40
codegen_flags: <defaults>
</compile_context>

<pallas_src>
import functools

import numpy as np
import jax
import jax.numpy as jnp
from jax.experimental import pallas as pl
from jax.experimental.pallas import tpu as pltpu


# ----------------------------------------------------------------------------
# Pallas kernel: act(x @ w + b), single K pass (used for conv1 / conv2)
# ----------------------------------------------------------------------------
def _matmul_bias_act_kernel(x_ref, w_ref, b_ref, o_ref, *, act):
    out = jnp.dot(x_ref[...], w_ref[...], preferred_element_type=jnp.float32)
    out = out + b_ref[...]
    if act == "leaky_relu":
        out = jnp.where(out > 0, out, 0.2 * out)
    elif act == "sigmoid":
        out = 1.0 / (1.0 + jnp.exp(-out))
    o_ref[...] = out.astype(o_ref.dtype)


def matmul_bias_act(x, w, b2d, *, act="leaky_relu", out_dtype=jnp.bfloat16,
                    m_blocks=1):
    """y = act(x @ w + b); x:(M,K), w:(K,N), b2d:(1,N). K, N stay whole."""
    M, K = x.shape
    K2, N = w.shape
    assert K == K2 and b2d.shape == (1, N)
    assert M % m_blocks == 0
    tm = M // m_blocks
    flops = 2 * M * K * N
    bytes_accessed = int(M * K * x.dtype.itemsize + K * N * w.dtype.itemsize
                         + N * 4 + M * N * jnp.dtype(out_dtype).itemsize)
    return pl.pallas_call(
        functools.partial(_matmul_bias_act_kernel, act=act),
        out_shape=jax.ShapeDtypeStruct((M, N), out_dtype),
        grid_spec=pltpu.PrefetchScalarGridSpec(
            num_scalar_prefetch=0,
            grid=(m_blocks,),
            in_specs=[
                pl.BlockSpec((tm, K), lambda m: (m, 0)),
                # Constant index maps -> weight/bias stay resident across the
                # grid. (pl.Buffered(1) would drop the redundant second buffer;
                # irrelevant at these sizes, left at the default.)
                pl.BlockSpec((K, N), lambda m: (0, 0)),
                pl.BlockSpec((1, N), lambda m: (0, 0)),
            ],
            out_specs=pl.BlockSpec((tm, N), lambda m: (m, 0)),
        ),
        compiler_params=pltpu.CompilerParams(
            dimension_semantics=("parallel",)),
        cost_estimate=pl.CostEstimate(flops=flops, transcendentals=0,
                                      bytes_accessed=bytes_accessed),
    )(x, w, b2d)


# ----------------------------------------------------------------------------
# Fused tail: conv3 (matmul+bias+lrelu) + conv4 (folded pad) + FC + sigmoid
# ----------------------------------------------------------------------------
def _tail_kernel(p3_ref, w3_ref, b3_ref, w4_ref, b4_ref, wfc_ref, bfc_ref,
                 o_ref, *, gb, n_pos, c3, c4):
    # conv3: one MXU pass over the (spatial-major, batch-padded-to-8) rows.
    h3 = jnp.dot(p3_ref[...], w3_ref[...], preferred_element_type=jnp.float32)
    h3 = h3 + b3_ref[...]
    h3 = jnp.where(h3 > 0, h3, 0.2 * h3)                  # (n_pos*gb, c3) f32

    # conv4 (output 1x1x1): zero-pad taps folded out of the weight, so it is a
    # sum of n_pos small matmuls over vreg-aligned row groups of h3.
    acc = jnp.zeros((gb, c4), jnp.float32)
    for j in range(n_pos):
        hj = h3[j * gb:(j + 1) * gb, :].astype(jnp.bfloat16)     # aligned slice
        wj = w4_ref[j * c3:(j + 1) * c3, :]                      # (c3, c4)
        acc = acc + jnp.dot(hj, wj, preferred_element_type=jnp.float32)
    h4 = acc + b4_ref[...]
    h4 = jnp.where(h4 > 0, h4, 0.2 * h4)                  # (gb, c4)

    # FC + sigmoid: elementwise mul + lane reduce (no degenerate 1-lane MXU op).
    logit = jnp.sum(h4 * wfc_ref[...], axis=1, keepdims=True) + bfc_ref[0, 0]
    o_ref[...] = (1.0 / (1.0 + jnp.exp(-logit))).astype(o_ref.dtype)


def conv3_conv4_fc_fused(p3, w3, b3, w4, b4, wfc, bfc, *, gb, n_pos):
    Mp, K3 = p3.shape
    c3 = w3.shape[1]
    c4 = w4.shape[1]
    assert Mp == gb * n_pos and w4.shape[0] == n_pos * c3
    flops = 2 * Mp * K3 * c3 + 2 * gb * n_pos * c3 * c4 + 2 * gb * c4
    bytes_accessed = int(Mp * K3 * 2 + K3 * c3 * 2 + n_pos * c3 * c4 * 2
                         + (c3 + c4 + c4 + 1) * 4 + gb * 4)
    kernel = functools.partial(_tail_kernel, gb=gb, n_pos=n_pos, c3=c3, c4=c4)
    return pl.pallas_call(
        kernel,
        out_shape=jax.ShapeDtypeStruct((gb, 1), jnp.float32),
        grid_spec=pltpu.PrefetchScalarGridSpec(
            num_scalar_prefetch=0,
            grid=(1,),
            in_specs=[
                pl.BlockSpec((Mp, K3), lambda i: (0, 0)),
                pl.BlockSpec((K3, c3), lambda i: (0, 0)),
                pl.BlockSpec((1, c3), lambda i: (0, 0)),
                pl.BlockSpec((n_pos * c3, c4), lambda i: (0, 0)),
                pl.BlockSpec((1, c4), lambda i: (0, 0)),
                pl.BlockSpec((1, c4), lambda i: (0, 0)),
                pl.BlockSpec(memory_space=pltpu.MemorySpace.SMEM),   # fc bias
            ],
            out_specs=pl.BlockSpec((gb, 1), lambda i: (0, 0)),
        ),
        compiler_params=pltpu.CompilerParams(
            dimension_semantics=("arbitrary",)),
        cost_estimate=pl.CostEstimate(flops=flops, transcendentals=2 * gb,
                                      bytes_accessed=bytes_accessed),
    )(p3, w3, b3, w4, b4, wfc, bfc)


# ----------------------------------------------------------------------------
# Channels-last im2col via space-to-depth: 8 wide slices + 1 concat per layer
# (k=4, stride=2, pad=1). K ordering: (kd//2, kh//2, kw//2, kd%2, kh%2, kw%2, c)
# ----------------------------------------------------------------------------
def _im2col_s2d(x):
    B, D, H, W, C = x.shape
    assert D % 2 == 0 and H % 2 == 0 and W % 2 == 0
    OD, OH, OW = D // 2, H // 2, W // 2
    xp = jnp.pad(x, ((0, 0), (1, 1), (1, 1), (1, 1), (0, 0)))
    xq = xp.reshape(B, OD + 1, 2, OH + 1, 2, OW + 1, 2, C)
    xq = jnp.transpose(xq, (0, 1, 3, 5, 2, 4, 6, 7))
    xq = xq.reshape(B, OD + 1, OH + 1, OW + 1, 8 * C)
    cols = [xq[:, a:a + OD, b:b + OH, c:c + OW, :]
            for a in range(2) for b in range(2) for c in range(2)]
    patches = jnp.concatenate(cols, axis=-1)               # (B,OD,OH,OW,64C)
    return patches.reshape(B * OD * OH * OW, 64 * C), (OD, OH, OW)


# ----------------------------------------------------------------------------
# One-time parameter repack (outside jit)
# ----------------------------------------------------------------------------
def _repack_conv_weight_s2d(w):
    """torch (O, I, 4,4,4) -> (64*I, O), rows ordered to match _im2col_s2d."""
    O, I = w.shape[0], w.shape[1]
    w = np.asarray(w, np.float32).reshape(O, I, 2, 2, 2, 2, 2, 2)
    w = np.transpose(w, (2, 4, 6, 3, 5, 7, 1, 0))           # (ad,ah,aw,rd,rh,rw,I,O)
    return w.reshape(64 * I, O)


def prepare_params(params):
    kp = {}
    # conv1: 4-way block-diagonal weight -> four 32-lane output rows pack into
    # one 128-lane row (lane-dense stores; row-major identical to (M,32)).
    w1m = _repack_conv_weight_s2d(params["conv1_w"])
    k1, n1 = w1m.shape
    w1bd = np.zeros((4 * k1, 4 * n1), np.float32)
    for j in range(4):
        w1bd[j * k1:(j + 1) * k1, j * n1:(j + 1) * n1] = w1m
    kp["w1"] = jnp.asarray(w1bd, jnp.bfloat16)
    kp["b1"] = jnp.asarray(np.tile(np.asarray(params["conv1_b"],
                                              np.float32).reshape(1, n1), (1, 4)))

    for i in (2, 3):
        kp[f"w{i}"] = jnp.asarray(_repack_conv_weight_s2d(params[f"conv{i}_w"]),
                                  jnp.bfloat16)
        kp[f"b{i}"] = jnp.asarray(np.asarray(params[f"conv{i}_b"],
                                             np.float32).reshape(1, -1))

    # conv4: 2x2x2 input + pad 1 -> 1x1x1 output; only the centre 2x2x2 of the
    # 4x4x4 kernel touches non-pad data -> fold the padding out of the weight.
    w4 = np.asarray(params["conv4_w"], np.float32)           # (O, I, 4,4,4)
    c4, cin4 = w4.shape[0], w4.shape[1]
    w4c = np.transpose(w4[:, :, 1:3, 1:3, 1:3], (2, 3, 4, 1, 0))   # (d,h,w,I,O)
    kp["w4"] = jnp.asarray(w4c.reshape(8 * cin4, c4), jnp.bfloat16)
    kp["b4"] = jnp.asarray(np.asarray(params["conv4_b"],
                                      np.float32).reshape(1, c4))

    # final spatial 1^3 -> torch's channel-major flatten is just channels.
    assert params["fc_w"].shape[1] == c4, "Pallas path requires final_spatial=1"
    kp["wfc"] = jnp.asarray(np.asarray(params["fc_w"], np.float32).reshape(1, c4))
    kp["bfc"] = jnp.asarray(np.asarray(params["fc_b"], np.float32).reshape(1, 1))
    return kp


def _conv1_m_blocks():
    """Split conv1 over M only when a second TensorCore exists (v7x/megacore)."""
    try:
        kind = jax.devices()[0].device_kind.lower()
    except Exception:
        return 1
    return 2 if any(t in kind for t in ("v7", "v5p", "v4")) else 1


# ----------------------------------------------------------------------------
# Discriminator forward (Pallas path, channels-last, bf16 activations)
# ----------------------------------------------------------------------------
def discriminator_forward(kparams, x, phase_condition, *, m_blocks_conv1=1):
    B, C, D, H, W = x.shape
    assert D == 16 and H == 16 and W == 16, "specialised to 16^3 (final spatial 1^3)"
    x_cl = jnp.transpose(x, (0, 2, 3, 4, 1))                 # single NCDHW->NDHWC
    phase = phase_condition.reshape(B, -1)
    pmap = jnp.broadcast_to(phase[:, None, None, None, :],
                            (B, D, H, W, phase.shape[1]))
    h = jnp.concatenate([x_cl, pmap], axis=-1).astype(jnp.bfloat16)

    # conv1: wide im2col + lane-dense block-diagonal matmul.
    p1, (od, oh, ow) = _im2col_s2d(h)                        # (B*8^3, 64*(C+P))
    m1, k1 = p1.shape
    p1w = p1.reshape(m1 // 4, 4 * k1)                        # free row-major view
    h1 = matmul_bias_act(p1w, kparams["w1"], kparams["b1"],
                         m_blocks=m_blocks_conv1)            # (m1//4, 128) == (m1, 32)
    h1 = h1.reshape(B, od, oh, ow, 32)

    # conv2
    p2, (od, oh, ow) = _im2col_s2d(h1)                       # (B*4^3, 2048)
    h2 = matmul_bias_act(p2, kparams["w2"], kparams["b2"])   # (B*64, 64)
    h2 = h2.reshape(B, od, oh, ow, 64)

    # conv3 patches: spatial-major rows, batch padded to 8-row (vreg) groups so
    # every slice inside the fused tail is sublane-aligned. Pad rows only ever
    # produce garbage logits that are dropped below.
    p3, (od, oh, ow) = _im2col_s2d(h2)                       # (B*8, 4096)
    n_pos = od * oh * ow                                     # 8
    gb = ((B + 7) // 8) * 8
    k3 = p3.shape[1]
    p3 = jnp.transpose(p3.reshape(B, n_pos, k3), (1, 0, 2))  # (n_pos, B, k3)
    p3 = jnp.pad(p3, ((0, 0), (0, gb - B), (0, 0))).reshape(n_pos * gb, k3)

    probs = conv3_conv4_fc_fused(p3, kparams["w3"], kparams["b3"],
                                 kparams["w4"], kparams["b4"],
                                 kparams["wfc"], kparams["bfc"],
                                 gb=gb, n_pos=n_pos)
    return probs[:B]


# ----------------------------------------------------------------------------
# Pure-JAX (lax.conv, f32, NCDHW) reference for numerical sanity check
# ----------------------------------------------------------------------------
def reference_forward(params, x, phase_condition):
    B, C, D, H, W = x.shape
    pmap = phase_condition.reshape(B, -1, 1, 1, 1)
    pmap = jnp.broadcast_to(pmap, (B, pmap.shape[1], D, H, W))
    h = jnp.concatenate([x, pmap], axis=1)

    def conv(h, w, b):
        y = jax.lax.conv_general_dilated(
            h, w, window_strides=(2, 2, 2), padding=[(1, 1)] * 3,
            dimension_numbers=("NCDHW", "OIDHW", "NCDHW"))
        y = y + b.reshape(1, -1, 1, 1, 1)
        return jnp.where(y > 0, y, 0.2 * y)

    for i in range(1, 5):
        h = conv(h, params[f"conv{i}_w"], params[f"conv{i}_b"])
    h = h.reshape(B, -1)
    logits = h @ params["fc_w"].T + params["fc_b"]
    return jax.nn.sigmoid(logits)


def init_params(key, in_channels=1, phase_dim=1, final_spatial=1):
    ks = jax.random.split(key, 10)
    chans = [(32, in_channels + phase_dim), (64, 32), (128, 64), (256, 128)]
    params = {}
    for i, (oc, ic) in enumerate(chans, start=1):
        params[f"conv{i}_w"] = 0.02 * jax.random.normal(
            ks[2 * (i - 1)], (oc, ic, 4, 4, 4), jnp.float32)
        params[f"conv{i}_b"] = 0.01 * jax.random.normal(
            ks[2 * (i - 1) + 1], (oc,), jnp.float32)
    fc_in = 256 * final_spatial ** 3
    params["fc_w"] = 0.02 * jax.random.normal(ks[8], (1, fc_in), jnp.float32)
    params["fc_b"] = 0.01 * jax.random.normal(ks[9], (1,), jnp.float32)
    return params


if __name__ == "__main__":
    # 4 stride-2 convs -> spatial/16, so D=H=W=16 gives a 1x1x1 final volume.
    B, C, D, H, W = 2, 1, 16, 16, 16
    phase_dim = 1

    key = jax.random.PRNGKey(0)
    k_x, k_p, k_par = jax.random.split(key, 3)
    x = jax.random.normal(k_x, (B, C, D, H, W), jnp.float32)
    phase = jax.random.normal(k_p, (B, phase_dim), jnp.float32)
    params = init_params(k_par, in_channels=C, phase_dim=phase_dim,
                         final_spatial=1)
    kparams = prepare_params(params)                       # one-time repack

    fwd = jax.jit(functools.partial(discriminator_forward,
                                    m_blocks_conv1=_conv1_m_blocks()))
    out = jax.block_until_ready(fwd(kparams, x, phase))

    ref = jax.block_until_ready(reference_forward(params, x, phase))
    assert out.shape == (B, 1), out.shape
    # bf16 MXU operands / bf16 inter-layer activations with f32 accumulation.
    assert jnp.allclose(out, ref, rtol=2e-2, atol=2e-2), (out, ref)

    print("KERNEL_OK")
</pallas_src>

<mosaic_0001>
module attributes {stable_mosaic.version = 11 : i64} {
  func.func @_matmul_bias_act_kernel(%arg0: i32, %arg1: memref<256x512xbf16, #tpu.memory_space<vmem>>, %arg2: memref<512x128xbf16, #tpu.memory_space<vmem>>, %arg3: memref<1x128xf32, #tpu.memory_space<vmem>>, %arg4: memref<256x128xbf16, #tpu.memory_space<vmem>>) attributes {dimension_semantics = [#tpu.dimension_semantics<parallel>], iteration_bounds = array<i64: 1>, scalar_prefetch = 0 : i64, scratch_operands = 0 : i64, tpu.core_type = #tpu.core_type<tc>, window_params = [{transform_indices = @transform_0, window_bounds = array<i64: 256, 512>}, {pipeline_mode = #tpu.pipeline_mode<synchronous>, transform_indices = @transform_1, window_bounds = array<i64: 512, 128>}, {pipeline_mode = #tpu.pipeline_mode<synchronous>, transform_indices = @transform_2, window_bounds = array<i64: 1, 128>}, {transform_indices = @transform_3, window_bounds = array<i64: 256, 128>}]} {
    %c0 = arith.constant 0 : index
    %c0_0 = arith.constant 0 : index
    %0 = vector.load %arg1[%c0, %c0_0] : memref<256x512xbf16, #tpu.memory_space<vmem>>, vector<256x512xbf16>
    %c0_1 = arith.constant 0 : index
    %c0_2 = arith.constant 0 : index
    %1 = vector.load %arg2[%c0_1, %c0_2] : memref<512x128xbf16, #tpu.memory_space<vmem>>, vector<512x128xbf16>
    %cst = arith.constant dense<0.000000e+00> : vector<256x128xf32>
    %2 = tpu.matmul %0, %1, %cst {dimension_numbers = #tpu.dot_dimension_numbers<[1], [0], [0], [1], [0, 0, 1, 1], [], []>} : vector<256x512xbf16>, vector<512x128xbf16>, vector<256x128xf32> -> vector<256x128xf32>
    %c0_3 = arith.constant 0 : index
    %c0_4 = arith.constant 0 : index
    %3 = vector.load %arg3[%c0_3, %c0_4] : memref<1x128xf32, #tpu.memory_space<vmem>>, vector<1x128xf32>
    %4 = vector.broadcast %3 : vector<1x128xf32> to vector<256x128xf32>
    %5 = arith.addf %2, %4 : vector<256x128xf32>
    %cst_5 = arith.constant 0.000000e+00 : f32
    %6 = vector.broadcast %cst_5 : f32 to vector<256x128xf32>
    %7 = arith.cmpf ogt, %5, %6 : vector<256x128xf32>
    %cst_6 = arith.constant 2.000000e-01 : f32
    %8 = vector.broadcast %cst_6 : f32 to vector<256x128xf32>
    %9 = arith.mulf %8, %5 : vector<256x128xf32>
    %10 = arith.select %7, %5, %9 : vector<256x128xi1>, vector<256x128xf32>
    %11 = arith.truncf %10 : vector<256x128xf32> to vector<256x128xbf16>
    %c0_7 = arith.constant 0 : index
    %c0_8 = arith.constant 0 : index
    %12 = vector.load %arg4[%c0_7, %c0_8] : memref<256x128xbf16, #tpu.memory_space<vmem>>, vector<256x128xbf16>
    tpu.vector_store %arg4[%c0_7, %c0_8], %11 {strides = array<i32>} : memref<256x128xbf16, #tpu.memory_space<vmem>>, vector<256x128xbf16>,
    return
  }
  func.func @transform_0(%arg0: i32) -> (i32, i32) {
    %c0_i32 = arith.constant 0 : i32
    %c0_i32_0 = arith.constant 0 : i32
    return %arg0, %c0_i32 : i32, i32
  }
  func.func @transform_1(%arg0: i32) -> (i32, i32) {
    %c0_i32 = arith.constant 0 : i32
    %c0_i32_0 = arith.constant 0 : i32
    %c0_i32_1 = arith.constant 0 : i32
    return %c0_i32, %c0_i32_0 : i32, i32
  }
  func.func @transform_2(%arg0: i32) -> (i32, i32) {
    %c0_i32 = arith.constant 0 : i32
    %c0_i32_0 = arith.constant 0 : i32
    %c0_i32_1 = arith.constant 0 : i32
    return %c0_i32, %c0_i32_0 : i32, i32
  }
  func.func @transform_3(%arg0: i32) -> (i32, i32) {
    %c0_i32 = arith.constant 0 : i32
    %c0_i32_0 = arith.constant 0 : i32
    return %arg0, %c0_i32 : i32, i32
  }
}

module attributes {stable_mosaic.version = 11 : i64} {
  func.func @_matmul_bias_act_kernel(%arg0: i32, %arg1: memref<128x2048xbf16, #tpu.memory_space<vmem>>, %arg2: memref<2048x64xbf16, #tpu.memory_space<vmem>>, %arg3: memref<1x64xf32, #tpu.memory_space<vmem>>, %arg4: memref<128x64xbf16, #tpu.memory_space<vmem>>) attributes {dimension_semantics = [#tpu.dimension_semantics<parallel>], iteration_bounds = array<i64: 1>, scalar_prefetch = 0 : i64, scratch_operands = 0 : i64, tpu.core_type = #tpu.core_type<tc>, window_params = [{transform_indices = @transform_0, window_bounds = array<i64: 128, 2048>}, {pipeline_mode = #tpu.pipeline_mode<synchronous>, transform_indices = @transform_1, window_bounds = array<i64: 2048, 64>}, {pipeline_mode = #tpu.pipeline_mode<synchronous>, transform_indices = @transform_2, window_bounds = array<i64: 1, 64>}, {transform_indices = @transform_3, window_bounds = array<i64: 128, 64>}]} {
    %c0 = arith.constant 0 : index
    %c0_0 = arith.constant 0 : index
    %0 = vector.load %arg1[%c0, %c0_0] : memref<128x2048xbf16, #tpu.memory_space<vmem>>, vector<128x2048xbf16>
    %c0_1 = arith.constant 0 : index
    %c0_2 = arith.constant 0 : index
    %1 = vector.load %arg2[%c0_1, %c0_2] : memref<2048x64xbf16, #tpu.memory_space<vmem>>, vector<2048x64xbf16>
    %cst = arith.constant dense<0.000000e+00> : vector<128x64xf32>
    %2 = tpu.matmul %0, %1, %cst {dimension_numbers = #tpu.dot_dimension_numbers<[1], [0], [0], [1], [0, 0, 1, 1], [], []>} : vector<128x2048xbf16>, vector<2048x64xbf16>, vector<128x64xf32> -> vector<128x64xf32>
    %c0_3 = arith.constant 0 : index
    %c0_4 = arith.constant 0 : index
    %3 = vector.load %arg3[%c0_3, %c0_4] : memref<1x64xf32, #tpu.memory_space<vmem>>, vector<1x64xf32>
    %4 = vector.broadcast %3 : vector<1x64xf32> to vector<128x64xf32>
    %5 = arith.addf %2, %4 : vector<128x64xf32>
    %cst_5 = arith.constant 0.000000e+00 : f32
    %6 = vector.broadcast %cst_5 : f32 to vector<128x64xf32>
    %7 = arith.cmpf ogt, %5, %6 : vector<128x64xf32>
    %cst_6 = arith.constant 2.000000e-01 : f32
    %8 = vector.broadcast %cst_6 : f32 to vector<128x64xf32>
    %9 = arith.mulf %8, %5 : vector<128x64xf32>
    %10 = arith.select %7, %5, %9 : vector<128x64xi1>, vector<128x64xf32>
    %11 = arith.truncf %10 : vector<128x64xf32> to vector<128x64xbf16>
    %c0_7 = arith.constant 0 : index
    %c0_8 = arith.constant 0 : index
    %12 = vector.load %arg4[%c0_7, %c0_8] : memref<128x64xbf16, #tpu.memory_space<vmem>>, vector<128x64xbf16>
    tpu.vector_store %arg4[%c0_7, %c0_8], %11 {strides = array<i32>} : memref<128x64xbf16, #tpu.memory_space<vmem>>, vector<128x64xbf16>,
    return
  }
  func.func @transform_0(%arg0: i32) -> (i32, i32) {
    %c0_i32 = arith.constant 0 : i32
    %c0_i32_0 = arith.constant 0 : i32
    return %arg0, %c0_i32 : i32, i32
  }
  func.func @transform_1(%arg0: i32) -> (i32, i32) {
    %c0_i32 = arith.constant 0 : i32
    %c0_i32_0 = arith.constant 0 : i32
    %c0_i32_1 = arith.constant 0 : i32
    return %c0_i32, %c0_i32_0 : i32, i32
  }
  func.func @transform_2(%arg0: i32) -> (i32, i32) {
    %c0_i32 = arith.constant 0 : i32
    %c0_i32_0 = arith.constant 0 : i32
    %c0_i32_1 = arith.constant 0 : i32
    return %c0_i32, %c0_i32_0 : i32, i32
  }
  func.func @transform_3(%arg0: i32) -> (i32, i32) {
    %c0_i32 = arith.constant 0 : i32
    %c0_i32_0 = arith.constant 0 : i32
    return %arg0, %c0_i32 : i32, i32
  }
}

module attributes {stable_mosaic.version = 11 : i64} {
  func.func @_tail_kernel(%arg0: i32, %arg1: memref<64x4096xbf16, #tpu.memory_space<vmem>>, %arg2: memref<4096x128xbf16, #tpu.memory_space<vmem>>, %arg3: memref<1x128xf32, #tpu.memory_space<vmem>>, %arg4: memref<1024x256xbf16, #tpu.memory_space<vmem>>, %arg5: memref<1x256xf32, #tpu.memory_space<vmem>>, %arg6: memref<1x256xf32, #tpu.memory_space<vmem>>, %arg7: memref<1x1xf32, #tpu.memory_space<smem>>, %arg8: memref<8x1xf32, #tpu.memory_space<vmem>>) attributes {dimension_semantics = [#tpu.dimension_semantics<arbitrary>], iteration_bounds = array<i64: 1>, scalar_prefetch = 0 : i64, scratch_operands = 0 : i64, tpu.core_type = #tpu.core_type<tc>, window_params = [{pipeline_mode = #tpu.pipeline_mode<synchronous>, transform_indices = @transform_0, window_bounds = array<i64: 64, 4096>}, {pipeline_mode = #tpu.pipeline_mode<synchronous>, transform_indices = @transform_1, window_bounds = array<i64: 4096, 128>}, {pipeline_mode = #tpu.pipeline_mode<synchronous>, transform_indices = @transform_2, window_bounds = array<i64: 1, 128>}, {pipeline_mode = #tpu.pipeline_mode<synchronous>, transform_indices = @transform_3, window_bounds = array<i64: 1024, 256>}, {pipeline_mode = #tpu.pipeline_mode<synchronous>, transform_indices = @transform_4, window_bounds = array<i64: 1, 256>}, {pipeline_mode = #tpu.pipeline_mode<synchronous>, transform_indices = @transform_5, window_bounds = array<i64: 1, 256>}, {transform_indices = @transform_6, window_bounds = array<i64: 1, 1>}, {pipeline_mode = #tpu.pipeline_mode<synchronous>, transform_indices = @transform_7, window_bounds = array<i64: 8, 1>}]} {
    %c0 = arith.constant 0 : index
    %c0_0 = arith.constant 0 : index
    %0 = vector.load %arg1[%c0, %c0_0] : memref<64x4096xbf16, #tpu.memory_space<vmem>>, vector<64x4096xbf16>
    %c0_1 = arith.constant 0 : index
    %c0_2 = arith.constant 0 : index
    %1 = vector.load %arg2[%c0_1, %c0_2] : memref<4096x128xbf16, #tpu.memory_space<vmem>>, vector<4096x128xbf16>
    %cst = arith.constant dense<0.000000e+00> : vector<64x128xf32>
    %2 = tpu.matmul %0, %1, %cst {dimension_numbers = #tpu.dot_dimension_numbers<[1], [0], [0], [1], [0, 0, 1, 1], [], []>} : vector<64x4096xbf16>, vector<4096x128xbf16>, vector<64x128xf32> -> vector<64x128xf32>
    %c0_3 = arith.constant 0 : index
    %c0_4 = arith.constant 0 : index
    %3 = vector.load %arg3[%c0_3, %c0_4] : memref<1x128xf32, #tpu.memory_space<vmem>>, vector<1x128xf32>
    %4 = vector.broadcast %3 : vector<1x128xf32> to vector<64x128xf32>
    %5 = arith.addf %2, %4 : vector<64x128xf32>
    %cst_5 = arith.constant 0.000000e+00 : f32
    %6 = vector.broadcast %cst_5 : f32 to vector<64x128xf32>
    %7 = arith.cmpf ogt, %5, %6 : vector<64x128xf32>
    %cst_6 = arith.constant 2.000000e-01 : f32
    %8 = vector.broadcast %cst_6 : f32 to vector<64x128xf32>
    %9 = arith.mulf %8, %5 : vector<64x128xf32>
    %10 = arith.select %7, %5, %9 : vector<64x128xi1>, vector<64x128xf32>
    %cst_7 = arith.constant 0.000000e+00 : f32
    %11 = vector.broadcast %cst_7 : f32 to vector<8x256xf32>
    %12 = vector.extract_strided_slice %10 {offsets = [0, 0], sizes = [8, 128], strides = [1, 1]} : vector<64x128xf32> to vector<8x128xf32>
    %13 = arith.truncf %12 : vector<8x128xf32> to vector<8x128xbf16>
    %c0_8 = arith.constant 0 : index
    %c0_9 = arith.constant 0 : index
    %14 = vector.load %arg4[%c0_8, %c0_9] : memref<1024x256xbf16, #tpu.memory_space<vmem>>, vector<128x256xbf16>
    %cst_10 = arith.constant dense<0.000000e+00> : vector<8x256xf32>
    %15 = tpu.matmul %13, %14, %cst_10 {dimension_numbers = #tpu.dot_dimension_numbers<[1], [0], [0], [1], [0, 0, 1, 1], [], []>} : vector<8x128xbf16>, vector<128x256xbf16>, vector<8x256xf32> -> vector<8x256xf32>
    %16 = arith.addf %11, %15 : vector<8x256xf32>
    %17 = vector.extract_strided_slice %10 {offsets = [8, 0], sizes = [8, 128], strides = [1, 1]} : vector<64x128xf32> to vector<8x128xf32>
    %18 = arith.truncf %17 : vector<8x128xf32> to vector<8x128xbf16>
    %c128 = arith.constant 128 : index
    %c0_11 = arith.constant 0 : index
    %19 = vector.load %arg4[%c128, %c0_11] : memref<1024x256xbf16, #tpu.memory_space<vmem>>, vector<128x256xbf16>
    %cst_12 = arith.constant dense<0.000000e+00> : vector<8x256xf32>
    %20 = tpu.matmul %18, %19, %cst_12 {dimension_numbers = #tpu.dot_dimension_numbers<[1], [0], [0], [1], [0, 0, 1, 1], [], []>} : vector<8x128xbf16>, vector<128x256xbf16>, vector<8x256xf32> -> vector<8x256xf32>
    %21 = arith.addf %16, %20 : vector<8x256xf32>
    %22 = vector.extract_strided_slice %10 {offsets = [16, 0], sizes = [8, 128], strides = [1, 1]} : vector<64x128xf32> to vector<8x128xf32>
    %23 = arith.truncf %22 : vector<8x128xf32> to vector<8x128xbf16>
    %c256 = arith.constant 256 : index
    %c0_13 = arith.constant 0 : index
    %24 = vector.load %arg4[%c256, %c0_13] : memref<1024x256xbf16, #tpu.memory_space<vmem>>, vector<128x256xbf16>
    %cst_14 = arith.constant dense<0.000000e+00> : vector<8x256xf32>
    %25 = tpu.matmul %23, %24, %cst_14 {dimension_numbers = #tpu.dot_dimension_numbers<[1], [0], [0], [1], [0, 0, 1, 1], [], []>} : vector<8x128xbf16>, vector<128x256xbf16>, vector<8x256xf32> -> vector<8x256xf32>
    %26 = arith.addf %21, %25 : vector<8x256xf32>
    %27 = vector.extract_strided_slice %10 {offsets = [24, 0], sizes = [8, 128], strides = [1, 1]} : vector<64x128xf32> to vector<8x128xf32>
    %28 = arith.truncf %27 : vector<8x128xf32> to vector<8x128xbf16>
    %c384 = arith.constant 384 : index
    %c0_15 = arith.constant 0 : index
    %29 = vector.load %arg4[%c384, %c0_15] : memref<1024x256xbf16, #tpu.memory_space<vmem>>, vector<128x256xbf16>
    %cst_16 = arith.constant dense<0.000000e+00> : vector<8x256xf32>
    %30 = tpu.matmul %28, %29, %cst_16 {dimension_numbers = #tpu.dot_dimension_numbers<[1], [0], [0], [1], [0, 0, 1, 1], [], []>} : vector<8x128xbf16>, vector<128x256xbf16>, vector<8x256xf32> -> vector<8x256xf32>
    %31 = arith.addf %26, %30 : vector<8x256xf32>
    %32 = vector.extract_strided_slice %10 {offsets = [32, 0], sizes = [8, 128], strides = [1, 1]} : vector<64x128xf32> to vector<8x128xf32>
    %33 = arith.truncf %32 : vector<8x128xf32> to vector<8x128xbf16>
    %c512 = arith.constant 512 : index
    %c0_17 = arith.constant 0 : index
    %34 = vector.load %arg4[%c512, %c0_17] : memref<1024x256xbf16, #tpu.memory_space<vmem>>, vector<128x256xbf16>
    %cst_18 = arith.constant dense<0.000000e+00> : vector<8x256xf32>
    %35 = tpu.matmul %33, %34, %cst_18 {dimension_numbers = #tpu.dot_dimension_numbers<[1], [0], [0], [1], [0, 0, 1, 1], [], []>} : vector<8x128xbf16>, vector<128x256xbf16>, vector<8x256xf32> -> vector<8x256xf32>
    %36 = arith.addf %31, %35 : vector<8x256xf32>
    %37 = vector.extract_strided_slice %10 {offsets = [40, 0], sizes = [8, 128], strides = [1, 1]} : vector<64x128xf32> to vector<8x128xf32>
    %38 = arith.truncf %37 : vector<8x128xf32> to vector<8x128xbf16>
    %c640 = arith.constant 640 : index
    %c0_19 = arith.constant 0 : index
    %39 = vector.load %arg4[%c640, %c0_19] : memref<1024x256xbf16, #tpu.memory_space<vmem>>, vector<128x256xbf16>
    %cst_20 = arith.constant dense<0.000000e+00> : vector<8x256xf32>
    %40 = tpu.matmul %38, %39, %cst_20 {dimension_numbers = #tpu.dot_dimension_numbers<[1], [0], [0], [1], [0, 0, 1, 1], [], []>} : vector<8x128xbf16>, vector<128x256xbf16>, vector<8x256xf32> -> vector<8x256xf32>
    %41 = arith.addf %36, %40 : vector<8x256xf32>
    %42 = vector.extract_strided_slice %10 {offsets = [48, 0], sizes = [8, 128], strides = [1, 1]} : vector<64x128xf32> to vector<8x128xf32>
    %43 = arith.truncf %42 : vector<8x128xf32> to vector<8x128xbf16>
    %c768 = arith.constant 768 : index
    %c0_21 = arith.constant 0 : index
    %44 = vector.load %arg4[%c768, %c0_21] : memref<1024x256xbf16, #tpu.memory_space<vmem>>, vector<128x256xbf16>
    %cst_22 = arith.constant dense<0.000000e+00> : vector<8x256xf32>
    %45 = tpu.matmul %43, %44, %cst_22 {dimension_numbers = #tpu.dot_dimension_numbers<[1], [0], [0], [1], [0, 0, 1, 1], [], []>} : vector<8x128xbf16>, vector<128x256xbf16>, vector<8x256xf32> -> vector<8x256xf32>
    %46 = arith.addf %41, %45 : vector<8x256xf32>
    %47 = vector.extract_strided_slice %10 {offsets = [56, 0], sizes = [8, 128], strides = [1, 1]} : vector<64x128xf32> to vector<8x128xf32>
    %48 = arith.truncf %47 : vector<8x128xf32> to vector<8x128xbf16>
    %c896 = arith.constant 896 : index
    %c0_23 = arith.constant 0 : index
    %49 = vector.load %arg4[%c896, %c0_23] : memref<1024x256xbf16, #tpu.memory_space<vmem>>, vector<128x256xbf16>
    %cst_24 = arith.constant dense<0.000000e+00> : vector<8x256xf32>
    %50 = tpu.matmul %48, %49, %cst_24 {dimension_numbers = #tpu.dot_dimension_numbers<[1], [0], [0], [1], [0, 0, 1, 1], [], []>} : vector<8x128xbf16>, vector<128x256xbf16>, vector<8x256xf32> -> vector<8x256xf32>
    %51 = arith.addf %46, %50 : vector<8x256xf32>
    %c0_25 = arith.constant 0 : index
    %c0_26 = arith.constant 0 : index
    %52 = vector.load %arg5[%c0_25, %c0_26] : memref<1x256xf32, #tpu.memory_space<vmem>>, vector<1x256xf32>
    %53 = vector.broadcast %52 : vector<1x256xf32> to vector<8x256xf32>
    %54 = arith.addf %51, %53 : vector<8x256xf32>
    %cst_27 = arith.constant 0.000000e+00 : f32
    %55 = vector.broadcast %cst_27 : f32 to vector<8x256xf32>
    %56 = arith.cmpf ogt, %54, %55 : vector<8x256xf32>
    %cst_28 = arith.constant 2.000000e-01 : f32
    %57 = vector.broadcast %cst_28 : f32 to vector<8x256xf32>
    %58 = arith.mulf %57, %54 : vector<8x256xf32>
    %59 = arith.select %56, %54, %58 : vector<8x256xi1>, vector<8x256xf32>
    %c0_29 = arith.constant 0 : index
    %c0_30 = arith.constant 0 : index
    %60 = vector.load %arg6[%c0_29, %c0_30] : memref<1x256xf32, #tpu.memory_space<vmem>>, vector<1x256xf32>
    %61 = vector.broadcast %60 : vector<1x256xf32> to vector<8x256xf32>
    %62 = arith.mulf %59, %61 : vector<8x256xf32>
    %cst_31 = arith.constant dense<0.000000e+00> : vector<8xf32>
    %63 = vector.multi_reduction <add>, %62, %cst_31 [1] : vector<8x256xf32> to vector<8xf32>
    %64 = vector.shape_cast %63 : vector<8xf32> to vector<8x1xf32>
    %c0_32 = arith.constant 0 : index
    %c0_33 = arith.constant 0 : index
    %65 = memref.load %arg7[%c0_32, %c0_33] : memref<1x1xf32, #tpu.memory_space<smem>>
    %66 = vector.broadcast %65 : f32 to vector<8x1xf32>
    %67 = arith.addf %64, %66 : vector<8x1xf32>
    %cst_34 = arith.constant 0.000000e+00 : f32
    %68 = vector.broadcast %cst_34 : f32 to vector<8x1xf32>
    %69 = arith.subf %68, %67 : vector<8x1xf32>
    %70 = math.exp %69 : vector<8x1xf32>
    %cst_35 = arith.constant 1.000000e+00 : f32
    %71 = vector.broadcast %cst_35 : f32 to vector<8x1xf32>
    %72 = arith.addf %71, %70 : vector<8x1xf32>
    %cst_36 = arith.constant 1.000000e+00 : f32
    %73 = vector.broadcast %cst_36 : f32 to vector<8x1xf32>
    %74 = arith.divf %73, %72 : vector<8x1xf32>
    %c0_37 = arith.constant 0 : index
    %c0_38 = arith.constant 0 : index
    %75 = vector.load %arg8[%c0_37, %c0_38] : memref<8x1xf32, #tpu.memory_space<vmem>>, vector<8x1xf32>
    tpu.vector_store %arg8[%c0_37, %c0_38], %74 {strides = array<i32>} : memref<8x1xf32, #tpu.memory_space<vmem>>, vector<8x1xf32>,
    return
  }
  func.func @transform_0(%arg0: i32) -> (i32, i32) {
    %c0_i32 = arith.constant 0 : i32
    %c0_i32_0 = arith.constant 0 : i32
    %c0_i32_1 = arith.constant 0 : i32
    return %c0_i32, %c0_i32_0 : i32, i32
  }
  func.func @transform_1(%arg0: i32) -> (i32, i32) {
    %c0_i32 = arith.constant 0 : i32
    %c0_i32_0 = arith.constant 0 : i32
    %c0_i32_1 = arith.constant 0 : i32
    return %c0_i32, %c0_i32_0 : i32, i32
  }
  func.func @transform_2(%arg0: i32) -> (i32, i32) {
    %c0_i32 = arith.constant 0 : i32
    %c0_i32_0 = arith.constant 0 : i32
    %c0_i32_1 = arith.constant 0 : i32
    return %c0_i32, %c0_i32_0 : i32, i32
  }
  func.func @transform_3(%arg0: i32) -> (i32, i32) {
    %c0_i32 = arith.constant 0 : i32
    %c0_i32_0 = arith.constant 0 : i32
    %c0_i32_1 = arith.constant 0 : i32
    return %c0_i32, %c0_i32_0 : i32, i32
  }
  func.func @transform_4(%arg0: i32) -> (i32, i32) {
    %c0_i32 = arith.constant 0 : i32
    %c0_i32_0 = arith.constant 0 : i32
    %c0_i32_1 = arith.constant 0 : i32
    return %c0_i32, %c0_i32_0 : i32, i32
  }
  func.func @transform_5(%arg0: i32) -> (i32, i32) {
    %c0_i32 = arith.constant 0 : i32
    %c0_i32_0 = arith.constant 0 : i32
    %c0_i32_1 = arith.constant 0 : i32
    return %c0_i32, %c0_i32_0 : i32, i32
  }
  func.func @transform_6(%arg0: i32) -> (i32, i32) {
    %c0_i32 = arith.constant 0 : i32
    %c0_i32_0 = arith.constant 0 : i32
    %c0_i32_1 = arith.constant 0 : i32
    return %c0_i32, %c0_i32_0 : i32, i32
  }
  func.func @transform_7(%arg0: i32) -> (i32, i32) {
    %c0_i32 = arith.constant 0 : i32
    %c0_i32_0 = arith.constant 0 : i32
    %c0_i32_1 = arith.constant 0 : i32
    return %c0_i32, %c0_i32_0 : i32, i32
  }
}

</mosaic_0001>

<bundles_post_ra>
// kernel: discriminator_forward.3
= control target key start
LH: loop header
LB: loop body
LE: loop exit
PB: predicated region body
PF: predicated region fallthrough
CT: control target
= control target key end

     0   :  { %s2245_s1 = inlined_call_operand.vmem [shape: bf16[512,128], index: 1, kind: input, shape index: {}]   ;;  %s2246_s0 = inlined_call_operand.vmem [shape: bf16[256,512], index: 0, kind: input, shape index: {}]   ;;  %s2247_s2 = inlined_call_operand.vmem [shape: f32[1,128], index: 2, kind: input, shape index: {}]   ;;  %s2248_s3 = inlined_call_operand.vmem [shape: bf16[256,128], index: 3, kind: output, shape index: {}]  }
   0x1   :  { %v1724_v0 = vld [vmem:[%s2245_s1 + $0x40] sm:$0xff]   ;;  %v1728_v4 = vld [vmem:[%s2245_s1 + $0x48] sm:$0xff]   ;;  %v1732_v8 = vld [vmem:[%s2245_s1 + $0x50] sm:$0xff]  }
   0x2   :  { %v1725_v1 = vld [vmem:[%s2245_s1 + $0xc0] sm:$0xff]   ;;  %1500 = vmatprep.subr.bf16.mxu0 %v1724_v0  ;;  %v1729_v5 = vld [vmem:[%s2245_s1 + $0xc8] sm:$0xff]   ;;  %v1733_v9 = vld [vmem:[%s2245_s1 + $0xd0] sm:$0xff]  }
   0x3   :  { %v1726_v2 = vld [vmem:[%s2245_s1] sm:$0xff]   ;;  %1612 = vmatprep.subr.bf16.mxu1 %v1725_v1  ;;  %v1730_v6 = vld [vmem:[%s2245_s1 + $0x8] sm:$0xff]   ;;  %v1734_v10 = vld [vmem:[%s2245_s1 + $0x10] sm:$0xff]  }
   0x4   :  { %v1727_v3 = vld [vmem:[%s2245_s1 + $0x80] sm:$0xff]   ;;  %1501 = vmatpush3.bf16.msra.mxu0 %v1726_v2  ;;  %v1731_v7 = vld [vmem:[%s2245_s1 + $0x88] sm:$0xff]   ;;  %v1735_v11 = vld [vmem:[%s2245_s1 + $0x90] sm:$0xff]  }
   0x5   :  { %1613 = vmatpush3.bf16.msra.mxu1 %v1727_v3  ;;  %1502 = vmatprep.subr.bf16.mxu0 %v1728_v4  ;;  %v1736_v12 = vld [vmem:[%s2245_s1 + $0x58] sm:$0xff]   ;;  %v1740_v16 = vld [vmem:[%s2245_s1 + $0x60] sm:$0xff]   ;;  %v1744_v20 = vld [vmem:[%s2245_s1 + $0x68] sm:$0xff]  }
   0x6   :  { %1614 = vmatprep.subr.bf16.mxu1 %v1729_v5  ;;  %v1737_v13 = vld [vmem:[%s2245_s1 + $0xd8] sm:$0xff]   ;;  %v1741_v17 = vld [vmem:[%s2245_s1 + $0xe0] sm:$0xff]   ;;  %v1745_v21 = vld [vmem:[%s2245_s1 + $0xe8] sm:$0xff]  }
   0x7   :  { %v1738_v14 = vld [vmem:[%s2245_s1 + $0x18] sm:$0xff]   ;;  %v1742_v18 = vld [vmem:[%s2245_s1 + $0x20] sm:$0xff]   ;;  %v1746_v22 = vld [vmem:[%s2245_s1 + $0x28] sm:$0xff]  }
   0x8   :  { %1503 = vmatpush3.bf16.msra.mxu0 %v1730_v6  ;;  %v1739_v15 = vld [vmem:[%s2245_s1 + $0x98] sm:$0xff]   ;;  %v1743_v19 = vld [vmem:[%s2245_s1 + $0xa0] sm:$0xff]   ;;  %v1747_v23 = vld [vmem:[%s2245_s1 + $0xa8] sm:$0xff]  }
   0x9   :  { %1615 = vmatpush3.bf16.msra.mxu1 %v1731_v7  ;;  %1504 = vmatprep.subr.bf16.mxu0 %v1732_v8  ;;  %v1748_v24 = vld [vmem:[%s2245_s1 + $0x70] sm:$0xff]   ;;  %v1752_v28 = vld [vmem:[%s2245_s1 + $0x78] sm:$0xff]  }
   0xa   :  { %1616 = vmatprep.subr.bf16.mxu1 %v1733_v9  ;;  %v1749_v25 = vld [vmem:[%s2245_s1 + $0xf0] sm:$0xff]   ;;  %v1753_v29 = vld [vmem:[%s2245_s1 + $0xf8] sm:$0xff]  }
   0xb   :  { %v1750_v26 = vld [vmem:[%s2245_s1 + $0x30] sm:$0xff]   ;;  %v1754_v30 = vld [vmem:[%s2245_s1 + $0x38] sm:$0xff]  }
   0xc   :  { %1505 = vmatpush3.bf16.msra.mxu0 %v1734_v10  ;;  %v1751_v27 = vld [vmem:[%s2245_s1 + $0xb0] sm:$0xff]   ;;  %v1755_v31 = vld [vmem:[%s2245_s1 + $0xb8] sm:$0xff]  }
   0xd   :  { %1617 = vmatpush3.bf16.msra.mxu1 %v1735_v11  ;;  %1506 = vmatprep.subr.bf16.mxu0 %v1736_v12  ;;  %v1756_v32 = vld [vmem:[%s2246_s0] ss:$16 sps:$4 sm:$0xff]   ;;  %v1758_v33 = vld [vmem:[%s2246_s0 + $0x4] ss:$16 sps:$4 sm:$0xff]   ;;  %v1759_v34 = vld [vmem:[%s2246_s0 + $0x8] ss:$16 sps:$4 sm:$0xff]  }
   0xe   :  { %1618 = vmatprep.subr.bf16.mxu1 %v1737_v13  ;;  %v1761_v35 = vld [vmem:[%s2246_s0 + $0xc] ss:$16 sps:$4 sm:$0xff]   ;;  %694 = vmatprep.mubr.bf16.mxu0 %v1758_v33  ;;  %v1762_v36 = vld [vmem:[%s2246_s0 + $0x24] ss:$16 sps:$4 sm:$0xff]   ;;  %v1766_v38 = vld [vmem:[%s2246_s0 + $0x20] ss:$16 sps:$4 sm:$0xff]  }
   0xf   :  { %855 = vmatprep.mubr.bf16.mxu1 %v1761_v35  ;;  %v1764_v37 = vld [vmem:[%s2246_s0 + $0x2c] ss:$16 sps:$4 sm:$0xff]   ;;  %v1767_v39 = vld [vmem:[%s2246_s0 + $0x28] ss:$16 sps:$4 sm:$0xff]   ;;  %v1768_v40 = vld [vmem:[%s2246_s0 + $0x44] ss:$16 sps:$4 sm:$0xff]  }
  0x10   :  { %1507 = vmatpush3.bf16.msra.mxu0 %v1738_v14  ;;  %v1770_v41 = vld [vmem:[%s2246_s0 + $0x4c] ss:$16 sps:$4 sm:$0xff]   ;;  %v1772_v42 = vld [vmem:[%s2246_s0 + $0x40] ss:$16 sps:$4 sm:$0xff]   ;;  %v1773_v43 = vld [vmem:[%s2246_s0 + $0x48] ss:$16 sps:$4 sm:$0xff]  }
  0x11   :  { %1619 = vmatpush3.bf16.msra.mxu1 %v1739_v15  ;;  %1508 = vmatprep.subr.bf16.mxu0 %v1740_v16  ;;  %v1774_v44 = vld [vmem:[%s2246_s0 + $0x64] ss:$16 sps:$4 sm:$0xff]   ;;  %v1776_v45 = vld [vmem:[%s2246_s0 + $0x6c] ss:$16 sps:$4 sm:$0xff]   ;;  %v1778_v46 = vld [vmem:[%s2246_s0 + $0x60] ss:$16 sps:$4 sm:$0xff]  }
  0x12   :  { %1620 = vmatprep.subr.bf16.mxu1 %v1741_v17  ;;  %v1779_v47 = vld [vmem:[%s2246_s0 + $0x68] ss:$16 sps:$4 sm:$0xff]   ;;  %v1780_v48 = vld [vmem:[%s2246_s0 + $0x84] ss:$16 sps:$4 sm:$0xff]   ;;  %v1782_v49 = vld [vmem:[%s2246_s0 + $0x8c] ss:$16 sps:$4 sm:$0xff]  }
  0x13   :  { %v1784_v50 = vld [vmem:[%s2246_s0 + $0x80] ss:$16 sps:$4 sm:$0xff]   ;;  %v1785_v51 = vld [vmem:[%s2246_s0 + $0x88] ss:$16 sps:$4 sm:$0xff]   ;;  %v1786_v52 = vld [vmem:[%s2246_s0 + $0xa4] ss:$16 sps:$4 sm:$0xff]  }
  0x14   :  { %1509 = vmatpush3.bf16.msra.mxu0 %v1742_v18  ;;  %v1788_v53 = vld [vmem:[%s2246_s0 + $0xac] ss:$16 sps:$4 sm:$0xff]   ;;  %v1790_v54 = vld [vmem:[%s2246_s0 + $0xa0] ss:$16 sps:$4 sm:$0xff]   ;;  %v1791_v55 = vld [vmem:[%s2246_s0 + $0xa8] ss:$16 sps:$4 sm:$0xff]  }
  0x15   :  { %1621 = vmatpush3.bf16.msra.mxu1 %v1743_v19  ;;  %1510 = vmatprep.subr.bf16.mxu0 %v1744_v20  ;;  %v1792_v56 = vld [vmem:[%s2246_s0 + $0xc4] ss:$16 sps:$4 sm:$0xff]   ;;  %v1794_v57 = vld [vmem:[%s2246_s0 + $0xcc] ss:$16 sps:$4 sm:$0xff]   ;;  %v1796_v58 = vld [vmem:[%s2246_s0 + $0xc0] ss:$16 sps:$4 sm:$0xff]  }
  0x16   :  { %1622 = vmatprep.subr.bf16.mxu1 %v1745_v21  ;;  %v1797_v59 = vld [vmem:[%s2246_s0 + $0xc8] ss:$16 sps:$4 sm:$0xff]   ;;  %v1798_v60 = vld [vmem:[%s2246_s0 + $0xe4] ss:$16 sps:$4 sm:$0xff]   ;;  %v1800_v61 = vld [vmem:[%s2246_s0 + $0xec] ss:$16 sps:$4 sm:$0xff]  }
  0x17   :  { %v1802_v62 = vld [vmem:[%s2246_s0 + $0xe0] ss:$16 sps:$4 sm:$0xff]   ;;  %v1803_v63 = vld [vmem:[%s2246_s0 + $0xe8] ss:$16 sps:$4 sm:$0xff]   ;;  %v1804_v0 = vld [vmem:[%s2246_s0 + $0x104] ss:$16 sps:$4 sm:$0xff]  }
  0x18   :  { %1511 = vmatpush3.bf16.msra.mxu0 %v1746_v22  ;;  %v1806_v1 = vld [vmem:[%s2246_s0 + $0x10c] ss:$16 sps:$4 sm:$0xff]   ;;  %v1808_v2 = vld [vmem:[%s2246_s0 + $0x100] ss:$16 sps:$4 sm:$0xff]   ;;  %v1809_v3 = vld [vmem:[%s2246_s0 + $0x108] ss:$16 sps:$4 sm:$0xff]  }
  0x19   :  { %1623 = vmatpush3.bf16.msra.mxu1 %v1747_v23  ;;  %1512 = vmatprep.subr.bf16.mxu0 %v1748_v24  ;;  %v1810_v4 = vld [vmem:[%s2246_s0 + $0x124] ss:$16 sps:$4 sm:$0xff]   ;;  %v1812_v5 = vld [vmem:[%s2246_s0 + $0x12c] ss:$16 sps:$4 sm:$0xff]   ;;  %v1814_v6 = vld [vmem:[%s2246_s0 + $0x120] ss:$16 sps:$4 sm:$0xff]  }
  0x1a   :  { %1624 = vmatprep.subr.bf16.mxu1 %v1749_v25  ;;  %v1815_v7 = vld [vmem:[%s2246_s0 + $0x128] ss:$16 sps:$4 sm:$0xff]   ;;  %v1816_v8 = vld [vmem:[%s2246_s0 + $0x144] ss:$16 sps:$4 sm:$0xff]   ;;  %v1818_v9 = vld [vmem:[%s2246_s0 + $0x14c] ss:$16 sps:$4 sm:$0xff]  }
  0x1b   :  { %v1820_v10 = vld [vmem:[%s2246_s0 + $0x140] ss:$16 sps:$4 sm:$0xff]   ;;  %v1821_v11 = vld [vmem:[%s2246_s0 + $0x148] ss:$16 sps:$4 sm:$0xff]   ;;  %v1822_v12 = vld [vmem:[%s2246_s0 + $0x164] ss:$16 sps:$4 sm:$0xff]  }
  0x1c   :  { %1513 = vmatpush3.bf16.msra.mxu0 %v1750_v26  ;;  %v1824_v13 = vld [vmem:[%s2246_s0 + $0x16c] ss:$16 sps:$4 sm:$0xff]   ;;  %v1826_v14 = vld [vmem:[%s2246_s0 + $0x160] ss:$16 sps:$4 sm:$0xff]   ;;  %v1827_v15 = vld [vmem:[%s2246_s0 + $0x168] ss:$16 sps:$4 sm:$0xff]  }
  0x1d   :  { %1625 = vmatpush3.bf16.msra.mxu1 %v1751_v27  ;;  %1514 = vmatprep.subr.bf16.mxu0 %v1752_v28  ;;  %v1828_v16 = vld [vmem:[%s2246_s0 + $0x184] ss:$16 sps:$4 sm:$0xff]   ;;  %v1830_v17 = vld [vmem:[%s2246_s0 + $0x18c] ss:$16 sps:$4 sm:$0xff]   ;;  %v1832_v18 = vld [vmem:[%s2246_s0 + $0x180] ss:$16 sps:$4 sm:$0xff]  }
  0x1e   :  { %1626 = vmatprep.subr.bf16.mxu1 %v1753_v29  ;;  %v1833_v19 = vld [vmem:[%s2246_s0 + $0x188] ss:$16 sps:$4 sm:$0xff]   ;;  %v1834_v20 = vld [vmem:[%s2246_s0 + $0x1a4] ss:$16 sps:$4 sm:$0xff]   ;;  %v1836_v21 = vld [vmem:[%s2246_s0 + $0x1ac] ss:$16 sps:$4 sm:$0xff]  }
  0x1f   :  { %v1838_v22 = vld [vmem:[%s2246_s0 + $0x1a0] ss:$16 sps:$4 sm:$0xff]   ;;  %v1839_v23 = vld [vmem:[%s2246_s0 + $0x1a8] ss:$16 sps:$4 sm:$0xff]   ;;  %v1840_v24 = vld [vmem:[%s2246_s0 + $0x1c4] ss:$16 sps:$4 sm:$0xff]  }
  0x20   :  { %1515 = vmatpush3.bf16.msra.mxu0 %v1754_v30  ;;  %v1842_v25 = vld [vmem:[%s2246_s0 + $0x1cc] ss:$16 sps:$4 sm:$0xff]   ;;  %v1844_v26 = vld [vmem:[%s2246_s0 + $0x1c0] ss:$16 sps:$4 sm:$0xff]   ;;  %v1845_v27 = vld [vmem:[%s2246_s0 + $0x1c8] ss:$16 sps:$4 sm:$0xff]  }
  0x21   :  { %1627 = vmatpush3.bf16.msra.mxu1 %v1755_v31  ;;  %v1846_v28 = vld [vmem:[%s2246_s0 + $0x1e4] ss:$16 sps:$4 sm:$0xff]   ;;  %v1848_v29 = vld [vmem:[%s2246_s0 + $0x1ec] ss:$16 sps:$4 sm:$0xff]   ;;  %v1850_v30 = vld [vmem:[%s2246_s0 + $0x1e0] ss:$16 sps:$4 sm:$0xff]  }
  0x22   :  { %v1851_v31 = vld [vmem:[%s2246_s0 + $0x1e8] ss:$16 sps:$4 sm:$0xff]  }
  0x23   :  { %695 = vmatmul.mubr.bf16.vlgmr.msra.gmra.mrb[0].mxu0 %v1756_v32 }
  0x24   :  { %856 = vmatmul.mubr.bf16.vlgmr.msra.gmra.mrb[0].mxu1 %v1759_v34  ;;  %702 = vmatprep.mubr.bf16.mxu0 %v1762_v36  ;;  %v2163_v34 = vld [vmem:[%s2247_s2] ss:$0 sm:$0xff] }
  0x25   :  { %863 = vmatprep.mubr.bf16.mxu1 %v1764_v37 }
  0x2b   :  { %703 = vmatmul.mubr.bf16.gmra.mrb[4].mxu0 %v1766_v38 }
  0x2c   :  { %864 = vmatmul.mubr.bf16.gmra.mrb[4].mxu1 %v1767_v39  ;;  %710 = vmatprep.mubr.bf16.mxu0 %v1768_v40 }
  0x2d   :  { %871 = vmatprep.mubr.bf16.mxu1 %v1770_v41 }
  0x33   :  { %711 = vmatmul.mubr.bf16.gmra.mrb[8].mxu0 %v1772_v42 }
  0x34   :  { %872 = vmatmul.mubr.bf16.gmra.mrb[8].mxu1 %v1773_v43  ;;  %718 = vmatprep.mubr.bf16.mxu0 %v1774_v44 }
  0x35   :  { %879 = vmatprep.mubr.bf16.mxu1 %v1776_v45 }
  0x3b   :  { %719 = vmatmul.mubr.bf16.gmra.mrb[12].mxu0 %v1778_v46 }
  0x3c   :  { %880 = vmatmul.mubr.bf16.gmra.mrb[12].mxu1 %v1779_v47  ;;  %726 = vmatprep.mubr.bf16.mxu0 %v1780_v48 }
  0x3d   :  { %887 = vmatprep.mubr.bf16.mxu1 %v1782_v49 }
  0x43   :  { %727 = vmatmul.mubr.bf16.gmra.mrb[16].mxu0 %v1784_v50 }
  0x44   :  { %888 = vmatmul.mubr.bf16.gmra.mrb[16].mxu1 %v1785_v51  ;;  %734 = vmatprep.mubr.bf16.mxu0 %v1786_v52 }
  0x45   :  { %895 = vmatprep.mubr.bf16.mxu1 %v1788_v53 }
  0x4b   :  { %735 = vmatmul.mubr.bf16.gmra.mrb[20].mxu0 %v1790_v54 }
  0x4c   :  { %896 = vmatmul.mubr.bf16.gmra.mrb[20].mxu1 %v1791_v55  ;;  %742 = vmatprep.mubr.bf16.mxu0 %v1792_v56 }
  0x4d   :  { %903 = vmatprep.mubr.bf16.mxu1 %v1794_v57 }
  0x53   :  { %743 = vmatmul.mubr.bf16.gmra.mrb[24].mxu0 %v1796_v58 }
  0x54   :  { %904 = vmatmul.mubr.bf16.gmra.mrb[24].mxu1 %v1797_v59  ;;  %750 = vmatprep.mubr.bf16.mxu0 %v1798_v60 }
  0x55   :  { %911 = vmatprep.mubr.bf16.mxu1 %v1800_v61 }
  0x5b   :  { %751 = vmatmul.mubr.bf16.gmra.mrb[28].mxu0 %v1802_v62 }
  0x5c   :  { %912 = vmatmul.mubr.bf16.gmra.mrb[28].mxu1 %v1803_v63  ;;  %758 = vmatprep.mubr.bf16.mxu0 %v1804_v0 }
  0x5d   :  { %919 = vmatprep.mubr.bf16.mxu1 %v1806_v1 }
  0x63   :  { %759 = vmatmul.mubr.bf16.gmra.mrb[32].mxu0 %v1808_v2 }
  0x64   :  { %920 = vmatmul.mubr.bf16.gmra.mrb[32].mxu1 %v1809_v3  ;;  %766 = vmatprep.mubr.bf16.mxu0 %v1810_v4 }
  0x65   :  { %927 = vmatprep.mubr.bf16.mxu1 %v1812_v5 }
  0x6b   :  { %767 = vmatmul.mubr.bf16.gmra.mrb[36].mxu0 %v1814_v6 }
  0x6c   :  { %928 = vmatmul.mubr.bf16.gmra.mrb[36].mxu1 %v1815_v7  ;;  %774 = vmatprep.mubr.bf16.mxu0 %v1816_v8 }
  0x6d   :  { %935 = vmatprep.mubr.bf16.mxu1 %v1818_v9 }
  0x73   :  { %775 = vmatmul.mubr.bf16.gmra.mrb[40].mxu0 %v1820_v10 }
  0x74   :  { %936 = vmatmul.mubr.bf16.gmra.mrb[40].mxu1 %v1821_v11  ;;  %782 = vmatprep.mubr.bf16.mxu0 %v1822_v12 }
  0x75   :  { %943 = vmatprep.mubr.bf16.mxu1 %v1824_v13 }
  0x7b   :  { %783 = vmatmul.mubr.bf16.gmra.mrb[44].mxu0 %v1826_v14 }
  0x7c   :  { %944 = vmatmul.mubr.bf16.gmra.mrb[44].mxu1 %v1827_v15  ;;  %790 = vmatprep.mubr.bf16.mxu0 %v1828_v16 }
  0x7d   :  { %951 = vmatprep.mubr.bf16.mxu1 %v1830_v17 }
  0x83   :  { %791 = vmatmul.mubr.bf16.gmra.mrb[48].mxu0 %v1832_v18 }
  0x84   :  { %952 = vmatmul.mubr.bf16.gmra.mrb[48].mxu1 %v1833_v19  ;;  %798 = vmatprep.mubr.bf16.mxu0 %v1834_v20 }
  0x85   :  { %959 = vmatprep.mubr.bf16.mxu1 %v1836_v21 }
  0x8b   :  { %799 = vmatmul.mubr.bf16.gmra.mrb[52].mxu0 %v1838_v22 }
  0x8c   :  { %960 = vmatmul.mubr.bf16.gmra.mrb[52].mxu1 %v1839_v23  ;;  %806 = vmatprep.mubr.bf16.mxu0 %v1840_v24 }
  0x8d   :  { %967 = vmatprep.mubr.bf16.mxu1 %v1842_v25 }
  0x93   :  { %807 = vmatmul.mubr.bf16.gmra.mrb[56].mxu0 %v1844_v26 }
  0x94   :  { %968 = vmatmul.mubr.bf16.gmra.mrb[56].mxu1 %v1845_v27  ;;  %814 = vmatprep.mubr.bf16.mxu0 %v1846_v28 }
  0x95   :  { %975 = vmatprep.mubr.bf16.mxu1 %v1848_v29 }
  0x9b   :  { %815 = vmatmul.mubr.bf16.gmra.mrb[60].mxu0 %v1850_v30 }
  0x9c   :  { %976 = vmatmul.mubr.bf16.gmra.mrb[60].mxu1 %v1851_v31 }
  0xf6   :  { %v1516_v32 = vpop.f32.mrb[0].mxu0 }
  0xf7   :  { %v1628_v33 = vpop.f32.mrb[0].mxu1  ;;  %v1517_v35 = vpop.f32.mrb[1].mxu0 }
  0xf8   :  { %v1518_v36 = vadd.f32 %v1517_v35, %v1516_v32  ;;  %v1629_v37 = vpop.f32.mrb[1].mxu1  ;;  %v1519_v38 = vpop.f32.mrb[2].mxu0 }
  0xf9   :  { %v1630_v39 = vadd.f32 %v1629_v37, %v1628_v33  ;;  %v1631_v40 = vpop.f32.mrb[2].mxu1  ;;  %v1520_v41 = vpop.f32.mrb[3].mxu0 }
  0xfa   :  { %v697_v42 = vadd.f32 %v1518_v36, %v2163_v34  ;;  %v1521_v43 = vadd.f32 %v1520_v41, %v1519_v38  ;;  %v1632_v44 = vpop.f32.mrb[3].mxu1 }
  0xfb   :  { %v1633_v45 = vadd.f32 %v1632_v44, %v1631_v40 }
  0xfc   :  { %v858_v46 = vadd.f32 %v1630_v39, %v697_v42  ;;  %v700_v47 = vadd.f32 %v1521_v43, %v2163_v34 }
  0xfe   :  { %v1016_v48 = vmul.f32 0.2, %v858_v46  ;;  %v861_v49 = vadd.f32 %v1633_v45, %v700_v47  ;;  %v1522_v50 = vpop.f32.mrb[4].mxu0  ;;  %vm984_vm0 = vcmp.gt.f32.partialorder %v858_v46, 0.0 }
  0xff   :  { %v1634_v51 = vpop.f32.mrb[4].mxu1  ;;  %v1523_v52 = vpop.f32.mrb[5].mxu0 }
 0x100   :  { %vm985_vm1 = vcmp.gt.f32.partialorder %v861_v49, 0.0  ;;  %v1017_v53 = vmul.f32 0.2, %v861_v49  ;;  %v1524_v54 = vadd.f32 %v1523_v52, %v1522_v50  ;;  %v1635_v55 = vpop.f32.mrb[5].mxu1  ;;  %v1525_v56 = vpop.f32.mrb[6].mxu0  ;;  %v1048_v60 = vsel %vm984_vm0, %v858_v46, %v1016_v48 }
 0x101   :  { %v1636_v57 = vadd.f32 %v1635_v55, %v1634_v51  ;;  %v1637_v58 = vpop.f32.mrb[6].mxu1  ;;  %v1526_v59 = vpop.f32.mrb[7].mxu0 }
 0x102   :  { %v1049_v61 = vsel %vm985_vm1, %v861_v49, %v1017_v53  ;;  %v705_v62 = vadd.f32 %v1524_v54, %v2163_v34  ;;  %v1527_v63 = vadd.f32 %v1526_v59, %v1525_v56  ;;  %v1638_v0 = vpop.f32.mrb[7].mxu1 }
 0x103   :  { %v1408_v1 = vpack.c.bf16 %v1049_v61, %v1048_v60  ;;  %v1639_v2 = vadd.f32 %v1638_v0, %v1637_v58 }
 0x104   :  { %v866_v3 = vadd.f32 %v1636_v57, %v705_v62  ;;  %v708_v4 = vadd.f32 %v1527_v63, %v2163_v34 }
 0x105   :  { %1409 = vst [vmem:[%s2248_s3] sm:$0xff] %v1408_v1  }
 0x106   :  { %v1018_v5 = vmul.f32 0.2, %v866_v3  ;;  %v869_v6 = vadd.f32 %v1639_v2, %v708_v4  ;;  %v1528_v7 = vpop.f32.mrb[8].mxu0  ;;  %vm986_vm2 = vcmp.gt.f32.partialorder %v866_v3, 0.0 }
 0x107   :  { %v1640_v8 = vpop.f32.mrb[8].mxu1  ;;  %v1529_v9 = vpop.f32.mrb[9].mxu0 }
 0x108   :  { %vm987_vm3 = vcmp.gt.f32.partialorder %v869_v6, 0.0  ;;  %v1019_v10 = vmul.f32 0.2, %v869_v6  ;;  %v1530_v11 = vadd.f32 %v1529_v9, %v1528_v7  ;;  %v1641_v12 = vpop.f32.mrb[9].mxu1  ;;  %v1531_v13 = vpop.f32.mrb[10].mxu0  ;;  %v1050_v17 = vsel %vm986_vm2, %v866_v3, %v1018_v5 }
 0x109   :  { %v1642_v14 = vadd.f32 %v1641_v12, %v1640_v8  ;;  %v1643_v15 = vpop.f32.mrb[10].mxu1  ;;  %v1532_v16 = vpop.f32.mrb[11].mxu0 }
 0x10a   :  { %v1051_v18 = vsel %vm987_vm3, %v869_v6, %v1019_v10  ;;  %v713_v19 = vadd.f32 %v1530_v11, %v2163_v34  ;;  %v1533_v20 = vadd.f32 %v1532_v16, %v1531_v13  ;;  %v1644_v21 = vpop.f32.mrb[11].mxu1 }
 0x10b   :  { %v1413_v22 = vpack.c.bf16 %v1051_v18, %v1050_v17  ;;  %v1645_v23 = vadd.f32 %v1644_v21, %v1643_v15 }
 0x10c   :  { %v874_v24 = vadd.f32 %v1642_v14, %v713_v19  ;;  %v716_v25 = vadd.f32 %v1533_v20, %v2163_v34 }
 0x10d   :  { %1485 = vst [vmem:[%s2248_s3 + $0x8] sm:$0xff] %v1413_v22  }
 0x10e   :  { %v1020_v26 = vmul.f32 0.2, %v874_v24  ;;  %v877_v27 = vadd.f32 %v1645_v23, %v716_v25  ;;  %v1534_v28 = vpop.f32.mrb[12].mxu0  ;;  %vm988_vm4 = vcmp.gt.f32.partialorder %v874_v24, 0.0 }
 0x10f   :  { %v1646_v29 = vpop.f32.mrb[12].mxu1  ;;  %v1535_v30 = vpop.f32.mrb[13].mxu0 }
 0x110   :  { %vm989_vm5 = vcmp.gt.f32.partialorder %v877_v27, 0.0  ;;  %v1021_v31 = vmul.f32 0.2, %v877_v27  ;;  %v1536_v32 = vadd.f32 %v1535_v30, %v1534_v28  ;;  %v1647_v33 = vpop.f32.mrb[13].mxu1  ;;  %v1537_v35 = vpop.f32.mrb[14].mxu0  ;;  %v1052_v39 = vsel %vm988_vm4, %v874_v24, %v1020_v26 }
 0x111   :  { %v1648_v36 = vadd.f32 %v1647_v33, %v1646_v29  ;;  %v1649_v37 = vpop.f32.mrb[14].mxu1  ;;  %v1538_v38 = vpop.f32.mrb[15].mxu0 }
 0x112   :  { %v1053_v40 = vsel %vm989_vm5, %v877_v27, %v1021_v31  ;;  %v721_v41 = vadd.f32 %v1536_v32, %v2163_v34  ;;  %v1539_v42 = vadd.f32 %v1538_v38, %v1537_v35  ;;  %v1650_v43 = vpop.f32.mrb[15].mxu1 }
 0x113   :  { %v1418_v44 = vpack.c.bf16 %v1053_v40, %v1052_v39  ;;  %v1651_v45 = vadd.f32 %v1650_v43, %v1649_v37 }
 0x114   :  { %v882_v46 = vadd.f32 %v1648_v36, %v721_v41  ;;  %v724_v47 = vadd.f32 %v1539_v42, %v2163_v34 }
 0x115   :  { %1486 = vst [vmem:[%s2248_s3 + $0x10] sm:$0xff] %v1418_v44  }
 0x116   :  { %v1022_v48 = vmul.f32 0.2, %v882_v46  ;;  %v885_v49 = vadd.f32 %v1651_v45, %v724_v47  ;;  %v1540_v50 = vpop.f32.mrb[16].mxu0  ;;  %vm990_vm6 = vcmp.gt.f32.partialorder %v882_v46, 0.0 }
 0x117   :  { %v1652_v51 = vpop.f32.mrb[16].mxu1  ;;  %v1541_v52 = vpop.f32.mrb[17].mxu0 }
 0x118   :  { %vm991_vm7 = vcmp.gt.f32.partialorder %v885_v49, 0.0  ;;  %v1023_v53 = vmul.f32 0.2, %v885_v49  ;;  %v1542_v54 = vadd.f32 %v1541_v52, %v1540_v50  ;;  %v1653_v55 = vpop.f32.mrb[17].mxu1  ;;  %v1543_v56 = vpop.f32.mrb[18].mxu0  ;;  %v1054_v60 = vsel %vm990_vm6, %v882_v46, %v1022_v48 }
 0x119   :  { %v1654_v57 = vadd.f32 %v1653_v55, %v1652_v51  ;;  %v1655_v58 = vpop.f32.mrb[18].mxu1  ;;  %v1544_v59 = vpop.f32.mrb[19].mxu0 }
 0x11a   :  { %v1055_v61 = vsel %vm991_vm7, %v885_v49, %v1023_v53  ;;  %v729_v62 = vadd.f32 %v1542_v54, %v2163_v34  ;;  %v1545_v63 = vadd.f32 %v1544_v59, %v1543_v56  ;;  %v1656_v0 = vpop.f32.mrb[19].mxu1 }
 0x11b   :  { %v1423_v1 = vpack.c.bf16 %v1055_v61, %v1054_v60  ;;  %v1657_v2 = vadd.f32 %v1656_v0, %v1655_v58 }
 0x11c   :  { %v890_v3 = vadd.f32 %v1654_v57, %v729_v62  ;;  %v732_v4 = vadd.f32 %v1545_v63, %v2163_v34 }
 0x11d   :  { %1487 = vst [vmem:[%s2248_s3 + $0x18] sm:$0xff] %v1423_v1  }
 0x11e   :  { %v1024_v5 = vmul.f32 0.2, %v890_v3  ;;  %v893_v6 = vadd.f32 %v1657_v2, %v732_v4  ;;  %v1546_v7 = vpop.f32.mrb[20].mxu0  ;;  %vm992_vm8 = vcmp.gt.f32.partialorder %v890_v3, 0.0 }
 0x11f   :  { %v1658_v8 = vpop.f32.mrb[20].mxu1  ;;  %v1547_v9 = vpop.f32.mrb[21].mxu0 }
 0x120   :  { %vm993_vm9 = vcmp.gt.f32.partialorder %v893_v6, 0.0  ;;  %v1025_v10 = vmul.f32 0.2, %v893_v6  ;;  %v1548_v11 = vadd.f32 %v1547_v9, %v1546_v7  ;;  %v1659_v12 = vpop.f32.mrb[21].mxu1  ;;  %v1549_v13 = vpop.f32.mrb[22].mxu0  ;;  %v1056_v17 = vsel %vm992_vm8, %v890_v3, %v1024_v5 }
 0x121   :  { %v1660_v14 = vadd.f32 %v1659_v12, %v1658_v8  ;;  %v1661_v15 = vpop.f32.mrb[22].mxu1  ;;  %v1550_v16 = vpop.f32.mrb[23].mxu0 }
 0x122   :  { %v1057_v18 = vsel %vm993_vm9, %v893_v6, %v1025_v10  ;;  %v737_v19 = vadd.f32 %v1548_v11, %v2163_v34  ;;  %v1551_v20 = vadd.f32 %v1550_v16, %v1549_v13  ;;  %v1662_v21 = vpop.f32.mrb[23].mxu1 }
 0x123   :  { %v1428_v22 = vpack.c.bf16 %v1057_v18, %v1056_v17  ;;  %v1663_v23 = vadd.f32 %v1662_v21, %v1661_v15 }
 0x124   :  { %v898_v24 = vadd.f32 %v1660_v14, %v737_v19  ;;  %v740_v25 = vadd.f32 %v1551_v20, %v2163_v34 }
 0x125   :  { %1488 = vst [vmem:[%s2248_s3 + $0x20] sm:$0xff] %v1428_v22  }
 0x126   :  { %v1026_v26 = vmul.f32 0.2, %v898_v24  ;;  %v901_v27 = vadd.f32 %v1663_v23, %v740_v25  ;;  %v1552_v28 = vpop.f32.mrb[24].mxu0  ;;  %vm994_vm10 = vcmp.gt.f32.partialorder %v898_v24, 0.0 }
 0x127   :  { %v1664_v29 = vpop.f32.mrb[24].mxu1  ;;  %v1553_v30 = vpop.f32.mrb[25].mxu0 }
 0x128   :  { %vm995_vm11 = vcmp.gt.f32.partialorder %v901_v27, 0.0  ;;  %v1027_v31 = vmul.f32 0.2, %v901_v27  ;;  %v1554_v32 = vadd.f32 %v1553_v30, %v1552_v28  ;;  %v1665_v33 = vpop.f32.mrb[25].mxu1  ;;  %v1555_v35 = vpop.f32.mrb[26].mxu0  ;;  %v1058_v39 = vsel %vm994_vm10, %v898_v24, %v1026_v26 }
 0x129   :  { %v1666_v36 = vadd.f32 %v1665_v33, %v1664_v29  ;;  %v1667_v37 = vpop.f32.mrb[26].mxu1  ;;  %v1556_v38 = vpop.f32.mrb[27].mxu0 }
 0x12a   :  { %v1059_v40 = vsel %vm995_vm11, %v901_v27, %v1027_v31  ;;  %v745_v41 = vadd.f32 %v1554_v32, %v2163_v34  ;;  %v1557_v42 = vadd.f32 %v1556_v38, %v1555_v35  ;;  %v1668_v43 = vpop.f32.mrb[27].mxu1 }
 0x12b   :  { %v1433_v44 = vpack.c.bf16 %v1059_v40, %v1058_v39  ;;  %v1669_v45 = vadd.f32 %v1668_v43, %v1667_v37 }
 0x12c   :  { %v906_v46 = vadd.f32 %v1666_v36, %v745_v41  ;;  %v748_v47 = vadd.f32 %v1557_v42, %v2163_v34 }
 0x12d   :  { %1489 = vst [vmem:[%s2248_s3 + $0x28] sm:$0xff] %v1433_v44  }
 0x12e   :  { %v1028_v48 = vmul.f32 0.2, %v906_v46  ;;  %v909_v49 = vadd.f32 %v1669_v45, %v748_v47  ;;  %v1558_v50 = vpop.f32.mrb[28].mxu0  ;;  %vm996_vm12 = vcmp.gt.f32.partialorder %v906_v46, 0.0 }
 0x12f   :  { %v1670_v51 = vpop.f32.mrb[28].mxu1  ;;  %v1559_v52 = vpop.f32.mrb[29].mxu0 }
 0x130   :  { %vm997_vm13 = vcmp.gt.f32.partialorder %v909_v49, 0.0  ;;  %v1029_v53 = vmul.f32 0.2, %v909_v49  ;;  %v1560_v54 = vadd.f32 %v1559_v52, %v1558_v50  ;;  %v1671_v55 = vpop.f32.mrb[29].mxu1  ;;  %v1561_v56 = vpop.f32.mrb[30].mxu0  ;;  %v1060_v60 = vsel %vm996_vm12, %v906_v46, %v1028_v48 }
 0x131   :  { %v1672_v57 = vadd.f32 %v1671_v55, %v1670_v51  ;;  %v1673_v58 = vpop.f32.mrb[30].mxu1  ;;  %v1562_v59 = vpop.f32.mrb[31].mxu0 }
 0x132   :  { %v1061_v61 = vsel %vm997_vm13, %v909_v49, %v1029_v53  ;;  %v753_v62 = vadd.f32 %v1560_v54, %v2163_v34  ;;  %v1563_v63 = vadd.f32 %v1562_v59, %v1561_v56  ;;  %v1674_v0 = vpop.f32.mrb[31].mxu1 }
 0x133   :  { %v1438_v1 = vpack.c.bf16 %v1061_v61, %v1060_v60  ;;  %v1675_v2 = vadd.f32 %v1674_v0, %v1673_v58 }
 0x134   :  { %v914_v3 = vadd.f32 %v1672_v57, %v753_v62  ;;  %v756_v4 = vadd.f32 %v1563_v63, %v2163_v34 }
 0x135   :  { %1490 = vst [vmem:[%s2248_s3 + $0x30] sm:$0xff] %v1438_v1  }
 0x136   :  { %v1030_v5 = vmul.f32 0.2, %v914_v3  ;;  %v917_v6 = vadd.f32 %v1675_v2, %v756_v4  ;;  %v1564_v7 = vpop.f32.mrb[32].mxu0  ;;  %vm998_vm14 = vcmp.gt.f32.partialorder %v914_v3, 0.0 }
 0x137   :  { %v1676_v8 = vpop.f32.mrb[32].mxu1  ;;  %v1565_v9 = vpop.f32.mrb[33].mxu0 }
 0x138   :  { %vm999_vm15 = vcmp.gt.f32.partialorder %v917_v6, 0.0  ;;  %v1031_v10 = vmul.f32 0.2, %v917_v6  ;;  %v1566_v11 = vadd.f32 %v1565_v9, %v1564_v7  ;;  %v1677_v12 = vpop.f32.mrb[33].mxu1  ;;  %v1567_v13 = vpop.f32.mrb[34].mxu0  ;;  %v1062_v17 = vsel %vm998_vm14, %v914_v3, %v1030_v5 }
 0x139   :  { %v1678_v14 = vadd.f32 %v1677_v12, %v1676_v8  ;;  %v1679_v15 = vpop.f32.mrb[34].mxu1  ;;  %v1568_v16 = vpop.f32.mrb[35].mxu0 }
 0x13a   :  { %v1063_v18 = vsel %vm999_vm15, %v917_v6, %v1031_v10  ;;  %v761_v19 = vadd.f32 %v1566_v11, %v2163_v34  ;;  %v1569_v20 = vadd.f32 %v1568_v16, %v1567_v13  ;;  %v1680_v21 = vpop.f32.mrb[35].mxu1 }
 0x13b   :  { %v1443_v22 = vpack.c.bf16 %v1063_v18, %v1062_v17  ;;  %v1681_v23 = vadd.f32 %v1680_v21, %v1679_v15 }
 0x13c   :  { %v922_v24 = vadd.f32 %v1678_v14, %v761_v19  ;;  %v764_v25 = vadd.f32 %v1569_v20, %v2163_v34 }
 0x13d   :  { %1491 = vst [vmem:[%s2248_s3 + $0x38] sm:$0xff] %v1443_v22  }
 0x13e   :  { %v1032_v26 = vmul.f32 0.2, %v922_v24  ;;  %v925_v27 = vadd.f32 %v1681_v23, %v764_v25  ;;  %v1570_v28 = vpop.f32.mrb[36].mxu0  ;;  %vm1000_vm0 = vcmp.gt.f32.partialorder %v922_v24, 0.0 }
 0x13f   :  { %v1682_v29 = vpop.f32.mrb[36].mxu1  ;;  %v1571_v30 = vpop.f32.mrb[37].mxu0 }
 0x140   :  { %vm1001_vm1 = vcmp.gt.f32.partialorder %v925_v27, 0.0  ;;  %v1033_v31 = vmul.f32 0.2, %v925_v27  ;;  %v1572_v32 = vadd.f32 %v1571_v30, %v1570_v28  ;;  %v1683_v33 = vpop.f32.mrb[37].mxu1  ;;  %v1573_v35 = vpop.f32.mrb[38].mxu0  ;;  %v1064_v39 = vsel %vm1000_vm0, %v922_v24, %v1032_v26 }
 0x141   :  { %v1684_v36 = vadd.f32 %v1683_v33, %v1682_v29  ;;  %v1685_v37 = vpop.f32.mrb[38].mxu1  ;;  %v1574_v38 = vpop.f32.mrb[39].mxu0 }
 0x142   :  { %v1065_v40 = vsel %vm1001_vm1, %v925_v27, %v1033_v31  ;;  %v769_v41 = vadd.f32 %v1572_v32, %v2163_v34  ;;  %v1575_v42 = vadd.f32 %v1574_v38, %v1573_v35  ;;  %v1686_v43 = vpop.f32.mrb[39].mxu1 }
 0x143   :  { %v1448_v44 = vpack.c.bf16 %v1065_v40, %v1064_v39  ;;  %v1687_v45 = vadd.f32 %v1686_v43, %v1685_v37 }
 0x144   :  { %v930_v46 = vadd.f32 %v1684_v36, %v769_v41  ;;  %v772_v47 = vadd.f32 %v1575_v42, %v2163_v34 }
 0x145   :  { %1492 = vst [vmem:[%s2248_s3 + $0x40] sm:$0xff] %v1448_v44  }
 0x146   :  { %v1034_v48 = vmul.f32 0.2, %v930_v46  ;;  %v933_v49 = vadd.f32 %v1687_v45, %v772_v47  ;;  %v1576_v50 = vpop.f32.mrb[40].mxu0  ;;  %vm1002_vm2 = vcmp.gt.f32.partialorder %v930_v46, 0.0 }
 0x147   :  { %v1688_v51 = vpop.f32.mrb[40].mxu1  ;;  %v1577_v52 = vpop.f32.mrb[41].mxu0 }
 0x148   :  { %vm1003_vm3 = vcmp.gt.f32.partialorder %v933_v49, 0.0  ;;  %v1035_v53 = vmul.f32 0.2, %v933_v49  ;;  %v1578_v54 = vadd.f32 %v1577_v52, %v1576_v50  ;;  %v1689_v55 = vpop.f32.mrb[41].mxu1  ;;  %v1579_v56 = vpop.f32.mrb[42].mxu0  ;;  %v1066_v60 = vsel %vm1002_vm2, %v930_v46, %v1034_v48 }
 0x149   :  { %v1690_v57 = vadd.f32 %v1689_v55, %v1688_v51  ;;  %v1691_v58 = vpop.f32.mrb[42].mxu1  ;;  %v1580_v59 = vpop.f32.mrb[43].mxu0 }
 0x14a   :  { %v1067_v61 = vsel %vm1003_vm3, %v933_v49, %v1035_v53  ;;  %v777_v62 = vadd.f32 %v1578_v54, %v2163_v34  ;;  %v1581_v63 = vadd.f32 %v1580_v59, %v1579_v56  ;;  %v1692_v0 = vpop.f32.mrb[43].mxu1 }
 0x14b   :  { %v1453_v1 = vpack.c.bf16 %v1067_v61, %v1066_v60  ;;  %v1693_v2 = vadd.f32 %v1692_v0, %v1691_v58 }
 0x14c   :  { %v938_v3 = vadd.f32 %v1690_v57, %v777_v62  ;;  %v780_v4 = vadd.f32 %v1581_v63, %v2163_v34 }
 0x14d   :  { %1493 = vst [vmem:[%s2248_s3 + $0x48] sm:$0xff] %v1453_v1  }
 0x14e   :  { %v1036_v5 = vmul.f32 0.2, %v938_v3  ;;  %v941_v6 = vadd.f32 %v1693_v2, %v780_v4  ;;  %v1582_v7 = vpop.f32.mrb[44].mxu0  ;;  %vm1004_vm4 = vcmp.gt.f32.partialorder %v938_v3, 0.0 }
 0x14f   :  { %v1694_v8 = vpop.f32.mrb[44].mxu1  ;;  %v1583_v9 = vpop.f32.mrb[45].mxu0 }
 0x150   :  { %vm1005_vm5 = vcmp.gt.f32.partialorder %v941_v6, 0.0  ;;  %v1037_v10 = vmul.f32 0.2, %v941_v6  ;;  %v1584_v11 = vadd.f32 %v1583_v9, %v1582_v7  ;;  %v1695_v12 = vpop.f32.mrb[45].mxu1  ;;  %v1585_v13 = vpop.f32.mrb[46].mxu0  ;;  %v1068_v17 = vsel %vm1004_vm4, %v938_v3, %v1036_v5 }
 0x151   :  { %v1696_v14 = vadd.f32 %v1695_v12, %v1694_v8  ;;  %v1697_v15 = vpop.f32.mrb[46].mxu1  ;;  %v1586_v16 = vpop.f32.mrb[47].mxu0 }
 0x152   :  { %v1069_v18 = vsel %vm1005_vm5, %v941_v6, %v1037_v10  ;;  %v785_v19 = vadd.f32 %v1584_v11, %v2163_v34  ;;  %v1587_v20 = vadd.f32 %v1586_v16, %v1585_v13  ;;  %v1698_v21 = vpop.f32.mrb[47].mxu1 }
 0x153   :  { %v1458_v22 = vpack.c.bf16 %v1069_v18, %v1068_v17  ;;  %v1699_v23 = vadd.f32 %v1698_v21, %v1697_v15 }
 0x154   :  { %v946_v24 = vadd.f32 %v1696_v14, %v785_v19  ;;  %v788_v25 = vadd.f32 %v1587_v20, %v2163_v34 }
 0x155   :  { %1494 = vst [vmem:[%s2248_s3 + $0x50] sm:$0xff] %v1458_v22  }
 0x156   :  { %v1038_v26 = vmul.f32 0.2, %v946_v24  ;;  %v949_v27 = vadd.f32 %v1699_v23, %v788_v25  ;;  %v1588_v28 = vpop.f32.mrb[48].mxu0  ;;  %vm1006_vm6 = vcmp.gt.f32.partialorder %v946_v24, 0.0 }
 0x157   :  { %v1700_v29 = vpop.f32.mrb[48].mxu1  ;;  %v1589_v30 = vpop.f32.mrb[49].mxu0 }
 0x158   :  { %vm1007_vm7 = vcmp.gt.f32.partialorder %v949_v27, 0.0  ;;  %v1039_v31 = vmul.f32 0.2, %v949_v27  ;;  %v1590_v32 = vadd.f32 %v1589_v30, %v1588_v28  ;;  %v1701_v33 = vpop.f32.mrb[49].mxu1  ;;  %v1591_v35 = vpop.f32.mrb[50].mxu0  ;;  %v1070_v39 = vsel %vm1006_vm6, %v946_v24, %v1038_v26 }
 0x159   :  { %v1702_v36 = vadd.f32 %v1701_v33, %v1700_v29  ;;  %v1703_v37 = vpop.f32.mrb[50].mxu1  ;;  %v1592_v38 = vpop.f32.mrb[51].mxu0 }
 0x15a   :  { %v1071_v40 = vsel %vm1007_vm7, %v949_v27, %v1039_v31  ;;  %v793_v41 = vadd.f32 %v1590_v32, %v2163_v34  ;;  %v1593_v42 = vadd.f32 %v1592_v38, %v1591_v35  ;;  %v1704_v43 = vpop.f32.mrb[51].mxu1 }
 0x15b   :  { %v1463_v44 = vpack.c.bf16 %v1071_v40, %v1070_v39  ;;  %v1705_v45 = vadd.f32 %v1704_v43, %v1703_v37 }
 0x15c   :  { %v954_v46 = vadd.f32 %v1702_v36, %v793_v41  ;;  %v796_v47 = vadd.f32 %v1593_v42, %v2163_v34 }
 0x15d   :  { %1495 = vst [vmem:[%s2248_s3 + $0x58] sm:$0xff] %v1463_v44  }
 0x15e   :  { %v1040_v48 = vmul.f32 0.2, %v954_v46  ;;  %v957_v49 = vadd.f32 %v1705_v45, %v796_v47  ;;  %v1594_v50 = vpop.f32.mrb[52].mxu0  ;;  %vm1008_vm8 = vcmp.gt.f32.partialorder %v954_v46, 0.0 }
 0x15f   :  { %v1706_v51 = vpop.f32.mrb[52].mxu1  ;;  %v1595_v52 = vpop.f32.mrb[53].mxu0 }
 0x160   :  { %vm1009_vm9 = vcmp.gt.f32.partialorder %v957_v49, 0.0  ;;  %v1041_v53 = vmul.f32 0.2, %v957_v49  ;;  %v1596_v54 = vadd.f32 %v1595_v52, %v1594_v50  ;;  %v1707_v55 = vpop.f32.mrb[53].mxu1  ;;  %v1597_v56 = vpop.f32.mrb[54].mxu0  ;;  %v1072_v60 = vsel %vm1008_vm8, %v954_v46, %v1040_v48 }
 0x161   :  { %v1708_v57 = vadd.f32 %v1707_v55, %v1706_v51  ;;  %v1709_v58 = vpop.f32.mrb[54].mxu1  ;;  %v1598_v59 = vpop.f32.mrb[55].mxu0 }
 0x162   :  { %v1073_v61 = vsel %vm1009_vm9, %v957_v49, %v1041_v53  ;;  %v801_v62 = vadd.f32 %v1596_v54, %v2163_v34  ;;  %v1599_v63 = vadd.f32 %v1598_v59, %v1597_v56  ;;  %v1710_v0 = vpop.f32.mrb[55].mxu1 }
 0x163   :  { %v1468_v1 = vpack.c.bf16 %v1073_v61, %v1072_v60  ;;  %v1711_v2 = vadd.f32 %v1710_v0, %v1709_v58 }
 0x164   :  { %v962_v3 = vadd.f32 %v1708_v57, %v801_v62  ;;  %v804_v4 = vadd.f32 %v1599_v63, %v2163_v34 }
 0x165   :  { %1496 = vst [vmem:[%s2248_s3 + $0x60] sm:$0xff] %v1468_v1  }
 0x166   :  { %v1042_v5 = vmul.f32 0.2, %v962_v3  ;;  %v965_v6 = vadd.f32 %v1711_v2, %v804_v4  ;;  %v1600_v7 = vpop.f32.mrb[56].mxu0  ;;  %vm1010_vm10 = vcmp.gt.f32.partialorder %v962_v3, 0.0 }
 0x167   :  { %v1712_v8 = vpop.f32.mrb[56].mxu1  ;;  %v1601_v9 = vpop.f32.mrb[57].mxu0 }
 0x168   :  { %vm1011_vm11 = vcmp.gt.f32.partialorder %v965_v6, 0.0  ;;  %v1043_v10 = vmul.f32 0.2, %v965_v6  ;;  %v1602_v11 = vadd.f32 %v1601_v9, %v1600_v7  ;;  %v1713_v12 = vpop.f32.mrb[57].mxu1  ;;  %v1603_v13 = vpop.f32.mrb[58].mxu0  ;;  %v1074_v17 = vsel %vm1010_vm10, %v962_v3, %v1042_v5 }
 0x169   :  { %v1714_v14 = vadd.f32 %v1713_v12, %v1712_v8  ;;  %v1715_v15 = vpop.f32.mrb[58].mxu1  ;;  %v1604_v16 = vpop.f32.mrb[59].mxu0 }
 0x16a   :  { %v1075_v18 = vsel %vm1011_vm11, %v965_v6, %v1043_v10  ;;  %v809_v19 = vadd.f32 %v1602_v11, %v2163_v34  ;;  %v1605_v20 = vadd.f32 %v1604_v16, %v1603_v13  ;;  %v1716_v21 = vpop.f32.mrb[59].mxu1 }
 0x16b   :  { %v1473_v22 = vpack.c.bf16 %v1075_v18, %v1074_v17  ;;  %v1717_v23 = vadd.f32 %v1716_v21, %v1715_v15 }
 0x16c   :  { %v970_v24 = vadd.f32 %v1714_v14, %v809_v19  ;;  %v812_v25 = vadd.f32 %v1605_v20, %v2163_v34 }
 0x16d   :  { %1497 = vst [vmem:[%s2248_s3 + $0x68] sm:$0xff] %v1473_v22  }
 0x16e   :  { %v1044_v26 = vmul.f32 0.2, %v970_v24  ;;  %v973_v27 = vadd.f32 %v1717_v23, %v812_v25  ;;  %v1606_v28 = vpop.f32.mrb[60].mxu0  ;;  %vm1012_vm12 = vcmp.gt.f32.partialorder %v970_v24, 0.0 }
 0x16f   :  { %v1718_v29 = vpop.f32.mrb[60].mxu1  ;;  %v1607_v30 = vpop.f32.mrb[61].mxu0 }
 0x170   :  { %vm1013_vm13 = vcmp.gt.f32.partialorder %v973_v27, 0.0  ;;  %v1045_v31 = vmul.f32 0.2, %v973_v27  ;;  %v1608_v32 = vadd.f32 %v1607_v30, %v1606_v28  ;;  %v1719_v33 = vpop.f32.mrb[61].mxu1  ;;  %v1609_v35 = vpop.f32.mrb[62].mxu0  ;;  %v1076_v39 = vsel %vm1012_vm12, %v970_v24, %v1044_v26 }
 0x171   :  { %v1720_v36 = vadd.f32 %v1719_v33, %v1718_v29  ;;  %v1721_v37 = vpop.f32.mrb[62].mxu1  ;;  %v1610_v38 = vpop.f32.mrb[63].mxu0 }
 0x172   :  { %v1077_v40 = vsel %vm1013_vm13, %v973_v27, %v1045_v31  ;;  %v817_v41 = vadd.f32 %v1608_v32, %v2163_v34  ;;  %v1611_v42 = vadd.f32 %v1610_v38, %v1609_v35  ;;  %v1722_v43 = vpop.f32.mrb[63].mxu1 }
 0x173   :  { %v1478_v44 = vpack.c.bf16 %v1077_v40, %v1076_v39  ;;  %v1723_v45 = vadd.f32 %v1722_v43, %v1721_v37 }
 0x174   :  { %v978_v46 = vadd.f32 %v1720_v36, %v817_v41  ;;  %v820_v47 = vadd.f32 %v1611_v42, %v2163_v34 }
 0x175   :  { %1498 = vst [vmem:[%s2248_s3 + $0x70] sm:$0xff] %v1478_v44  }
 0x176   :  { %v1046_v48 = vmul.f32 0.2, %v978_v46  ;;  %v981_v49 = vadd.f32 %v1723_v45, %v820_v47  ;;  %vm1014_vm14 = vcmp.gt.f32.partialorder %v978_v46, 0.0 }
 0x178   :  { %vm1015_vm15 = vcmp.gt.f32.partialorder %v981_v49, 0.0  ;;  %v1047_v50 = vmul.f32 0.2, %v981_v49  ;;  %v1078_v51 = vsel %vm1014_vm14, %v978_v46, %v1046_v48 }
 0x17a   :  { %v1079_v52 = vsel %vm1015_vm15, %v981_v49, %v1047_v50 }
 0x17b   :  { %v1483_v53 = vpack.c.bf16 %v1079_v52, %v1078_v51 }
 0x17d   :  { %1499 = vst [vmem:[%s2248_s3 + $0x78] sm:$0xff] %v1483_v53  }

// kernel: discriminator_forward.4
= control target key start
LH: loop header
LB: loop body
LE: loop exit
PB: predicated region body
PF: predicated region fallthrough
CT: control target
= control target key end

     0   :  { %vm2702_vm1 = vcmask 519168   ;;  %s4669_s1 = inlined_call_operand.vmem [shape: bf16[2048,64], index: 1, kind: input, shape index: {}]   ;;  %s4670_s0 = inlined_call_operand.vmem [shape: bf16[128,2048], index: 0, kind: input, shape index: {}]   ;;  %s4671_s2 = inlined_call_operand.vmem [shape: f32[1,64], index: 2, kind: input, shape index: {}]   ;;  %s4672_s3 = inlined_call_operand.vmem [shape: bf16[128,64], index: 3, kind: output, shape index: {}]  }
   0x1   :  { %v3524_v0 = vld [vmem:[%s4669_s1 + $0x40] sm:$0xff]   ;;  %v3528_v4 = vld [vmem:[%s4669_s1 + $0x48] sm:$0xff]   ;;  %v3532_v8 = vld [vmem:[%s4669_s1 + $0x50] sm:$0xff]  }
   0x2   :  { %v3525_v1 = vld [vmem:[%s4669_s1 + $0xc0] sm:$0xff]   ;;  %3012 = vmatprep.subr.bf16.mxu0 %v3524_v0  ;;  %v3529_v5 = vld [vmem:[%s4669_s1 + $0xc8] sm:$0xff]   ;;  %v3533_v9 = vld [vmem:[%s4669_s1 + $0xd0] sm:$0xff]  }
   0x3   :  { %v3526_v2 = vld [vmem:[%s4669_s1] sm:$0xff]   ;;  %3076 = vmatprep.subr.bf16.mxu1 %v3525_v1  ;;  %v3530_v6 = vld [vmem:[%s4669_s1 + $0x8] sm:$0xff]   ;;  %v3534_v10 = vld [vmem:[%s4669_s1 + $0x10] sm:$0xff]  }
   0x4   :  { %v3527_v3 = vld [vmem:[%s4669_s1 + $0x80] sm:$0xff]   ;;  %3013 = vmatpush3.bf16.msra.mxu0 %v3526_v2  ;;  %v3531_v7 = vld [vmem:[%s4669_s1 + $0x88] sm:$0xff]   ;;  %v3535_v11 = vld [vmem:[%s4669_s1 + $0x90] sm:$0xff]  }
   0x5   :  { %3077 = vmatpush3.bf16.msra.mxu1 %v3527_v3  ;;  %3014 = vmatprep.subr.bf16.mxu0 %v3528_v4  ;;  %v3536_v12 = vld [vmem:[%s4669_s1 + $0x58] sm:$0xff]   ;;  %v3540_v16 = vld [vmem:[%s4669_s1 + $0x60] sm:$0xff]   ;;  %v3544_v20 = vld [vmem:[%s4669_s1 + $0x68] sm:$0xff]  }
   0x6   :  { %3078 = vmatprep.subr.bf16.mxu1 %v3529_v5  ;;  %v3537_v13 = vld [vmem:[%s4669_s1 + $0xd8] sm:$0xff]   ;;  %v3541_v17 = vld [vmem:[%s4669_s1 + $0xe0] sm:$0xff]   ;;  %v3545_v21 = vld [vmem:[%s4669_s1 + $0xe8] sm:$0xff]  }
   0x7   :  { %v3538_v14 = vld [vmem:[%s4669_s1 + $0x18] sm:$0xff]   ;;  %v3542_v18 = vld [vmem:[%s4669_s1 + $0x20] sm:$0xff]   ;;  %v3546_v22 = vld [vmem:[%s4669_s1 + $0x28] sm:$0xff]  }
   0x8   :  { %3015 = vmatpush3.bf16.msra.mxu0 %v3530_v6  ;;  %v3539_v15 = vld [vmem:[%s4669_s1 + $0x98] sm:$0xff]   ;;  %v3543_v19 = vld [vmem:[%s4669_s1 + $0xa0] sm:$0xff]   ;;  %v3547_v23 = vld [vmem:[%s4669_s1 + $0xa8] sm:$0xff]  }
   0x9   :  { %3079 = vmatpush3.bf16.msra.mxu1 %v3531_v7  ;;  %3016 = vmatprep.subr.bf16.mxu0 %v3532_v8  ;;  %v3548_v24 = vld [vmem:[%s4669_s1 + $0x70] sm:$0xff]   ;;  %v3552_v28 = vld [vmem:[%s4669_s1 + $0x78] sm:$0xff]   ;;  %v15_v32 = vld [vmem:[%s4670_s0] sm:$0xff] }
   0xa   :  { %3080 = vmatprep.subr.bf16.mxu1 %v3533_v9  ;;  %v3549_v25 = vld [vmem:[%s4669_s1 + $0xf0] sm:$0xff]   ;;  %v3553_v29 = vld [vmem:[%s4669_s1 + $0xf8] sm:$0xff]   ;;  %v23_v33 = vld [vmem:[%s4670_s0 + $0x40] sm:$0xff] }
   0xb   :  { %v3550_v26 = vld [vmem:[%s4669_s1 + $0x30] sm:$0xff]   ;;  %v3554_v30 = vld [vmem:[%s4669_s1 + $0x38] sm:$0xff]   ;;  %v16_v34 = vld [vmem:[%s4670_s0 + $0x8] sm:$0xff]  ;;  %v2724_v35 = vcombine.low %v15_v32, %v23_v33  ;;  %v2725_v36 = vcombine.high %v15_v32, %v23_v33 }
   0xc   :  { %3017 = vmatpush3.bf16.msra.mxu0 %v3534_v10  ;;  %v3551_v27 = vld [vmem:[%s4669_s1 + $0xb0] sm:$0xff]   ;;  %v3555_v31 = vld [vmem:[%s4669_s1 + $0xb8] sm:$0xff]   ;;  %v24_v37 = vld [vmem:[%s4670_s0 + $0x48] sm:$0xff] }
   0xd   :  { %3081 = vmatpush3.bf16.msra.mxu1 %v3535_v11  ;;  %3018 = vmatprep.subr.bf16.mxu0 %v3536_v12  ;;  %v2726_v38 = vcombine.low %v16_v34, %v24_v37  ;;  %v2727_v39 = vcombine.high %v16_v34, %v24_v37  ;;  %v3556_v40 = vld [vmem:[%s4669_s1 + $0x140] sm:$0xff]   ;;  %v32_v47 = vld [vmem:[%s4670_s0 + $0x88] sm:$0xff]  ;;  %v3564_v62 = vld [vmem:[%s4669_s1 + $0x150] sm:$0xff]  }
   0xe   :  { %3082 = vmatprep.subr.bf16.mxu1 %v3537_v13  ;;  %1846 = vmatprep.mubr.bf16.mxu0 %v2725_v36  ;;  %v3557_v41 = vld [vmem:[%s4669_s1 + $0x100] sm:$0xff]   ;;  %v40_v48 = vld [vmem:[%s4670_s0 + $0xc8] sm:$0xff]  ;;  %v3565_v63 = vld [vmem:[%s4669_s1 + $0x110] sm:$0xff]  }
   0xf   :  { %1943 = vmatprep.mubr.bf16.mxu1 %v2727_v39  ;;  %v3558_v42 = vld [vmem:[%s4669_s1 + $0x1c0] sm:$0xff]   ;;  %v2743_v49 = vcombine.high %v32_v47, %v40_v48  ;;  %v3560_v50 = vld [vmem:[%s4669_s1 + $0x148] sm:$0xff]   ;;  %v2742_v53 = vcombine.low %v32_v47, %v40_v48  ;;  %v3566_v0 = vld [vmem:[%s4669_s1 + $0x1d0] sm:$0xff]  }
  0x10   :  { %3019 = vmatpush3.bf16.msra.mxu0 %v3538_v14  ;;  %v3559_v43 = vld [vmem:[%s4669_s1 + $0x180] sm:$0xff]   ;;  %v3561_v52 = vld [vmem:[%s4669_s1 + $0x108] sm:$0xff]   ;;  %v3567_v1 = vld [vmem:[%s4669_s1 + $0x190] sm:$0xff]  }
  0x11   :  { %3083 = vmatpush3.bf16.msra.mxu1 %v3539_v15  ;;  %3020 = vmatprep.subr.bf16.mxu0 %v3540_v16  ;;  %v31_v44 = vld [vmem:[%s4670_s0 + $0x80] sm:$0xff]  ;;  %v3562_v54 = vld [vmem:[%s4669_s1 + $0x1c8] sm:$0xff]   ;;  %v3568_v10 = vld [vmem:[%s4669_s1 + $0x158] sm:$0xff]  }
  0x12   :  { %3084 = vmatprep.subr.bf16.mxu1 %v3541_v17  ;;  %v39_v45 = vld [vmem:[%s4670_s0 + $0xc0] sm:$0xff]  ;;  %v3563_v55 = vld [vmem:[%s4669_s1 + $0x188] sm:$0xff]   ;;  %v3569_v11 = vld [vmem:[%s4669_s1 + $0x118] sm:$0xff]  }
  0x13   :  { %v2741_v46 = vcombine.high %v31_v44, %v39_v45  ;;  %v2740_v51 = vcombine.low %v31_v44, %v39_v45  ;;  %v47_v56 = vld [vmem:[%s4670_s0 + $0x100] sm:$0xff]  ;;  %v48_v58 = vld [vmem:[%s4670_s0 + $0x108] sm:$0xff]  ;;  %v3570_v12 = vld [vmem:[%s4669_s1 + $0x1d8] sm:$0xff]  }
  0x14   :  { %3021 = vmatpush3.bf16.msra.mxu0 %v3542_v18  ;;  %v55_v57 = vld [vmem:[%s4670_s0 + $0x140] sm:$0xff]  ;;  %v56_v59 = vld [vmem:[%s4670_s0 + $0x148] sm:$0xff]  ;;  %v3571_v13 = vld [vmem:[%s4669_s1 + $0x198] sm:$0xff]  }
  0x15   :  { %3085 = vmatpush3.bf16.msra.mxu1 %v3543_v19  ;;  %3022 = vmatprep.subr.bf16.mxu0 %v3544_v20  ;;  %v2757_v60 = vcombine.high %v47_v56, %v55_v57  ;;  %v2759_v61 = vcombine.high %v48_v58, %v56_v59  ;;  %v2756_v2 = vcombine.low %v47_v56, %v55_v57  ;;  %v63_v3 = vld [vmem:[%s4670_s0 + $0x180] sm:$0xff]  ;;  %v64_v5 = vld [vmem:[%s4670_s0 + $0x188] sm:$0xff]  ;;  %v3581_v39 = vld [vmem:[%s4669_s1 + $0x130] sm:$0xff]  }
  0x16   :  { %3086 = vmatprep.subr.bf16.mxu1 %v3545_v21  ;;  %v71_v4 = vld [vmem:[%s4670_s0 + $0x1c0] sm:$0xff]  ;;  %v2758_v6 = vcombine.low %v48_v58, %v56_v59  ;;  %v72_v8 = vld [vmem:[%s4670_s0 + $0x1c8] sm:$0xff]  ;;  %v3585_v48 = vld [vmem:[%s4669_s1 + $0x138] sm:$0xff]  }
  0x17   :  { %v2773_v7 = vcombine.high %v63_v3, %v71_v4  ;;  %v2775_v9 = vcombine.high %v64_v5, %v72_v8  ;;  %v79_v14 = vld [vmem:[%s4670_s0 + $0x200] sm:$0xff]  ;;  %v80_v16 = vld [vmem:[%s4670_s0 + $0x208] sm:$0xff]  ;;  %v2772_v19 = vcombine.low %v63_v3, %v71_v4  ;;  %v2774_v21 = vcombine.low %v64_v5, %v72_v8  ;;  %v26_v3 = vld [vmem:[%s4670_s0 + $0x58] sm:$0xff] }
  0x18   :  { %3023 = vmatpush3.bf16.msra.mxu0 %v3546_v22  ;;  %v87_v15 = vld [vmem:[%s4670_s0 + $0x240] sm:$0xff]  ;;  %v88_v17 = vld [vmem:[%s4670_s0 + $0x248] sm:$0xff]  ;;  %v33_v8 = vld [vmem:[%s4670_s0 + $0x90] sm:$0xff] }
  0x19   :  { %3087 = vmatpush3.bf16.msra.mxu1 %v3547_v23  ;;  %3024 = vmatprep.subr.bf16.mxu0 %v3548_v24  ;;  %v3572_v18 = vld [vmem:[%s4669_s1 + $0x160] sm:$0xff]   ;;  %v2789_v22 = vcombine.high %v79_v14, %v87_v15  ;;  %v2791_v24 = vcombine.high %v80_v16, %v88_v17  ;;  %v3578_v32 = vld [vmem:[%s4669_s1 + $0x1e8] sm:$0xff]   ;;  %v2788_v34 = vcombine.low %v79_v14, %v87_v15 }
  0x1a   :  { %3088 = vmatprep.subr.bf16.mxu1 %v3549_v25  ;;  %v3573_v20 = vld [vmem:[%s4669_s1 + $0x120] sm:$0xff]   ;;  %v3579_v33 = vld [vmem:[%s4669_s1 + $0x1a8] sm:$0xff]  }
  0x1b   :  { %v3574_v23 = vld [vmem:[%s4669_s1 + $0x1e0] sm:$0xff]   ;;  %v112_v44 = vld [vmem:[%s4670_s0 + $0x308] sm:$0xff] }
  0x1c   :  { %3025 = vmatpush3.bf16.msra.mxu0 %v3550_v26  ;;  %v3575_v25 = vld [vmem:[%s4669_s1 + $0x1a0] sm:$0xff]   ;;  %v120_v45 = vld [vmem:[%s4670_s0 + $0x348] sm:$0xff] }
  0x1d   :  { %3089 = vmatpush3.bf16.msra.mxu1 %v3551_v27  ;;  %3026 = vmatprep.subr.bf16.mxu0 %v3552_v28  ;;  %v95_v26 = vld [vmem:[%s4670_s0 + $0x280] sm:$0xff]  ;;  %v3576_v28 = vld [vmem:[%s4669_s1 + $0x168] sm:$0xff]  }
  0x1e   :  { %3090 = vmatprep.subr.bf16.mxu1 %v3553_v29  ;;  %v103_v27 = vld [vmem:[%s4670_s0 + $0x2c0] sm:$0xff]  ;;  %v96_v29 = vld [vmem:[%s4670_s0 + $0x288] sm:$0xff] }
  0x1f   :  { %v2805_v36 = vcombine.high %v95_v26, %v103_v27  ;;  %v2804_v47 = vcombine.low %v95_v26, %v103_v27  ;;  %v3588_v56 = vld [vmem:[%s4669_s1 + $0x240] sm:$0xff]   ;;  %v128_v57 = vld [vmem:[%s4670_s0 + $0x388] sm:$0xff]  ;;  %v3596_v26 = vld [vmem:[%s4669_s1 + $0x250] sm:$0xff]  }
  0x20   :  { %3027 = vmatpush3.bf16.msra.mxu0 %v3554_v30  ;;  %v104_v30 = vld [vmem:[%s4670_s0 + $0x2c8] sm:$0xff]  ;;  %v3590_v58 = vld [vmem:[%s4669_s1 + $0x2c0] sm:$0xff]   ;;  %v3598_v27 = vld [vmem:[%s4669_s1 + $0x2d0] sm:$0xff]  }
  0x21   :  { %3091 = vmatpush3.bf16.msra.mxu1 %v3555_v31  ;;  %3140 = vmatprep.subr.bf16.mxu0 %v3556_v40  ;;  %v3577_v31 = vld [vmem:[%s4669_s1 + $0x128] sm:$0xff]   ;;  %v2807_v37 = vcombine.high %v96_v29, %v104_v30  ;;  %v3582_v40 = vld [vmem:[%s4669_s1 + $0x1f0] sm:$0xff]   ;;  %v3591_v15 = vld [vmem:[%s4669_s1 + $0x280] sm:$0xff]  }
  0x22   :  { %3204 = vmatprep.subr.bf16.mxu1 %v3558_v42  ;;  %v119_v42 = vld [vmem:[%s4670_s0 + $0x340] sm:$0xff]  ;;  %v136_v59 = vld [vmem:[%s4670_s0 + $0x3c8] sm:$0xff] }
  0x23   :  { %1847 = vmatmul.mubr.bf16.vlgmr.msra.gmra.mrb[0].mxu0 %v2724_v35  ;;  %v2790_v35 = vcombine.low %v80_v16, %v88_v17  ;;  %v2838_v5 = vcombine.low %v128_v57, %v136_v59  ;;  %v3592_v17 = vld [vmem:[%s4669_s1 + $0x248] sm:$0xff]  }
  0x24   :  { %1944 = vmatmul.mubr.bf16.vlgmr.msra.gmra.mrb[0].mxu1 %v2726_v38  ;;  %3141 = vmatpush3.bf16.msra.mxu0 %v3557_v41  ;;  %v3580_v38 = vld [vmem:[%s4669_s1 + $0x170] sm:$0xff]   ;;  %v111_v41 = vld [vmem:[%s4670_s0 + $0x300] sm:$0xff] }
  0x25   :  { %3205 = vmatpush3.bf16.msra.mxu1 %v3559_v43  ;;  %1854 = vmatprep.mubr.bf16.mxu0 %v2741_v46  ;;  %v3583_v43 = vld [vmem:[%s4669_s1 + $0x1b0] sm:$0xff]   ;;  %v3584_v46 = vld [vmem:[%s4669_s1 + $0x178] sm:$0xff]  }
  0x26   :  { %1951 = vmatprep.mubr.bf16.mxu1 %v2743_v49  ;;  %3142 = vmatprep.subr.bf16.mxu0 %v3560_v50  ;;  %v2806_v49 = vcombine.low %v96_v29, %v104_v30  ;;  %v2821_v50 = vcombine.high %v111_v41, %v119_v42 }
  0x27   :  { %3206 = vmatprep.subr.bf16.mxu1 %v3562_v54  ;;  %v127_v54 = vld [vmem:[%s4670_s0 + $0x380] sm:$0xff] }
  0x28   :  { %3143 = vmatpush3.bf16.msra.mxu0 %v3561_v52  ;;  %v2823_v52 = vcombine.high %v112_v44, %v120_v45 }
  0x29   :  { %3207 = vmatpush3.bf16.msra.mxu1 %v3563_v55  ;;  %3144 = vmatprep.subr.bf16.mxu0 %v3564_v62  ;;  %v135_v55 = vld [vmem:[%s4670_s0 + $0x3c0] sm:$0xff] }
  0x2a   :  { %3208 = vmatprep.subr.bf16.mxu1 %v3566_v0  ;;  %v2837_v62 = vcombine.high %v127_v54, %v135_v55  ;;  %v17_v0 = vld [vmem:[%s4670_s0 + $0x10] sm:$0xff]  ;;  %v2836_v4 = vcombine.low %v127_v54, %v135_v55  ;;  %v82_v54 = vld [vmem:[%s4670_s0 + $0x218] sm:$0xff] }
  0x2b   :  { %1855 = vmatmul.mubr.bf16.gmra.mrb[4].mxu0 %v2740_v51  ;;  %v3586_v51 = vld [vmem:[%s4669_s1 + $0x1f8] sm:$0xff]  }
  0x2c   :  { %1952 = vmatmul.mubr.bf16.gmra.mrb[4].mxu1 %v2742_v53  ;;  %1862 = vmatprep.mubr.bf16.mxu0 %v2757_v60  ;;  %v3587_v53 = vld [vmem:[%s4669_s1 + $0x1b8] sm:$0xff]   ;;  %v2820_v60 = vcombine.low %v111_v41, %v119_v42  ;;  %v3604_v42 = vld [vmem:[%s4669_s1 + $0x260] sm:$0xff]  }
  0x2d   :  { %1959 = vmatprep.mubr.bf16.mxu1 %v2759_v61  ;;  %3145 = vmatpush3.bf16.msra.mxu0 %v3565_v63  ;;  %v2822_v61 = vcombine.low %v112_v44, %v120_v45  ;;  %v2839_v63 = vcombine.high %v128_v57, %v136_v59  ;;  %v3603_v41 = vld [vmem:[%s4669_s1 + $0x298] sm:$0xff]   ;;  %v3606_v44 = vld [vmem:[%s4669_s1 + $0x2e0] sm:$0xff]   ;;  %v3611_v57 = vld [vmem:[%s4669_s1 + $0x2a8] sm:$0xff]  }
  0x2e   :  { %3209 = vmatpush3.bf16.msra.mxu1 %v3567_v1  ;;  %3146 = vmatprep.subr.bf16.mxu0 %v3568_v10  ;;  %v25_v1 = vld [vmem:[%s4670_s0 + $0x50] sm:$0xff]  ;;  %v90_v55 = vld [vmem:[%s4670_s0 + $0x258] sm:$0xff] }
  0x2f   :  { %3210 = vmatprep.subr.bf16.mxu1 %v3570_v12  ;;  %v2728_v10 = vcombine.low %v17_v0, %v25_v1  ;;  %v34_v12 = vld [vmem:[%s4670_s0 + $0x98] sm:$0xff] }
  0x31   :  { %3147 = vmatpush3.bf16.msra.mxu0 %v3569_v11  ;;  %v3589_v11 = vld [vmem:[%s4669_s1 + $0x200] sm:$0xff]  }
  0x32   :  { %3211 = vmatpush3.bf16.msra.mxu1 %v3571_v13  ;;  %3148 = vmatprep.subr.bf16.mxu0 %v3572_v18  ;;  %v42_v13 = vld [vmem:[%s4670_s0 + $0xd8] sm:$0xff] }
  0x33   :  { %1863 = vmatmul.mubr.bf16.gmra.mrb[8].mxu0 %v2756_v2  ;;  %3212 = vmatprep.subr.bf16.mxu1 %v3574_v23  ;;  %v18_v2 = vld [vmem:[%s4670_s0 + $0x18] sm:$0xff]  ;;  %v2747_v18 = vcombine.high %v34_v12, %v42_v13  ;;  %v57_v23 = vld [vmem:[%s4670_s0 + $0x150] sm:$0xff]  ;;  %v2746_v29 = vcombine.low %v34_v12, %v42_v13  ;;  %v3622_v12 = vld [vmem:[%s4669_s1 + $0x3c0] sm:$0xff]   ;;  %v2794_v13 = vcombine.low %v82_v54, %v90_v55 }
  0x34   :  { %1960 = vmatmul.mubr.bf16.gmra.mrb[8].mxu1 %v2758_v6  ;;  %1870 = vmatprep.mubr.bf16.mxu0 %v2773_v7  ;;  %v2729_v6 = vcombine.high %v17_v0, %v25_v1  ;;  %v2731_v7 = vcombine.high %v18_v2, %v26_v3  ;;  %v2730_v14 = vcombine.low %v18_v2, %v26_v3  ;;  %v3613_v0 = vld [vmem:[%s4669_s1 + $0x230] sm:$0xff]   ;;  %v3616_v2 = vld [vmem:[%s4669_s1 + $0x278] sm:$0xff]  }
  0x35   :  { %1967 = vmatprep.mubr.bf16.mxu1 %v2775_v9  ;;  %3149 = vmatpush3.bf16.msra.mxu0 %v3573_v20  ;;  %v41_v9 = vld [vmem:[%s4670_s0 + $0xd0] sm:$0xff]  ;;  %v3594_v20 = vld [vmem:[%s4669_s1 + $0x2c8] sm:$0xff]  }
  0x36   :  { %3213 = vmatpush3.bf16.msra.mxu1 %v3575_v25  ;;  %3150 = vmatprep.subr.bf16.mxu0 %v3576_v28  ;;  %v2745_v16 = vcombine.high %v33_v8, %v41_v9  ;;  %v58_v25 = vld [vmem:[%s4670_s0 + $0x158] sm:$0xff]  ;;  %v2744_v28 = vcombine.low %v33_v8, %v41_v9  ;;  %v3615_v1 = vld [vmem:[%s4669_s1 + $0x2b0] sm:$0xff]  }
  0x37   :  { %3214 = vmatprep.subr.bf16.mxu1 %v3578_v32  ;;  %v3597_v32 = vld [vmem:[%s4669_s1 + $0x210] sm:$0xff]   ;;  %v3617_v8 = vld [vmem:[%s4669_s1 + $0x238] sm:$0xff]  }
  0x38   :  { %v97_v3 = vld [vmem:[%s4670_s0 + $0x290] sm:$0xff]  ;;  %v3619_v9 = vld [vmem:[%s4669_s1 + $0x2b8] sm:$0xff]  }
  0x39   :  { %3151 = vmatpush3.bf16.msra.mxu0 %v3577_v31 }
  0x3a   :  { %3215 = vmatpush3.bf16.msra.mxu1 %v3579_v33  ;;  %3152 = vmatprep.subr.bf16.mxu0 %v3580_v38  ;;  %v3599_v33 = vld [vmem:[%s4669_s1 + $0x290] sm:$0xff]   ;;  %v66_v38 = vld [vmem:[%s4670_s0 + $0x198] sm:$0xff] }
  0x3b   :  { %1871 = vmatmul.mubr.bf16.gmra.mrb[12].mxu0 %v2772_v19  ;;  %3216 = vmatprep.subr.bf16.mxu1 %v3582_v40  ;;  %v3593_v19 = vld [vmem:[%s4669_s1 + $0x208] sm:$0xff]   ;;  %v3601_v40 = vld [vmem:[%s4669_s1 + $0x218] sm:$0xff]  }
  0x3c   :  { %1968 = vmatmul.mubr.bf16.gmra.mrb[12].mxu1 %v2774_v21  ;;  %1878 = vmatprep.mubr.bf16.mxu0 %v2789_v22  ;;  %v3595_v21 = vld [vmem:[%s4669_s1 + $0x288] sm:$0xff]   ;;  %v49_v22 = vld [vmem:[%s4670_s0 + $0x110] sm:$0xff] }
  0x3d   :  { %1975 = vmatprep.mubr.bf16.mxu1 %v2791_v24  ;;  %3153 = vmatpush3.bf16.msra.mxu0 %v3581_v39  ;;  %v50_v24 = vld [vmem:[%s4670_s0 + $0x118] sm:$0xff]  ;;  %v2761_v30 = vcombine.high %v49_v22, %v57_v23 }
  0x3e   :  { %3217 = vmatpush3.bf16.msra.mxu1 %v3583_v43  ;;  %3154 = vmatprep.subr.bf16.mxu0 %v3584_v46  ;;  %v2763_v31 = vcombine.high %v50_v24, %v58_v25  ;;  %v74_v39 = vld [vmem:[%s4670_s0 + $0x1d8] sm:$0xff]  ;;  %v2760_v43 = vcombine.low %v49_v22, %v57_v23  ;;  %v2762_v45 = vcombine.low %v50_v24, %v58_v25  ;;  %v129_v24 = vld [vmem:[%s4670_s0 + $0x390] sm:$0xff] }
  0x3f   :  { %3218 = vmatprep.subr.bf16.mxu1 %v3586_v51  ;;  %v81_v51 = vld [vmem:[%s4670_s0 + $0x210] sm:$0xff] }
  0x40   :  { %v137_v25 = vld [vmem:[%s4670_s0 + $0x3d0] sm:$0xff] }
  0x41   :  { %3155 = vmatpush3.bf16.msra.mxu0 %v3585_v48  ;;  %v2779_v48 = vcombine.high %v66_v38, %v74_v39 }
  0x42   :  { %3219 = vmatpush3.bf16.msra.mxu1 %v3587_v53  ;;  %3268 = vmatprep.subr.bf16.mxu0 %v3588_v56  ;;  %v89_v53 = vld [vmem:[%s4670_s0 + $0x250] sm:$0xff]  ;;  %v3609_v56 = vld [vmem:[%s4669_s1 + $0x228] sm:$0xff]  }
  0x43   :  { %1879 = vmatmul.mubr.bf16.gmra.mrb[16].mxu0 %v2788_v34  ;;  %3332 = vmatprep.subr.bf16.mxu1 %v3590_v58  ;;  %v3600_v34 = vld [vmem:[%s4669_s1 + $0x258] sm:$0xff]   ;;  %v3612_v58 = vld [vmem:[%s4669_s1 + $0x270] sm:$0xff]  }
  0x44   :  { %1976 = vmatmul.mubr.bf16.gmra.mrb[16].mxu1 %v2790_v35  ;;  %1886 = vmatprep.mubr.bf16.mxu0 %v2805_v36  ;;  %v65_v35 = vld [vmem:[%s4670_s0 + $0x190] sm:$0xff] }
  0x45   :  { %1983 = vmatprep.mubr.bf16.mxu1 %v2807_v37  ;;  %v73_v36 = vld [vmem:[%s4670_s0 + $0x1d0] sm:$0xff]  ;;  %v3602_v37 = vld [vmem:[%s4669_s1 + $0x2d8] sm:$0xff]  }
  0x46   :  { %v2777_v46 = vcombine.high %v65_v35, %v73_v36  ;;  %v2776_v59 = vcombine.low %v65_v35, %v73_v36  ;;  %v28_v35 = vld [vmem:[%s4670_s0 + $0x68] sm:$0xff]  ;;  %v2840_v36 = vcombine.low %v129_v24, %v137_v25 }
  0x4b   :  { %1887 = vmatmul.mubr.bf16.gmra.mrb[20].mxu0 %v2804_v47  ;;  %v3605_v47 = vld [vmem:[%s4669_s1 + $0x220] sm:$0xff]  }
  0x4c   :  { %1984 = vmatmul.mubr.bf16.gmra.mrb[20].mxu1 %v2806_v49  ;;  %1894 = vmatprep.mubr.bf16.mxu0 %v2821_v50  ;;  %v3607_v49 = vld [vmem:[%s4669_s1 + $0x2a0] sm:$0xff]   ;;  %v3608_v50 = vld [vmem:[%s4669_s1 + $0x268] sm:$0xff]  }
  0x4d   :  { %1991 = vmatprep.mubr.bf16.mxu1 %v2823_v52  ;;  %v3610_v52 = vld [vmem:[%s4669_s1 + $0x2e8] sm:$0xff]  }
  0x53   :  { %1895 = vmatmul.mubr.bf16.gmra.mrb[24].mxu0 %v2820_v60  ;;  %v3614_v60 = vld [vmem:[%s4669_s1 + $0x2f0] sm:$0xff]  }
  0x54   :  { %1992 = vmatmul.mubr.bf16.gmra.mrb[24].mxu1 %v2822_v61  ;;  %1902 = vmatprep.mubr.bf16.mxu0 %v2837_v62  ;;  %v2778_v61 = vcombine.low %v66_v38, %v74_v39  ;;  %v2793_v62 = vcombine.high %v81_v51, %v89_v53 }
  0x55   :  { %1999 = vmatprep.mubr.bf16.mxu1 %v2839_v63  ;;  %v2795_v63 = vcombine.high %v82_v54, %v90_v55  ;;  %v51_v54 = vld [vmem:[%s4670_s0 + $0x120] sm:$0xff] }
  0x56   :  { %v59_v55 = vld [vmem:[%s4670_s0 + $0x160] sm:$0xff] }
  0x5b   :  { %1903 = vmatmul.mubr.bf16.gmra.mrb[28].mxu0 %v2836_v4  ;;  %v105_v4 = vld [vmem:[%s4670_s0 + $0x2d0] sm:$0xff] }
  0x5c   :  { %2000 = vmatmul.mubr.bf16.gmra.mrb[28].mxu1 %v2838_v5  ;;  %2040 = vmatprep.mubr.bf16.mxu0 %v2729_v6  ;;  %v3618_v5 = vld [vmem:[%s4669_s1 + $0x2f8] sm:$0xff]  }
  0x5d   :  { %2137 = vmatprep.mubr.bf16.mxu1 %v2731_v7  ;;  %v98_v6 = vld [vmem:[%s4670_s0 + $0x298] sm:$0xff] }
  0x5e   :  { %v106_v7 = vld [vmem:[%s4670_s0 + $0x2d8] sm:$0xff] }
  0x63   :  { %2041 = vmatmul.mubr.bf16.vlgmr.msra.gmra.mrb[32].mxu0 %v2728_v10  ;;  %v3620_v10 = vld [vmem:[%s4669_s1 + $0x340] sm:$0xff]  }
  0x64   :  { %2138 = vmatmul.mubr.bf16.vlgmr.msra.gmra.mrb[32].mxu1 %v2730_v14  ;;  %3269 = vmatpush3.bf16.msra.mxu0 %v3589_v11  ;;  %v2792_v11 = vcombine.low %v81_v51, %v89_v53  ;;  %v2809_v14 = vcombine.high %v97_v3, %v105_v4  ;;  %v3626_v51 = vld [vmem:[%s4669_s1 + $0x3c8] sm:$0xff]  }
  0x65   :  { %3333 = vmatpush3.bf16.msra.mxu1 %v3591_v15  ;;  %2048 = vmatprep.mubr.bf16.mxu0 %v2745_v16  ;;  %v2811_v15 = vcombine.high %v98_v6, %v106_v7  ;;  %v113_v16 = vld [vmem:[%s4670_s0 + $0x310] sm:$0xff]  ;;  %v3627_v53 = vld [vmem:[%s4669_s1 + $0x388] sm:$0xff]  }
  0x66   :  { %2145 = vmatprep.mubr.bf16.mxu1 %v2747_v18  ;;  %3270 = vmatprep.subr.bf16.mxu0 %v3592_v17  ;;  %v121_v17 = vld [vmem:[%s4670_s0 + $0x350] sm:$0xff]  ;;  %v114_v18 = vld [vmem:[%s4670_s0 + $0x318] sm:$0xff] }
  0x67   :  { %3334 = vmatprep.subr.bf16.mxu1 %v3594_v20  ;;  %v2808_v20 = vcombine.low %v97_v3, %v105_v4  ;;  %v2825_v22 = vcombine.high %v113_v16, %v121_v17  ;;  %v3634_v3 = vld [vmem:[%s4669_s1 + $0x3d8] sm:$0xff]   ;;  %v67_v4 = vld [vmem:[%s4670_s0 + $0x1a0] sm:$0xff] }
  0x68   :  { %3271 = vmatpush3.bf16.msra.mxu0 %v3593_v19  ;;  %v122_v19 = vld [vmem:[%s4670_s0 + $0x358] sm:$0xff] }
  0x69   :  { %3335 = vmatpush3.bf16.msra.mxu1 %v3595_v21  ;;  %3272 = vmatprep.subr.bf16.mxu0 %v3596_v26  ;;  %v2810_v21 = vcombine.low %v98_v6, %v106_v7  ;;  %v2827_v23 = vcombine.high %v114_v18, %v122_v19  ;;  %v130_v26 = vld [vmem:[%s4670_s0 + $0x398] sm:$0xff]  ;;  %v68_v6 = vld [vmem:[%s4670_s0 + $0x1a8] sm:$0xff] }
  0x6a   :  { %3336 = vmatprep.subr.bf16.mxu1 %v3598_v27  ;;  %v138_v27 = vld [vmem:[%s4670_s0 + $0x3d8] sm:$0xff] }
  0x6b   :  { %2049 = vmatmul.mubr.bf16.gmra.mrb[36].mxu0 %v2744_v28  ;;  %v2824_v28 = vcombine.low %v113_v16, %v121_v17  ;;  %v3633_v7 = vld [vmem:[%s4669_s1 + $0x318] sm:$0xff]   ;;  %v3637_v16 = vld [vmem:[%s4669_s1 + $0x320] sm:$0xff]  }
  0x6c   :  { %2146 = vmatmul.mubr.bf16.gmra.mrb[36].mxu1 %v2746_v29  ;;  %2056 = vmatprep.mubr.bf16.mxu0 %v2761_v30  ;;  %v2826_v29 = vcombine.low %v114_v18, %v122_v19  ;;  %v2841_v30 = vcombine.high %v129_v24, %v137_v25  ;;  %v3639_v17 = vld [vmem:[%s4669_s1 + $0x3a0] sm:$0xff]   ;;  %v3640_v18 = vld [vmem:[%s4669_s1 + $0x368] sm:$0xff]  }
  0x6d   :  { %2153 = vmatprep.mubr.bf16.mxu1 %v2763_v31  ;;  %3273 = vmatpush3.bf16.msra.mxu0 %v3597_v32  ;;  %v2843_v31 = vcombine.high %v130_v26, %v138_v27  ;;  %v19_v32 = vld [vmem:[%s4670_s0 + $0x20] sm:$0xff]  ;;  %v3642_v19 = vld [vmem:[%s4669_s1 + $0x3e8] sm:$0xff]  }
  0x6e   :  { %3337 = vmatpush3.bf16.msra.mxu1 %v3599_v33  ;;  %3274 = vmatprep.subr.bf16.mxu0 %v3600_v34  ;;  %v27_v33 = vld [vmem:[%s4670_s0 + $0x60] sm:$0xff]  ;;  %v20_v34 = vld [vmem:[%s4670_s0 + $0x28] sm:$0xff] }
  0x6f   :  { %3338 = vmatprep.subr.bf16.mxu1 %v3602_v37  ;;  %v2842_v37 = vcombine.low %v130_v26, %v138_v27  ;;  %v2733_v38 = vcombine.high %v19_v32, %v27_v33  ;;  %v2735_v39 = vcombine.high %v20_v34, %v28_v35  ;;  %v92_v24 = vld [vmem:[%s4670_s0 + $0x268] sm:$0xff]  ;;  %v3644_v26 = vld [vmem:[%s4669_s1 + $0x370] sm:$0xff]  }
  0x70   :  { %v3643_v25 = vld [vmem:[%s4669_s1 + $0x3a8] sm:$0xff]  }
  0x71   :  { %3275 = vmatpush3.bf16.msra.mxu0 %v3601_v40  ;;  %v35_v40 = vld [vmem:[%s4670_s0 + $0xa0] sm:$0xff] }
  0x72   :  { %3339 = vmatpush3.bf16.msra.mxu1 %v3603_v41  ;;  %3276 = vmatprep.subr.bf16.mxu0 %v3604_v42  ;;  %v43_v41 = vld [vmem:[%s4670_s0 + $0xe0] sm:$0xff]  ;;  %v2732_v42 = vcombine.low %v19_v32, %v27_v33  ;;  %v3645_v32 = vld [vmem:[%s4669_s1 + $0x330] sm:$0xff]  }
  0x73   :  { %2057 = vmatmul.mubr.bf16.gmra.mrb[40].mxu0 %v2760_v43  ;;  %3340 = vmatprep.subr.bf16.mxu1 %v3606_v44  ;;  %v36_v43 = vld [vmem:[%s4670_s0 + $0xa8] sm:$0xff]  ;;  %v3647_v33 = vld [vmem:[%s4669_s1 + $0x3b0] sm:$0xff]  }
  0x74   :  { %2154 = vmatmul.mubr.bf16.gmra.mrb[40].mxu1 %v2762_v45  ;;  %2064 = vmatprep.mubr.bf16.mxu0 %v2777_v46  ;;  %v44_v44 = vld [vmem:[%s4670_s0 + $0xe8] sm:$0xff]  ;;  %v2734_v45 = vcombine.low %v20_v34, %v28_v35  ;;  %v3621_v46 = vld [vmem:[%s4669_s1 + $0x300] sm:$0xff]   ;;  %v3648_v34 = vld [vmem:[%s4669_s1 + $0x378] sm:$0xff]  }
  0x75   :  { %2161 = vmatprep.mubr.bf16.mxu1 %v2779_v48  ;;  %3277 = vmatpush3.bf16.msra.mxu0 %v3605_v47  ;;  %v3623_v47 = vld [vmem:[%s4669_s1 + $0x380] sm:$0xff]   ;;  %v2749_v48 = vcombine.high %v35_v40, %v43_v41  ;;  %v3650_v35 = vld [vmem:[%s4669_s1 + $0x3f8] sm:$0xff]  }
  0x76   :  { %3341 = vmatpush3.bf16.msra.mxu1 %v3607_v49  ;;  %3278 = vmatprep.subr.bf16.mxu0 %v3608_v50  ;;  %v2751_v49 = vcombine.high %v36_v43, %v44_v44  ;;  %v3624_v50 = vld [vmem:[%s4669_s1 + $0x348] sm:$0xff]  }
  0x77   :  { %3342 = vmatprep.subr.bf16.mxu1 %v3610_v52  ;;  %v3625_v52 = vld [vmem:[%s4669_s1 + $0x308] sm:$0xff]  }
  0x79   :  { %3279 = vmatpush3.bf16.msra.mxu0 %v3609_v56  ;;  %v3628_v56 = vld [vmem:[%s4669_s1 + $0x350] sm:$0xff]  }
  0x7a   :  { %3343 = vmatpush3.bf16.msra.mxu1 %v3611_v57  ;;  %3280 = vmatprep.subr.bf16.mxu0 %v3612_v58  ;;  %v52_v57 = vld [vmem:[%s4670_s0 + $0x128] sm:$0xff] }
  0x7b   :  { %2065 = vmatmul.mubr.bf16.gmra.mrb[44].mxu0 %v2776_v59  ;;  %3344 = vmatprep.subr.bf16.mxu1 %v3614_v60  ;;  %v60_v58 = vld [vmem:[%s4670_s0 + $0x168] sm:$0xff]  ;;  %v3630_v59 = vld [vmem:[%s4669_s1 + $0x3d0] sm:$0xff]   ;;  %v2748_v60 = vcombine.low %v35_v40, %v43_v41  ;;  %v3651_v41 = vld [vmem:[%s4669_s1 + $0x3b8] sm:$0xff]  }
  0x7c   :  { %2162 = vmatmul.mubr.bf16.gmra.mrb[44].mxu1 %v2778_v61  ;;  %2072 = vmatprep.mubr.bf16.mxu0 %v2793_v62  ;;  %v2750_v61 = vcombine.low %v36_v43, %v44_v44  ;;  %v2765_v62 = vcombine.high %v51_v54, %v59_v55  ;;  %v108_v40 = vld [vmem:[%s4670_s0 + $0x2e8] sm:$0xff] }
  0x7d   :  { %2169 = vmatprep.mubr.bf16.mxu1 %v2795_v63  ;;  %3281 = vmatpush3.bf16.msra.mxu0 %v3613_v0  ;;  %v2767_v63 = vcombine.high %v52_v57, %v60_v58  ;;  %v3629_v0 = vld [vmem:[%s4669_s1 + $0x310] sm:$0xff]  }
  0x7e   :  { %3345 = vmatpush3.bf16.msra.mxu1 %v3615_v1  ;;  %3282 = vmatprep.subr.bf16.mxu0 %v3616_v2  ;;  %v3631_v1 = vld [vmem:[%s4669_s1 + $0x390] sm:$0xff]   ;;  %v3632_v2 = vld [vmem:[%s4669_s1 + $0x358] sm:$0xff]  }
  0x7f   :  { %3346 = vmatprep.subr.bf16.mxu1 %v3618_v5  ;;  %v75_v5 = vld [vmem:[%s4670_s0 + $0x1e0] sm:$0xff] }
  0x80   :  { %v2780_v27 = vcombine.low %v67_v4, %v75_v5 }
  0x81   :  { %3283 = vmatpush3.bf16.msra.mxu0 %v3617_v8  ;;  %v76_v8 = vld [vmem:[%s4670_s0 + $0x1e8] sm:$0xff] }
  0x82   :  { %3347 = vmatpush3.bf16.msra.mxu1 %v3619_v9  ;;  %3396 = vmatprep.subr.bf16.mxu0 %v3620_v10  ;;  %v3635_v9 = vld [vmem:[%s4669_s1 + $0x398] sm:$0xff]   ;;  %v3636_v10 = vld [vmem:[%s4669_s1 + $0x360] sm:$0xff]  }
  0x83   :  { %2073 = vmatmul.mubr.bf16.gmra.mrb[48].mxu0 %v2792_v11  ;;  %3460 = vmatprep.subr.bf16.mxu1 %v3622_v12  ;;  %v2764_v11 = vcombine.low %v51_v54, %v59_v55  ;;  %v3638_v12 = vld [vmem:[%s4669_s1 + $0x3e0] sm:$0xff]  }
  0x84   :  { %2170 = vmatmul.mubr.bf16.gmra.mrb[48].mxu1 %v2794_v13  ;;  %2080 = vmatprep.mubr.bf16.mxu0 %v2809_v14  ;;  %v2766_v13 = vcombine.low %v52_v57, %v60_v58  ;;  %v2781_v14 = vcombine.high %v67_v4, %v75_v5  ;;  %v131_v54 = vld [vmem:[%s4670_s0 + $0x3a0] sm:$0xff]  ;;  %v140_v57 = vld [vmem:[%s4670_s0 + $0x3e8] sm:$0xff] }
  0x85   :  { %2177 = vmatprep.mubr.bf16.mxu1 %v2811_v15  ;;  %v2783_v15 = vcombine.high %v68_v6, %v76_v8  ;;  %v139_v55 = vld [vmem:[%s4670_s0 + $0x3e0] sm:$0xff] }
  0x8b   :  { %2081 = vmatmul.mubr.bf16.gmra.mrb[52].mxu0 %v2808_v20  ;;  %v83_v20 = vld [vmem:[%s4670_s0 + $0x220] sm:$0xff] }
  0x8c   :  { %2178 = vmatmul.mubr.bf16.gmra.mrb[52].mxu1 %v2810_v21  ;;  %2088 = vmatprep.mubr.bf16.mxu0 %v2825_v22  ;;  %v91_v21 = vld [vmem:[%s4670_s0 + $0x260] sm:$0xff]  ;;  %v84_v22 = vld [vmem:[%s4670_s0 + $0x228] sm:$0xff] }
  0x8d   :  { %2185 = vmatprep.mubr.bf16.mxu1 %v2827_v23  ;;  %v3641_v23 = vld [vmem:[%s4669_s1 + $0x328] sm:$0xff]   ;;  %v2798_v43 = vcombine.low %v84_v22, %v92_v24 }
  0x93   :  { %2089 = vmatmul.mubr.bf16.gmra.mrb[56].mxu0 %v2824_v28  ;;  %v3646_v28 = vld [vmem:[%s4669_s1 + $0x3f0] sm:$0xff]  }
  0x94   :  { %2186 = vmatmul.mubr.bf16.gmra.mrb[56].mxu1 %v2826_v29  ;;  %2096 = vmatprep.mubr.bf16.mxu0 %v2841_v30  ;;  %v2782_v29 = vcombine.low %v68_v6, %v76_v8  ;;  %v2797_v30 = vcombine.high %v83_v20, %v91_v21  ;;  %v37_v6 = vld [vmem:[%s4670_s0 + $0xb0] sm:$0xff]  ;;  %v38_v8 = vld [vmem:[%s4670_s0 + $0xb8] sm:$0xff] }
  0x95   :  { %2193 = vmatprep.mubr.bf16.mxu1 %v2843_v31  ;;  %v2799_v31 = vcombine.high %v84_v22, %v92_v24  ;;  %v69_v22 = vld [vmem:[%s4670_s0 + $0x1b0] sm:$0xff]  ;;  %v70_v24 = vld [vmem:[%s4670_s0 + $0x1b8] sm:$0xff] }
  0x9b   :  { %2097 = vmatmul.mubr.bf16.gmra.mrb[60].mxu0 %v2840_v36  ;;  %v99_v36 = vld [vmem:[%s4670_s0 + $0x2a0] sm:$0xff] }
  0x9c   :  { %2194 = vmatmul.mubr.bf16.gmra.mrb[60].mxu1 %v2842_v37  ;;  %2234 = vmatprep.mubr.bf16.mxu0 %v2733_v38  ;;  %v107_v37 = vld [vmem:[%s4670_s0 + $0x2e0] sm:$0xff]  ;;  %v3649_v38 = vld [vmem:[%s4669_s1 + $0x338] sm:$0xff]  }
  0x9d   :  { %2331 = vmatprep.mubr.bf16.mxu1 %v2735_v39  ;;  %v100_v39 = vld [vmem:[%s4670_s0 + $0x2a8] sm:$0xff]  ;;  %v2813_v44 = vcombine.high %v99_v36, %v107_v37 }
  0xa3   :  { %2235 = vmatmul.mubr.bf16.vlgmr.msra.gmra.mrb[64].mxu0 %v2732_v42  ;;  %v2796_v42 = vcombine.low %v83_v20, %v91_v21 }
  0xa4   :  { %2332 = vmatmul.mubr.bf16.vlgmr.msra.gmra.mrb[64].mxu1 %v2734_v45  ;;  %3397 = vmatpush3.bf16.msra.mxu0 %v3621_v46  ;;  %v2815_v45 = vcombine.high %v100_v39, %v108_v40  ;;  %v115_v46 = vld [vmem:[%s4670_s0 + $0x320] sm:$0xff] }
  0xa5   :  { %3461 = vmatpush3.bf16.msra.mxu1 %v3623_v47  ;;  %2242 = vmatprep.mubr.bf16.mxu0 %v2749_v48  ;;  %v123_v47 = vld [vmem:[%s4670_s0 + $0x360] sm:$0xff]  ;;  %v116_v48 = vld [vmem:[%s4670_s0 + $0x328] sm:$0xff] }
  0xa6   :  { %2339 = vmatprep.mubr.bf16.mxu1 %v2751_v49  ;;  %3398 = vmatprep.subr.bf16.mxu0 %v3624_v50  ;;  %v124_v49 = vld [vmem:[%s4670_s0 + $0x368] sm:$0xff]  ;;  %v2812_v50 = vcombine.low %v99_v36, %v107_v37  ;;  %v2828_v58 = vcombine.low %v115_v46, %v123_v47  ;;  %v4407_v36 = vld [vmem:[%s4671_s2] ss:$0 sm:$0xff] }
  0xa7   :  { %3462 = vmatprep.subr.bf16.mxu1 %v3626_v51  ;;  %v2814_v51 = vcombine.low %v100_v39, %v108_v40 }
  0xa8   :  { %3399 = vmatpush3.bf16.msra.mxu0 %v3625_v52  ;;  %v2829_v52 = vcombine.high %v115_v46, %v123_v47 }
  0xa9   :  { %3463 = vmatpush3.bf16.msra.mxu1 %v3627_v53  ;;  %3400 = vmatprep.subr.bf16.mxu0 %v3628_v56  ;;  %v2831_v53 = vcombine.high %v116_v48, %v124_v49  ;;  %v132_v56 = vld [vmem:[%s4670_s0 + $0x3a8] sm:$0xff] }
  0xaa   :  { %3464 = vmatprep.subr.bf16.mxu1 %v3630_v59  ;;  %v2830_v59 = vcombine.low %v116_v48, %v124_v49 }
  0xab   :  { %2243 = vmatmul.mubr.bf16.gmra.mrb[68].mxu0 %v2748_v60  ;;  %v2845_v60 = vcombine.high %v131_v54, %v139_v55 }
  0xac   :  { %2340 = vmatmul.mubr.bf16.gmra.mrb[68].mxu1 %v2750_v61  ;;  %2250 = vmatprep.mubr.bf16.mxu0 %v2765_v62  ;;  %v2847_v61 = vcombine.high %v132_v56, %v140_v57  ;;  %v21_v62 = vld [vmem:[%s4670_s0 + $0x30] sm:$0xff] }
  0xad   :  { %2347 = vmatprep.mubr.bf16.mxu1 %v2767_v63  ;;  %3401 = vmatpush3.bf16.msra.mxu0 %v3629_v0  ;;  %v29_v63 = vld [vmem:[%s4670_s0 + $0x70] sm:$0xff]  ;;  %v22_v0 = vld [vmem:[%s4670_s0 + $0x38] sm:$0xff] }
  0xae   :  { %3465 = vmatpush3.bf16.msra.mxu1 %v3631_v1  ;;  %3402 = vmatprep.subr.bf16.mxu0 %v3632_v2  ;;  %v30_v1 = vld [vmem:[%s4670_s0 + $0x78] sm:$0xff]  ;;  %v2844_v2 = vcombine.low %v131_v54, %v139_v55  ;;  %v2737_v4 = vcombine.high %v21_v62, %v29_v63  ;;  %v101_v54 = vld [vmem:[%s4670_s0 + $0x2b0] sm:$0xff] }
  0xaf   :  { %3466 = vmatprep.subr.bf16.mxu1 %v3634_v3  ;;  %v2846_v3 = vcombine.low %v132_v56, %v140_v57  ;;  %v2739_v5 = vcombine.high %v22_v0, %v30_v1  ;;  %v109_v55 = vld [vmem:[%s4670_s0 + $0x2f0] sm:$0xff] }
  0xb1   :  { %3403 = vmatpush3.bf16.msra.mxu0 %v3633_v7  ;;  %v45_v7 = vld [vmem:[%s4670_s0 + $0xf0] sm:$0xff] }
  0xb2   :  { %3467 = vmatpush3.bf16.msra.mxu1 %v3635_v9  ;;  %3404 = vmatprep.subr.bf16.mxu0 %v3636_v10  ;;  %v46_v9 = vld [vmem:[%s4670_s0 + $0xf8] sm:$0xff]  ;;  %v2736_v10 = vcombine.low %v21_v62, %v29_v63 }
  0xb3   :  { %2251 = vmatmul.mubr.bf16.gmra.mrb[72].mxu0 %v2764_v11  ;;  %3468 = vmatprep.subr.bf16.mxu1 %v3638_v12  ;;  %v2738_v11 = vcombine.low %v22_v0, %v30_v1  ;;  %v2753_v12 = vcombine.high %v37_v6, %v45_v7 }
  0xb4   :  { %2348 = vmatmul.mubr.bf16.gmra.mrb[72].mxu1 %v2766_v13  ;;  %2258 = vmatprep.mubr.bf16.mxu0 %v2781_v14  ;;  %v2755_v13 = vcombine.high %v38_v8, %v46_v9  ;;  %v53_v14 = vld [vmem:[%s4670_s0 + $0x130] sm:$0xff] }
  0xb5   :  { %2355 = vmatprep.mubr.bf16.mxu1 %v2783_v15  ;;  %3405 = vmatpush3.bf16.msra.mxu0 %v3637_v16  ;;  %v61_v15 = vld [vmem:[%s4670_s0 + $0x170] sm:$0xff]  ;;  %v54_v16 = vld [vmem:[%s4670_s0 + $0x138] sm:$0xff] }
  0xb6   :  { %3469 = vmatpush3.bf16.msra.mxu1 %v3639_v17  ;;  %3406 = vmatprep.subr.bf16.mxu0 %v3640_v18  ;;  %v62_v17 = vld [vmem:[%s4670_s0 + $0x178] sm:$0xff]  ;;  %v2752_v18 = vcombine.low %v37_v6, %v45_v7  ;;  %v2769_v20 = vcombine.high %v53_v14, %v61_v15 }
  0xb7   :  { %3470 = vmatprep.subr.bf16.mxu1 %v3642_v19  ;;  %v2754_v19 = vcombine.low %v38_v8, %v46_v9  ;;  %v2771_v21 = vcombine.high %v54_v16, %v62_v17 }
  0xb9   :  { %3407 = vmatpush3.bf16.msra.mxu0 %v3641_v23  ;;  %v77_v23 = vld [vmem:[%s4670_s0 + $0x1f0] sm:$0xff] }
  0xba   :  { %3471 = vmatpush3.bf16.msra.mxu1 %v3643_v25  ;;  %3408 = vmatprep.subr.bf16.mxu0 %v3644_v26  ;;  %v78_v25 = vld [vmem:[%s4670_s0 + $0x1f8] sm:$0xff]  ;;  %v2768_v26 = vcombine.low %v53_v14, %v61_v15  ;;  %v117_v14 = vld [vmem:[%s4670_s0 + $0x330] sm:$0xff] }
  0xbb   :  { %2259 = vmatmul.mubr.bf16.gmra.mrb[76].mxu0 %v2780_v27  ;;  %3472 = vmatprep.subr.bf16.mxu1 %v3646_v28  ;;  %v2770_v27 = vcombine.low %v54_v16, %v62_v17  ;;  %v2785_v28 = vcombine.high %v69_v22, %v77_v23  ;;  %v125_v15 = vld [vmem:[%s4670_s0 + $0x370] sm:$0xff] }
  0xbc   :  { %2356 = vmatmul.mubr.bf16.gmra.mrb[76].mxu1 %v2782_v29  ;;  %2266 = vmatprep.mubr.bf16.mxu0 %v2797_v30  ;;  %v2787_v29 = vcombine.high %v70_v24, %v78_v25  ;;  %v85_v30 = vld [vmem:[%s4670_s0 + $0x230] sm:$0xff] }
  0xbd   :  { %2363 = vmatprep.mubr.bf16.mxu1 %v2799_v31  ;;  %3409 = vmatpush3.bf16.msra.mxu0 %v3645_v32  ;;  %v93_v31 = vld [vmem:[%s4670_s0 + $0x270] sm:$0xff] }
  0xbe   :  { %3473 = vmatpush3.bf16.msra.mxu1 %v3647_v33  ;;  %3410 = vmatprep.subr.bf16.mxu0 %v3648_v34  ;;  %v86_v33 = vld [vmem:[%s4670_s0 + $0x238] sm:$0xff]  ;;  %v2800_v62 = vcombine.low %v85_v30, %v93_v31 }
  0xbf   :  { %3474 = vmatprep.subr.bf16.mxu1 %v3650_v35  ;;  %v94_v34 = vld [vmem:[%s4670_s0 + $0x278] sm:$0xff] }
  0xc0   :  { %v2803_v47 = vcombine.high %v86_v33, %v94_v34 }
  0xc1   :  { %3411 = vmatpush3.bf16.msra.mxu0 %v3649_v38  ;;  %v2784_v38 = vcombine.low %v69_v22, %v77_v23  ;;  %v2816_v22 = vcombine.low %v101_v54, %v109_v55 }
  0xc2   :  { %3475 = vmatpush3.bf16.msra.mxu1 %v3651_v41 }
  0xc3   :  { %2267 = vmatmul.mubr.bf16.gmra.mrb[80].mxu0 %v2796_v42  ;;  %v2786_v42 = vcombine.low %v70_v24, %v78_v25 }
  0xc4   :  { %2364 = vmatmul.mubr.bf16.gmra.mrb[80].mxu1 %v2798_v43  ;;  %2274 = vmatprep.mubr.bf16.mxu0 %v2813_v44  ;;  %v2801_v43 = vcombine.high %v85_v30, %v93_v31 }
  0xc5   :  { %2371 = vmatprep.mubr.bf16.mxu1 %v2815_v45 }
  0xcb   :  { %2275 = vmatmul.mubr.bf16.gmra.mrb[84].mxu0 %v2812_v50 }
  0xcc   :  { %2372 = vmatmul.mubr.bf16.gmra.mrb[84].mxu1 %v2814_v51  ;;  %2282 = vmatprep.mubr.bf16.mxu0 %v2829_v52 }
  0xcd   :  { %2379 = vmatprep.mubr.bf16.mxu1 %v2831_v53 }
  0xd3   :  { %2283 = vmatmul.mubr.bf16.gmra.mrb[88].mxu0 %v2828_v58  ;;  %v102_v58 = vld [vmem:[%s4670_s0 + $0x2b8] sm:$0xff] }
  0xd4   :  { %2380 = vmatmul.mubr.bf16.gmra.mrb[88].mxu1 %v2830_v59  ;;  %2290 = vmatprep.mubr.bf16.mxu0 %v2845_v60  ;;  %v110_v59 = vld [vmem:[%s4670_s0 + $0x2f8] sm:$0xff] }
  0xd5   :  { %2387 = vmatprep.mubr.bf16.mxu1 %v2847_v61  ;;  %v2819_v7 = vcombine.high %v102_v58, %v110_v59 }
  0xdb   :  { %2291 = vmatmul.mubr.bf16.gmra.mrb[92].mxu0 %v2844_v2  ;;  %v2802_v2 = vcombine.low %v86_v33, %v94_v34 }
  0xdc   :  { %2388 = vmatmul.mubr.bf16.gmra.mrb[92].mxu1 %v2846_v3  ;;  %2428 = vmatprep.mubr.bf16.mxu0 %v2737_v4  ;;  %v2817_v3 = vcombine.high %v101_v54, %v109_v55 }
  0xdd   :  { %2525 = vmatprep.mubr.bf16.mxu1 %v2739_v5 }
  0xe3   :  { %2429 = vmatmul.mubr.bf16.vlgmr.msra.gmra.mrb[96].mxu0 %v2736_v10 }
  0xe4   :  { %2526 = vmatmul.mubr.bf16.vlgmr.msra.gmra.mrb[96].mxu1 %v2738_v11  ;;  %2436 = vmatprep.mubr.bf16.mxu0 %v2753_v12 }
  0xe5   :  { %2533 = vmatprep.mubr.bf16.mxu1 %v2755_v13 }
  0xeb   :  { %2437 = vmatmul.mubr.bf16.gmra.mrb[100].mxu0 %v2752_v18  ;;  %v118_v18 = vld [vmem:[%s4670_s0 + $0x338] sm:$0xff] }
  0xec   :  { %2534 = vmatmul.mubr.bf16.gmra.mrb[100].mxu1 %v2754_v19  ;;  %2444 = vmatprep.mubr.bf16.mxu0 %v2769_v20  ;;  %v126_v19 = vld [vmem:[%s4670_s0 + $0x378] sm:$0xff] }
  0xed   :  { %2541 = vmatprep.mubr.bf16.mxu1 %v2771_v21  ;;  %v2835_v31 = vcombine.high %v118_v18, %v126_v19 }
  0xf3   :  { %2445 = vmatmul.mubr.bf16.gmra.mrb[104].mxu0 %v2768_v26  ;;  %v2818_v26 = vcombine.low %v102_v58, %v110_v59 }
  0xf4   :  { %2542 = vmatmul.mubr.bf16.gmra.mrb[104].mxu1 %v2770_v27  ;;  %2452 = vmatprep.mubr.bf16.mxu0 %v2785_v28  ;;  %v2833_v27 = vcombine.high %v117_v14, %v125_v15 }
  0xf5   :  { %2549 = vmatprep.mubr.bf16.mxu1 %v2787_v29 }
  0xf6   :  { %v3028_v32 = vpop.f32.mrb[0].mxu0 }
  0xf7   :  { %v3092_v35 = vpop.f32.mrb[0].mxu1  ;;  %v3029_v37 = vpop.f32.mrb[1].mxu0 }
  0xf8   :  { %v3030_v39 = vadd.f32 %v3029_v37, %v3028_v32  ;;  %v3093_v40 = vpop.f32.mrb[1].mxu1  ;;  %v3031_v41 = vpop.f32.mrb[2].mxu0 }
  0xf9   :  { %v3094_v44 = vadd.f32 %v3093_v40, %v3092_v35  ;;  %v3095_v45 = vpop.f32.mrb[2].mxu1  ;;  %v3032_v46 = vpop.f32.mrb[3].mxu0  ;;  %v141_v40 = vld [vmem:[%s4670_s0 + $0x3f0] sm:$0xff] }
  0xfa   :  { %v1849_v48 = vadd.f32 %v3030_v39, %v4407_v36  ;;  %v3033_v49 = vadd.f32 %v3032_v46, %v3031_v41  ;;  %v3096_v50 = vpop.f32.mrb[3].mxu1  ;;  %v133_v39 = vld [vmem:[%s4670_s0 + $0x3b0] sm:$0xff] }
  0xfb   :  { %v3097_v51 = vadd.f32 %v3096_v50, %v3095_v45  ;;  %2453 = vmatmul.mubr.bf16.gmra.mrb[108].mxu0 %v2784_v38 }
  0xfc   :  { %v4410_v52 = vadd.f32 %v3094_v44, %v1849_v48  ;;  %v1852_v53 = vadd.f32 %v3033_v49, %v4407_v36  ;;  %2550 = vmatmul.mubr.bf16.gmra.mrb[108].mxu1 %v2786_v42  ;;  %2460 = vmatprep.mubr.bf16.mxu0 %v2801_v43  ;;  %v134_v43 = vld [vmem:[%s4670_s0 + $0x3b8] sm:$0xff] }
  0xfd   :  { %2557 = vmatprep.mubr.bf16.mxu1 %v2803_v47  ;;  %v142_v44 = vld [vmem:[%s4670_s0 + $0x3f8] sm:$0xff]  ;;  %v2832_v47 = vcombine.low %v117_v14, %v125_v15 }
  0xfe   :  { %v4419_v56 = vadd.f32 %v3097_v51, %v1852_v53  ;;  %v3034_v57 = vpop.f32.mrb[4].mxu0  ;;  %v2834_v51 = vcombine.low %v118_v18, %v126_v19  ;;  %v2849_v53 = vcombine.high %v133_v39, %v141_v40  ;;  %v2851_v58 = vcombine.high %v134_v43, %v142_v44 }
  0xff   :  { %v3098_v60 = vpop.f32.mrb[4].mxu1  ;;  %v3035_v61 = vpop.f32.mrb[5].mxu0 }
 0x100   :  { %v3036_v63 = vadd.f32 %v3035_v61, %v3034_v57  ;;  %v3099_v0 = vpop.f32.mrb[5].mxu1  ;;  %v3037_v1 = vpop.f32.mrb[6].mxu0 }
 0x101   :  { %v3100_v4 = vadd.f32 %v3099_v0, %v3098_v60  ;;  %v3101_v5 = vpop.f32.mrb[6].mxu1  ;;  %v3038_v6 = vpop.f32.mrb[7].mxu0 }
 0x102   :  { %v1857_v8 = vadd.f32 %v3036_v63, %v4407_v36  ;;  %v3039_v9 = vadd.f32 %v3038_v6, %v3037_v1  ;;  %v3102_v10 = vpop.f32.mrb[7].mxu1 }
 0x103   :  { %v3103_v11 = vadd.f32 %v3102_v10, %v3101_v5  ;;  %2461 = vmatmul.mubr.bf16.gmra.mrb[112].mxu0 %v2800_v62  ;;  %v2848_v5 = vcombine.low %v133_v39, %v141_v40 }
 0x104   :  { %v4428_v12 = vadd.f32 %v3100_v4, %v1857_v8  ;;  %v1860_v13 = vadd.f32 %v3039_v9, %v4407_v36  ;;  %2558 = vmatmul.mubr.bf16.gmra.mrb[112].mxu1 %v2802_v2  ;;  %2468 = vmatprep.mubr.bf16.mxu0 %v2817_v3  ;;  %v2850_v9 = vcombine.low %v134_v43, %v142_v44 }
 0x105   :  { %2565 = vmatprep.mubr.bf16.mxu1 %v2819_v7 }
 0x106   :  { %v4437_v16 = vadd.f32 %v3103_v11, %v1860_v13  ;;  %v3040_v17 = vpop.f32.mrb[8].mxu0 }
 0x107   :  { %v3104_v20 = vpop.f32.mrb[8].mxu1  ;;  %v3041_v21 = vpop.f32.mrb[9].mxu0 }
 0x108   :  { %v3042_v23 = vadd.f32 %v3041_v21, %v3040_v17  ;;  %v3105_v24 = vpop.f32.mrb[9].mxu1  ;;  %v3043_v25 = vpop.f32.mrb[10].mxu0 }
 0x109   :  { %v3106_v28 = vadd.f32 %v3105_v24, %v3104_v20  ;;  %v3107_v29 = vpop.f32.mrb[10].mxu1  ;;  %v3044_v30 = vpop.f32.mrb[11].mxu0 }
 0x10a   :  { %v1865_v32 = vadd.f32 %v3042_v23, %v4407_v36  ;;  %v3045_v33 = vadd.f32 %v3044_v30, %v3043_v25  ;;  %v3108_v34 = vpop.f32.mrb[11].mxu1 }
 0x10b   :  { %v3109_v35 = vadd.f32 %v3108_v34, %v3107_v29  ;;  %2469 = vmatmul.mubr.bf16.gmra.mrb[116].mxu0 %v2816_v22 }
 0x10c   :  { %v4446_v37 = vadd.f32 %v3106_v28, %v1865_v32  ;;  %v1868_v38 = vadd.f32 %v3045_v33, %v4407_v36  ;;  %2566 = vmatmul.mubr.bf16.gmra.mrb[116].mxu1 %v2818_v26  ;;  %2476 = vmatprep.mubr.bf16.mxu0 %v2833_v27 }
 0x10d   :  { %2573 = vmatprep.mubr.bf16.mxu1 %v2835_v31 }
 0x10e   :  { %v4455_v41 = vadd.f32 %v3109_v35, %v1868_v38  ;;  %v3046_v42 = vpop.f32.mrb[12].mxu0 }
 0x10f   :  { %v3110_v45 = vpop.f32.mrb[12].mxu1  ;;  %v3047_v46 = vpop.f32.mrb[13].mxu0 }
 0x110   :  { %v3048_v48 = vadd.f32 %v3047_v46, %v3046_v42  ;;  %v3111_v49 = vpop.f32.mrb[13].mxu1  ;;  %v3049_v50 = vpop.f32.mrb[14].mxu0 }
 0x111   :  { %v3112_v54 = vadd.f32 %v3111_v49, %v3110_v45  ;;  %v3113_v55 = vpop.f32.mrb[14].mxu1  ;;  %v3050_v57 = vpop.f32.mrb[15].mxu0 }
 0x112   :  { %v1873_v59 = vadd.f32 %v3048_v48, %v4407_v36  ;;  %v3051_v60 = vadd.f32 %v3050_v57, %v3049_v50  ;;  %v3114_v61 = vpop.f32.mrb[15].mxu1 }
 0x113   :  { %v3115_v62 = vadd.f32 %v3114_v61, %v3113_v55  ;;  %2477 = vmatmul.mubr.bf16.gmra.mrb[120].mxu0 %v2832_v47 }
 0x114   :  { %v4464_v63 = vadd.f32 %v3112_v54, %v1873_v59  ;;  %v1876_v0 = vadd.f32 %v3051_v60, %v4407_v36  ;;  %2574 = vmatmul.mubr.bf16.gmra.mrb[120].mxu1 %v2834_v51  ;;  %2484 = vmatprep.mubr.bf16.mxu0 %v2849_v53 }
 0x115   :  { %2581 = vmatprep.mubr.bf16.mxu1 %v2851_v58 }
 0x116   :  { %v4467_v1 = vadd.f32 %v3115_v62, %v1876_v0  ;;  %v3052_v2 = vpop.f32.mrb[16].mxu0 }
 0x117   :  { %v3116_v3 = vpop.f32.mrb[16].mxu1  ;;  %v3053_v4 = vpop.f32.mrb[17].mxu0 }
 0x118   :  { %v3054_v6 = vadd.f32 %v3053_v4, %v3052_v2  ;;  %v3117_v7 = vpop.f32.mrb[17].mxu1  ;;  %v3055_v8 = vpop.f32.mrb[18].mxu0 }
 0x119   :  { %v3118_v10 = vadd.f32 %v3117_v7, %v3116_v3  ;;  %v3119_v11 = vpop.f32.mrb[18].mxu1  ;;  %v3056_v13 = vpop.f32.mrb[19].mxu0 }
 0x11a   :  { %v1881_v14 = vadd.f32 %v3054_v6, %v4407_v36  ;;  %v3057_v15 = vadd.f32 %v3056_v13, %v3055_v8  ;;  %v3120_v17 = vpop.f32.mrb[19].mxu1 }
 0x11b   :  { %v3121_v18 = vadd.f32 %v3120_v17, %v3119_v11  ;;  %2485 = vmatmul.mubr.bf16.gmra.mrb[124].mxu0 %v2848_v5 }
 0x11c   :  { %v4470_v19 = vadd.f32 %v3118_v10, %v1881_v14  ;;  %v1884_v20 = vadd.f32 %v3057_v15, %v4407_v36  ;;  %2582 = vmatmul.mubr.bf16.gmra.mrb[124].mxu1 %v2850_v9 }
 0x11e   :  { %v4473_v21 = vadd.f32 %v3121_v18, %v1884_v20  ;;  %v3058_v22 = vpop.f32.mrb[20].mxu0 }
 0x11f   :  { %v3122_v23 = vpop.f32.mrb[20].mxu1  ;;  %v3059_v24 = vpop.f32.mrb[21].mxu0 }
 0x120   :  { %v3060_v25 = vadd.f32 %v3059_v24, %v3058_v22  ;;  %v3123_v26 = vpop.f32.mrb[21].mxu1  ;;  %v3061_v27 = vpop.f32.mrb[22].mxu0 }
 0x121   :  { %v3124_v28 = vadd.f32 %v3123_v26, %v3122_v23  ;;  %v3125_v29 = vpop.f32.mrb[22].mxu1  ;;  %v3062_v30 = vpop.f32.mrb[23].mxu0 }
 0x122   :  { %v1889_v31 = vadd.f32 %v3060_v25, %v4407_v36  ;;  %v3063_v32 = vadd.f32 %v3062_v30, %v3061_v27  ;;  %v3126_v33 = vpop.f32.mrb[23].mxu1 }
 0x123   :  { %v3127_v34 = vadd.f32 %v3126_v33, %v3125_v29 }
 0x124   :  { %v4476_v35 = vadd.f32 %v3124_v28, %v1889_v31  ;;  %v1892_v38 = vadd.f32 %v3063_v32, %v4407_v36 }
 0x126   :  { %v4479_v39 = vadd.f32 %v3127_v34, %v1892_v38  ;;  %v3064_v40 = vpop.f32.mrb[24].mxu0 }
 0x127   :  { %v3128_v42 = vpop.f32.mrb[24].mxu1  ;;  %v3065_v43 = vpop.f32.mrb[25].mxu0 }
 0x128   :  { %v3066_v44 = vadd.f32 %v3065_v43, %v3064_v40  ;;  %v3129_v45 = vpop.f32.mrb[25].mxu1  ;;  %v3067_v46 = vpop.f32.mrb[26].mxu0 }
 0x129   :  { %v3130_v47 = vadd.f32 %v3129_v45, %v3128_v42  ;;  %v3131_v48 = vpop.f32.mrb[26].mxu1  ;;  %v3068_v49 = vpop.f32.mrb[27].mxu0 }
 0x12a   :  { %v1897_v50 = vadd.f32 %v3066_v44, %v4407_v36  ;;  %v3069_v51 = vadd.f32 %v3068_v49, %v3067_v46  ;;  %v3132_v53 = vpop.f32.mrb[27].mxu1 }
 0x12b   :  { %v3133_v54 = vadd.f32 %v3132_v53, %v3131_v48 }
 0x12c   :  { %v4482_v55 = vadd.f32 %v3130_v47, %v1897_v50  ;;  %v1900_v57 = vadd.f32 %v3069_v51, %v4407_v36 }
 0x12e   :  { %v4485_v58 = vadd.f32 %v3133_v54, %v1900_v57  ;;  %v3070_v59 = vpop.f32.mrb[28].mxu0 }
 0x12f   :  { %v3134_v60 = vpop.f32.mrb[28].mxu1  ;;  %v3071_v61 = vpop.f32.mrb[29].mxu0 }
 0x130   :  { %v3072_v62 = vadd.f32 %v3071_v61, %v3070_v59  ;;  %v3135_v0 = vpop.f32.mrb[29].mxu1  ;;  %v3073_v2 = vpop.f32.mrb[30].mxu0 }
 0x131   :  { %v3136_v3 = vadd.f32 %v3135_v0, %v3134_v60  ;;  %v3137_v4 = vpop.f32.mrb[30].mxu1  ;;  %v3074_v5 = vpop.f32.mrb[31].mxu0 }
 0x132   :  { %v1905_v6 = vadd.f32 %v3072_v62, %v4407_v36  ;;  %v3075_v7 = vadd.f32 %v3074_v5, %v3073_v2  ;;  %v3138_v8 = vpop.f32.mrb[31].mxu1 }
 0x133   :  { %v3139_v9 = vadd.f32 %v3138_v8, %v3137_v4 }
 0x134   :  { %v4488_v10 = vadd.f32 %v3136_v3, %v1905_v6  ;;  %v1908_v11 = vadd.f32 %v3075_v7, %v4407_v36 }
 0x136   :  { %v4491_v13 = vadd.f32 %v3139_v9, %v1908_v11  ;;  %v3156_v14 = vpop.f32.mrb[32].mxu0 }
 0x137   :  { %v3220_v15 = vpop.f32.mrb[32].mxu1  ;;  %v3157_v17 = vpop.f32.mrb[33].mxu0 }
 0x138   :  { %v3158_v18 = vadd.f32 %v3157_v17, %v3156_v14  ;;  %v3221_v20 = vpop.f32.mrb[33].mxu1  ;;  %v3159_v22 = vpop.f32.mrb[34].mxu0 }
 0x139   :  { %v3222_v23 = vadd.f32 %v3221_v20, %v3220_v15  ;;  %v3223_v24 = vpop.f32.mrb[34].mxu1  ;;  %v3160_v25 = vpop.f32.mrb[35].mxu0 }
 0x13a   :  { %v2043_v26 = vadd.f32 %v3158_v18, %v4410_v52  ;;  %v3161_v27 = vadd.f32 %v3160_v25, %v3159_v22  ;;  %v3224_v28 = vpop.f32.mrb[35].mxu1 }
 0x13b   :  { %v3225_v29 = vadd.f32 %v3224_v28, %v3223_v24 }
 0x13c   :  { %v4494_v30 = vadd.f32 %v3222_v23, %v2043_v26  ;;  %v2046_v36 = vadd.f32 %v3161_v27, %v4419_v56 }
 0x13e   :  { %v4497_v31 = vadd.f32 %v3225_v29, %v2046_v36  ;;  %v3162_v32 = vpop.f32.mrb[36].mxu0 }
 0x13f   :  { %v3226_v33 = vpop.f32.mrb[36].mxu1  ;;  %v3163_v34 = vpop.f32.mrb[37].mxu0 }
 0x140   :  { %v3164_v38 = vadd.f32 %v3163_v34, %v3162_v32  ;;  %v3227_v40 = vpop.f32.mrb[37].mxu1  ;;  %v3165_v42 = vpop.f32.mrb[38].mxu0 }
 0x141   :  { %v3228_v43 = vadd.f32 %v3227_v40, %v3226_v33  ;;  %v3229_v44 = vpop.f32.mrb[38].mxu1  ;;  %v3166_v45 = vpop.f32.mrb[39].mxu0 }
 0x142   :  { %v2051_v52 = vadd.f32 %v3164_v38, %v4428_v12  ;;  %v3167_v46 = vadd.f32 %v3166_v45, %v3165_v42  ;;  %v3230_v47 = vpop.f32.mrb[39].mxu1 }
 0x143   :  { %v3231_v48 = vadd.f32 %v3230_v47, %v3229_v44 }
 0x144   :  { %v4500_v49 = vadd.f32 %v3228_v43, %v2051_v52  ;;  %v2054_v56 = vadd.f32 %v3167_v46, %v4437_v16 }
 0x146   :  { %v4503_v50 = vadd.f32 %v3231_v48, %v2054_v56  ;;  %v3168_v51 = vpop.f32.mrb[40].mxu0 }
 0x147   :  { %v3232_v53 = vpop.f32.mrb[40].mxu1  ;;  %v3169_v54 = vpop.f32.mrb[41].mxu0 }
 0x148   :  { %v3170_v57 = vadd.f32 %v3169_v54, %v3168_v51  ;;  %v3233_v59 = vpop.f32.mrb[41].mxu1  ;;  %v3171_v60 = vpop.f32.mrb[42].mxu0 }
 0x149   :  { %v3234_v61 = vadd.f32 %v3233_v59, %v3232_v53  ;;  %v3235_v62 = vpop.f32.mrb[42].mxu1  ;;  %v3172_v0 = vpop.f32.mrb[43].mxu0 }
 0x14a   :  { %v2059_v12 = vadd.f32 %v3170_v57, %v4446_v37  ;;  %v3173_v2 = vadd.f32 %v3172_v0, %v3171_v60  ;;  %v3236_v3 = vpop.f32.mrb[43].mxu1 }
 0x14b   :  { %v3237_v4 = vadd.f32 %v3236_v3, %v3235_v62 }
 0x14c   :  { %v4506_v5 = vadd.f32 %v3234_v61, %v2059_v12  ;;  %v2062_v16 = vadd.f32 %v3173_v2, %v4455_v41 }
 0x14e   :  { %v4509_v6 = vadd.f32 %v3237_v4, %v2062_v16  ;;  %v3174_v7 = vpop.f32.mrb[44].mxu0 }
 0x14f   :  { %v3238_v8 = vpop.f32.mrb[44].mxu1  ;;  %v3175_v9 = vpop.f32.mrb[45].mxu0 }
 0x150   :  { %v3176_v11 = vadd.f32 %v3175_v9, %v3174_v7  ;;  %v3239_v14 = vpop.f32.mrb[45].mxu1  ;;  %v3177_v15 = vpop.f32.mrb[46].mxu0 }
 0x151   :  { %v3240_v17 = vadd.f32 %v3239_v14, %v3238_v8  ;;  %v3241_v18 = vpop.f32.mrb[46].mxu1  ;;  %v3178_v20 = vpop.f32.mrb[47].mxu0 }
 0x152   :  { %v2067_v37 = vadd.f32 %v3176_v11, %v4464_v63  ;;  %v3179_v22 = vadd.f32 %v3178_v20, %v3177_v15  ;;  %v3242_v23 = vpop.f32.mrb[47].mxu1 }
 0x153   :  { %v3243_v24 = vadd.f32 %v3242_v23, %v3241_v18 }
 0x154   :  { %v4512_v25 = vadd.f32 %v3240_v17, %v2067_v37  ;;  %v2070_v41 = vadd.f32 %v3179_v22, %v4467_v1 }
 0x156   :  { %v4515_v26 = vadd.f32 %v3243_v24, %v2070_v41  ;;  %v3180_v27 = vpop.f32.mrb[48].mxu0 }
 0x157   :  { %v3244_v28 = vpop.f32.mrb[48].mxu1  ;;  %v3181_v29 = vpop.f32.mrb[49].mxu0 }
 0x158   :  { %v3182_v36 = vadd.f32 %v3181_v29, %v3180_v27  ;;  %v3245_v32 = vpop.f32.mrb[49].mxu1  ;;  %v3183_v33 = vpop.f32.mrb[50].mxu0 }
 0x159   :  { %v3246_v34 = vadd.f32 %v3245_v32, %v3244_v28  ;;  %v3247_v38 = vpop.f32.mrb[50].mxu1  ;;  %v3184_v40 = vpop.f32.mrb[51].mxu0 }
 0x15a   :  { %v2075_v63 = vadd.f32 %v3182_v36, %v4470_v19  ;;  %v3185_v42 = vadd.f32 %v3184_v40, %v3183_v33  ;;  %v3248_v43 = vpop.f32.mrb[51].mxu1 }
 0x15b   :  { %v3249_v44 = vadd.f32 %v3248_v43, %v3247_v38 }
 0x15c   :  { %v4518_v45 = vadd.f32 %v3246_v34, %v2075_v63  ;;  %v2078_v1 = vadd.f32 %v3185_v42, %v4473_v21 }
 0x15e   :  { %v4521_v52 = vadd.f32 %v3249_v44, %v2078_v1  ;;  %v3186_v46 = vpop.f32.mrb[52].mxu0 }
 0x15f   :  { %v3250_v47 = vpop.f32.mrb[52].mxu1  ;;  %v3187_v48 = vpop.f32.mrb[53].mxu0 }
 0x160   :  { %v3188_v56 = vadd.f32 %v3187_v48, %v3186_v46  ;;  %v3251_v51 = vpop.f32.mrb[53].mxu1  ;;  %v3189_v53 = vpop.f32.mrb[54].mxu0 }
 0x161   :  { %v3252_v54 = vadd.f32 %v3251_v51, %v3250_v47  ;;  %v3253_v57 = vpop.f32.mrb[54].mxu1  ;;  %v3190_v59 = vpop.f32.mrb[55].mxu0 }
 0x162   :  { %v2083_v19 = vadd.f32 %v3188_v56, %v4476_v35  ;;  %v3191_v60 = vadd.f32 %v3190_v59, %v3189_v53  ;;  %v3254_v61 = vpop.f32.mrb[55].mxu1 }
 0x163   :  { %v3255_v62 = vadd.f32 %v3254_v61, %v3253_v57 }
 0x164   :  { %v4524_v0 = vadd.f32 %v3252_v54, %v2083_v19  ;;  %v2086_v21 = vadd.f32 %v3191_v60, %v4479_v39 }
 0x166   :  { %v4527_v12 = vadd.f32 %v3255_v62, %v2086_v21  ;;  %v3192_v2 = vpop.f32.mrb[56].mxu0 }
 0x167   :  { %v3256_v3 = vpop.f32.mrb[56].mxu1  ;;  %v3193_v4 = vpop.f32.mrb[57].mxu0 }
 0x168   :  { %v3194_v16 = vadd.f32 %v3193_v4, %v3192_v2  ;;  %v3257_v7 = vpop.f32.mrb[57].mxu1  ;;  %v3195_v8 = vpop.f32.mrb[58].mxu0 }
 0x169   :  { %v3258_v9 = vadd.f32 %v3257_v7, %v3256_v3  ;;  %v3259_v11 = vpop.f32.mrb[58].mxu1  ;;  %v3196_v14 = vpop.f32.mrb[59].mxu0 }
 0x16a   :  { %v2091_v35 = vadd.f32 %v3194_v16, %v4482_v55  ;;  %v3197_v15 = vadd.f32 %v3196_v14, %v3195_v8  ;;  %v3260_v17 = vpop.f32.mrb[59].mxu1 }
 0x16b   :  { %v3261_v18 = vadd.f32 %v3260_v17, %v3259_v11 }
 0x16c   :  { %v4530_v20 = vadd.f32 %v3258_v9, %v2091_v35  ;;  %v2094_v39 = vadd.f32 %v3197_v15, %v4485_v58 }
 0x16e   :  { %v4533_v37 = vadd.f32 %v3261_v18, %v2094_v39  ;;  %v3198_v22 = vpop.f32.mrb[60].mxu0 }
 0x16f   :  { %v3262_v23 = vpop.f32.mrb[60].mxu1  ;;  %v3199_v24 = vpop.f32.mrb[61].mxu0 }
 0x170   :  { %v3200_v41 = vadd.f32 %v3199_v24, %v3198_v22  ;;  %v3263_v27 = vpop.f32.mrb[61].mxu1  ;;  %v3201_v28 = vpop.f32.mrb[62].mxu0 }
 0x171   :  { %v3264_v29 = vadd.f32 %v3263_v27, %v3262_v23  ;;  %v3265_v36 = vpop.f32.mrb[62].mxu1  ;;  %v3202_v32 = vpop.f32.mrb[63].mxu0 }
 0x172   :  { %v2099_v55 = vadd.f32 %v3200_v41, %v4488_v10  ;;  %v3203_v33 = vadd.f32 %v3202_v32, %v3201_v28  ;;  %v3266_v34 = vpop.f32.mrb[63].mxu1 }
 0x173   :  { %v3267_v38 = vadd.f32 %v3266_v34, %v3265_v36 }
 0x174   :  { %v4536_v40 = vadd.f32 %v3264_v29, %v2099_v55  ;;  %v2102_v58 = vadd.f32 %v3203_v33, %v4491_v13 }
 0x176   :  { %v4539_v63 = vadd.f32 %v3267_v38, %v2102_v58  ;;  %v3284_v42 = vpop.f32.mrb[64].mxu0 }
 0x177   :  { %v3348_v43 = vpop.f32.mrb[64].mxu1  ;;  %v3285_v44 = vpop.f32.mrb[65].mxu0 }
 0x178   :  { %v3286_v1 = vadd.f32 %v3285_v44, %v3284_v42  ;;  %v3349_v46 = vpop.f32.mrb[65].mxu1  ;;  %v3287_v47 = vpop.f32.mrb[66].mxu0 }
 0x179   :  { %v3350_v48 = vadd.f32 %v3349_v46, %v3348_v43  ;;  %v3351_v56 = vpop.f32.mrb[66].mxu1  ;;  %v3288_v51 = vpop.f32.mrb[67].mxu0 }
 0x17a   :  { %v2237_v10 = vadd.f32 %v3286_v1, %v4494_v30  ;;  %v3289_v53 = vadd.f32 %v3288_v51, %v3287_v47  ;;  %v3352_v54 = vpop.f32.mrb[67].mxu1 }
 0x17b   :  { %v3353_v57 = vadd.f32 %v3352_v54, %v3351_v56 }
 0x17c   :  { %v4542_v59 = vadd.f32 %v3350_v48, %v2237_v10  ;;  %v2240_v13 = vadd.f32 %v3289_v53, %v4497_v31 }
 0x17e   :  { %v4545_v19 = vadd.f32 %v3353_v57, %v2240_v13  ;;  %v3290_v60 = vpop.f32.mrb[68].mxu0 }
 0x17f   :  { %v3354_v61 = vpop.f32.mrb[68].mxu1  ;;  %v3291_v62 = vpop.f32.mrb[69].mxu0 }
 0x180   :  { %v3292_v21 = vadd.f32 %v3291_v62, %v3290_v60  ;;  %v3355_v2 = vpop.f32.mrb[69].mxu1  ;;  %v3293_v3 = vpop.f32.mrb[70].mxu0 }
 0x181   :  { %v3356_v4 = vadd.f32 %v3355_v2, %v3354_v61  ;;  %v3357_v16 = vpop.f32.mrb[70].mxu1  ;;  %v3294_v7 = vpop.f32.mrb[71].mxu0 }
 0x182   :  { %v2245_v30 = vadd.f32 %v3292_v21, %v4500_v49  ;;  %v3295_v8 = vadd.f32 %v3294_v7, %v3293_v3  ;;  %v3358_v9 = vpop.f32.mrb[71].mxu1 }
 0x183   :  { %v3359_v11 = vadd.f32 %v3358_v9, %v3357_v16 }
 0x184   :  { %v4548_v14 = vadd.f32 %v3356_v4, %v2245_v30  ;;  %v2248_v31 = vadd.f32 %v3295_v8, %v4503_v50 }
 0x186   :  { %v4551_v35 = vadd.f32 %v3359_v11, %v2248_v31  ;;  %v3296_v15 = vpop.f32.mrb[72].mxu0 }
 0x187   :  { %v3360_v17 = vpop.f32.mrb[72].mxu1  ;;  %v3297_v18 = vpop.f32.mrb[73].mxu0 }
 0x188   :  { %v3298_v39 = vadd.f32 %v3297_v18, %v3296_v15  ;;  %v3361_v22 = vpop.f32.mrb[73].mxu1  ;;  %v3299_v23 = vpop.f32.mrb[74].mxu0 }
 0x189   :  { %v3362_v24 = vadd.f32 %v3361_v22, %v3360_v17  ;;  %v3363_v41 = vpop.f32.mrb[74].mxu1  ;;  %v3300_v27 = vpop.f32.mrb[75].mxu0 }
 0x18a   :  { %v2253_v49 = vadd.f32 %v3298_v39, %v4506_v5  ;;  %v3301_v28 = vadd.f32 %v3300_v27, %v3299_v23  ;;  %v3364_v29 = vpop.f32.mrb[75].mxu1 }
 0x18b   :  { %v3365_v36 = vadd.f32 %v3364_v29, %v3363_v41 }
 0x18c   :  { %v4554_v32 = vadd.f32 %v3362_v24, %v2253_v49  ;;  %v2256_v50 = vadd.f32 %v3301_v28, %v4509_v6 }
 0x18e   :  { %v4557_v55 = vadd.f32 %v3365_v36, %v2256_v50  ;;  %v3302_v33 = vpop.f32.mrb[76].mxu0 }
 0x18f   :  { %v3366_v34 = vpop.f32.mrb[76].mxu1  ;;  %v3303_v38 = vpop.f32.mrb[77].mxu0 }
 0x190   :  { %v3304_v58 = vadd.f32 %v3303_v38, %v3302_v33  ;;  %v3367_v42 = vpop.f32.mrb[77].mxu1  ;;  %v3305_v43 = vpop.f32.mrb[78].mxu0 }
 0x191   :  { %v3368_v44 = vadd.f32 %v3367_v42, %v3366_v34  ;;  %v3369_v1 = vpop.f32.mrb[78].mxu1  ;;  %v3306_v46 = vpop.f32.mrb[79].mxu0 }
 0x192   :  { %v2261_v5 = vadd.f32 %v3304_v58, %v4512_v25  ;;  %v3307_v47 = vadd.f32 %v3306_v46, %v3305_v43  ;;  %v3370_v48 = vpop.f32.mrb[79].mxu1 }
 0x193   :  { %v3371_v56 = vadd.f32 %v3370_v48, %v3369_v1 }
 0x194   :  { %v4560_v51 = vadd.f32 %v3368_v44, %v2261_v5  ;;  %v2264_v6 = vadd.f32 %v3307_v47, %v4515_v26 }
 0x196   :  { %v4563_v10 = vadd.f32 %v3371_v56, %v2264_v6  ;;  %v3308_v53 = vpop.f32.mrb[80].mxu0 }
 0x197   :  { %v3372_v54 = vpop.f32.mrb[80].mxu1  ;;  %v3309_v57 = vpop.f32.mrb[81].mxu0 }
 0x198   :  { %v3310_v13 = vadd.f32 %v3309_v57, %v3308_v53  ;;  %v3373_v60 = vpop.f32.mrb[81].mxu1  ;;  %v3311_v61 = vpop.f32.mrb[82].mxu0 }
 0x199   :  { %v3374_v62 = vadd.f32 %v3373_v60, %v3372_v54  ;;  %v3375_v21 = vpop.f32.mrb[82].mxu1  ;;  %v3312_v2 = vpop.f32.mrb[83].mxu0 }
 0x19a   :  { %v2269_v25 = vadd.f32 %v3310_v13, %v4518_v45  ;;  %v3313_v3 = vadd.f32 %v3312_v2, %v3311_v61  ;;  %v3376_v4 = vpop.f32.mrb[83].mxu1 }
 0x19b   :  { %v3377_v16 = vadd.f32 %v3376_v4, %v3375_v21 }
 0x19c   :  { %v4566_v7 = vadd.f32 %v3374_v62, %v2269_v25  ;;  %v2272_v26 = vadd.f32 %v3313_v3, %v4521_v52 }
 0x19e   :  { %v4569_v30 = vadd.f32 %v3377_v16, %v2272_v26  ;;  %v3314_v8 = vpop.f32.mrb[84].mxu0 }
 0x19f   :  { %v3378_v9 = vpop.f32.mrb[84].mxu1  ;;  %v3315_v11 = vpop.f32.mrb[85].mxu0 }
 0x1a0   :  { %v3316_v31 = vadd.f32 %v3315_v11, %v3314_v8  ;;  %v3379_v15 = vpop.f32.mrb[85].mxu1  ;;  %v3317_v17 = vpop.f32.mrb[86].mxu0 }
 0x1a1   :  { %v3380_v18 = vadd.f32 %v3379_v15, %v3378_v9  ;;  %v3381_v39 = vpop.f32.mrb[86].mxu1  ;;  %v3318_v22 = vpop.f32.mrb[87].mxu0 }
 0x1a2   :  { %v2277_v45 = vadd.f32 %v3316_v31, %v4524_v0  ;;  %v3319_v23 = vadd.f32 %v3318_v22, %v3317_v17  ;;  %v3382_v24 = vpop.f32.mrb[87].mxu1 }
 0x1a3   :  { %v3383_v41 = vadd.f32 %v3382_v24, %v3381_v39 }
 0x1a4   :  { %v4572_v27 = vadd.f32 %v3380_v18, %v2277_v45  ;;  %v2280_v52 = vadd.f32 %v3319_v23, %v4527_v12 }
 0x1a6   :  { %v4575_v49 = vadd.f32 %v3383_v41, %v2280_v52  ;;  %v3320_v28 = vpop.f32.mrb[88].mxu0 }
 0x1a7   :  { %v3384_v29 = vpop.f32.mrb[88].mxu1  ;;  %v3321_v36 = vpop.f32.mrb[89].mxu0 }
 0x1a8   :  { %v3322_v50 = vadd.f32 %v3321_v36, %v3320_v28  ;;  %v3385_v33 = vpop.f32.mrb[89].mxu1  ;;  %v3323_v34 = vpop.f32.mrb[90].mxu0 }
 0x1a9   :  { %v3386_v38 = vadd.f32 %v3385_v33, %v3384_v29  ;;  %v3387_v58 = vpop.f32.mrb[90].mxu1  ;;  %v3324_v42 = vpop.f32.mrb[91].mxu0 }
 0x1aa   :  { %v2285_v0 = vadd.f32 %v3322_v50, %v4530_v20  ;;  %v3325_v43 = vadd.f32 %v3324_v42, %v3323_v34  ;;  %v3388_v44 = vpop.f32.mrb[91].mxu1 }
 0x1ab   :  { %v3389_v1 = vadd.f32 %v3388_v44, %v3387_v58 }
 0x1ac   :  { %v4578_v46 = vadd.f32 %v3386_v38, %v2285_v0  ;;  %v2288_v12 = vadd.f32 %v3325_v43, %v4533_v37 }
 0x1ae   :  { %v4581_v5 = vadd.f32 %v3389_v1, %v2288_v12  ;;  %v3326_v47 = vpop.f32.mrb[92].mxu0 }
 0x1af   :  { %v3390_v48 = vpop.f32.mrb[92].mxu1  ;;  %v3327_v56 = vpop.f32.mrb[93].mxu0 }
 0x1b0   :  { %v3328_v6 = vadd.f32 %v3327_v56, %v3326_v47  ;;  %v3391_v53 = vpop.f32.mrb[93].mxu1  ;;  %v3329_v54 = vpop.f32.mrb[94].mxu0 }
 0x1b1   :  { %v3392_v57 = vadd.f32 %v3391_v53, %v3390_v48  ;;  %v3393_v13 = vpop.f32.mrb[94].mxu1  ;;  %v3330_v60 = vpop.f32.mrb[95].mxu0 }
 0x1b2   :  { %v2293_v20 = vadd.f32 %v3328_v6, %v4536_v40  ;;  %v3331_v61 = vadd.f32 %v3330_v60, %v3329_v54  ;;  %v3394_v62 = vpop.f32.mrb[95].mxu1 }
 0x1b3   :  { %v3395_v21 = vadd.f32 %v3394_v62, %v3393_v13 }
 0x1b4   :  { %v4584_v2 = vadd.f32 %v3392_v57, %v2293_v20  ;;  %v2296_v37 = vadd.f32 %v3331_v61, %v4539_v63 }
 0x1b6   :  { %v4587_v25 = vadd.f32 %v3395_v21, %v2296_v37  ;;  %v3412_v3 = vpop.f32.mrb[96].mxu0 }
 0x1b7   :  { %v3476_v4 = vpop.f32.mrb[96].mxu1  ;;  %v3413_v16 = vpop.f32.mrb[97].mxu0 }
 0x1b8   :  { %v3414_v26 = vadd.f32 %v3413_v16, %v3412_v3  ;;  %v3477_v8 = vpop.f32.mrb[97].mxu1  ;;  %v3415_v9 = vpop.f32.mrb[98].mxu0 }
 0x1b9   :  { %v3478_v11 = vadd.f32 %v3477_v8, %v3476_v4  ;;  %v3479_v31 = vpop.f32.mrb[98].mxu1  ;;  %v3416_v15 = vpop.f32.mrb[99].mxu0 }
 0x1ba   :  { %v2431_v40 = vadd.f32 %v3414_v26, %v4542_v59  ;;  %v3417_v17 = vadd.f32 %v3416_v15, %v3415_v9  ;;  %v3480_v18 = vpop.f32.mrb[99].mxu1 }
 0x1bb   :  { %v3481_v39 = vadd.f32 %v3480_v18, %v3479_v31 }
 0x1bc   :  { %v2528_v22 = vadd.f32 %v3478_v11, %v2431_v40  ;;  %v2434_v45 = vadd.f32 %v3417_v17, %v4545_v19 }
 0x1be   :  { %vm2590_vm0 = vcmp.gt.f32.partialorder %v2528_v22, 0.0  ;;  %v2606_v63 = vmul.f32 0.2, %v2528_v22  ;;  %v2531_v23 = vadd.f32 %v3481_v39, %v2434_v45  ;;  %v3418_v24 = vpop.f32.mrb[100].mxu0 }
 0x1bf   :  { %v3482_v41 = vpop.f32.mrb[100].mxu1  ;;  %v3419_v52 = vpop.f32.mrb[101].mxu0 }
 0x1c0   :  { %v2622_v28 = vsel %vm2590_vm0, %v2528_v22, %v2606_v63  ;;  %vm2591_vm2 = vcmp.gt.f32.partialorder %v2531_v23, 0.0  ;;  %v2607_v29 = vmul.f32 0.2, %v2531_v23  ;;  %v3420_v36 = vadd.f32 %v3419_v52, %v3418_v24  ;;  %v3483_v50 = vpop.f32.mrb[101].mxu1  ;;  %v3421_v33 = vpop.f32.mrb[102].mxu0 }
 0x1c1   :  { %v2996_v59 = vpack.c.bf16 %v2622_v28, %v2622_v28  ;;  %v3484_v34 = vadd.f32 %v3483_v50, %v3482_v41  ;;  %v3485_v38 = vpop.f32.mrb[102].mxu1  ;;  %v3422_v58 = vpop.f32.mrb[103].mxu0 }
 0x1c2   :  { %v2623_v42 = vsel %vm2591_vm2, %v2531_v23, %v2607_v29  ;;  %v2439_v19 = vadd.f32 %v3420_v36, %v4548_v14  ;;  %v3423_v0 = vadd.f32 %v3422_v58, %v3421_v33  ;;  %v3486_v43 = vpop.f32.mrb[103].mxu1 }
 0x1c3   :  { %2703 = vst.msk [vmem:[%s4672_s3] sm:$0xf] %vm2702_vm1, %v2996_v59  ;;  %v2997_v44 = vpack.c.bf16 %v2623_v42, %v2623_v42  ;;  %v3487_v1 = vadd.f32 %v3486_v43, %v3485_v38 }
 0x1c4   :  { %v2536_v12 = vadd.f32 %v3484_v34, %v2439_v19  ;;  %v2442_v47 = vadd.f32 %v3423_v0, %v4551_v35 }
 0x1c5   :  { %2704 = vst.msk [vmem:[%s4672_s3 + $0x4] sm:$0xf] %vm2702_vm1, %v2997_v44 }
 0x1c6   :  { %vm2592_vm3 = vcmp.gt.f32.partialorder %v2536_v12, 0.0  ;;  %v2608_v48 = vmul.f32 0.2, %v2536_v12  ;;  %v2539_v14 = vadd.f32 %v3487_v1, %v2442_v47  ;;  %v3424_v56 = vpop.f32.mrb[104].mxu0 }
 0x1c7   :  { %v3488_v6 = vpop.f32.mrb[104].mxu1  ;;  %v3425_v53 = vpop.f32.mrb[105].mxu0 }
 0x1c8   :  { %v2624_v54 = vsel %vm2592_vm3, %v2536_v12, %v2608_v48  ;;  %vm2593_vm4 = vcmp.gt.f32.partialorder %v2539_v14, 0.0  ;;  %v2609_v57 = vmul.f32 0.2, %v2539_v14  ;;  %v3426_v13 = vadd.f32 %v3425_v53, %v3424_v56  ;;  %v3489_v60 = vpop.f32.mrb[105].mxu1  ;;  %v3427_v20 = vpop.f32.mrb[106].mxu0 }
 0x1c9   :  { %v2998_v61 = vpack.c.bf16 %v2624_v54, %v2624_v54  ;;  %v3490_v62 = vadd.f32 %v3489_v60, %v3488_v6  ;;  %v3491_v35 = vpop.f32.mrb[106].mxu1  ;;  %v3428_v21 = vpop.f32.mrb[107].mxu0 }
 0x1ca   :  { %v2625_v37 = vsel %vm2593_vm4, %v2539_v14, %v2609_v57  ;;  %v2447_v3 = vadd.f32 %v3426_v13, %v4554_v32  ;;  %v3429_v4 = vadd.f32 %v3428_v21, %v3427_v20  ;;  %v3492_v16 = vpop.f32.mrb[107].mxu1 }
 0x1cb   :  { %2705 = vst.msk [vmem:[%s4672_s3 + $0x8] sm:$0xf] %vm2702_vm1, %v2998_v61  ;;  %v2999_v26 = vpack.c.bf16 %v2625_v37, %v2625_v37  ;;  %v3493_v8 = vadd.f32 %v3492_v16, %v3491_v35 }
 0x1cc   :  { %v2544_v9 = vadd.f32 %v3490_v62, %v2447_v3  ;;  %v2450_v11 = vadd.f32 %v3429_v4, %v4557_v55 }
 0x1cd   :  { %2706 = vst.msk [vmem:[%s4672_s3 + $0xc] sm:$0xf] %vm2702_vm1, %v2999_v26 }
 0x1ce   :  { %vm2594_vm5 = vcmp.gt.f32.partialorder %v2544_v9, 0.0  ;;  %v2610_v31 = vmul.f32 0.2, %v2544_v9  ;;  %v2547_v32 = vadd.f32 %v3493_v8, %v2450_v11  ;;  %v3430_v15 = vpop.f32.mrb[108].mxu0 }
 0x1cf   :  { %v3494_v40 = vpop.f32.mrb[108].mxu1  ;;  %v3431_v17 = vpop.f32.mrb[109].mxu0 }
 0x1d0   :  { %v2626_v18 = vsel %vm2594_vm5, %v2544_v9, %v2610_v31  ;;  %vm2595_vm6 = vcmp.gt.f32.partialorder %v2547_v32, 0.0  ;;  %v2611_v39 = vmul.f32 0.2, %v2547_v32  ;;  %v3432_v22 = vadd.f32 %v3431_v17, %v3430_v15  ;;  %v3495_v45 = vpop.f32.mrb[109].mxu1  ;;  %v3433_v63 = vpop.f32.mrb[110].mxu0 }
 0x1d1   :  { %v3000_v23 = vpack.c.bf16 %v2626_v18, %v2626_v18  ;;  %v3496_v24 = vadd.f32 %v3495_v45, %v3494_v40  ;;  %v3497_v55 = vpop.f32.mrb[110].mxu1  ;;  %v3434_v41 = vpop.f32.mrb[111].mxu0 }
 0x1d2   :  { %v2627_v52 = vsel %vm2595_vm6, %v2547_v32, %v2611_v39  ;;  %v2455_v28 = vadd.f32 %v3432_v22, %v4560_v51  ;;  %v3435_v29 = vadd.f32 %v3434_v41, %v3433_v63  ;;  %v3498_v36 = vpop.f32.mrb[111].mxu1 }
 0x1d3   :  { %2707 = vst.msk [vmem:[%s4672_s3 + $0x10] sm:$0xf] %vm2702_vm1, %v3000_v23  ;;  %v3001_v50 = vpack.c.bf16 %v2627_v52, %v2627_v52  ;;  %v3499_v33 = vadd.f32 %v3498_v36, %v3497_v55 }
 0x1d4   :  { %v2552_v59 = vadd.f32 %v3496_v24, %v2455_v28  ;;  %v2458_v34 = vadd.f32 %v3435_v29, %v4563_v10 }
 0x1d5   :  { %2708 = vst.msk [vmem:[%s4672_s3 + $0x14] sm:$0xf] %vm2702_vm1, %v3001_v50 }
 0x1d6   :  { %vm2596_vm7 = vcmp.gt.f32.partialorder %v2552_v59, 0.0  ;;  %v2612_v38 = vmul.f32 0.2, %v2552_v59  ;;  %v2555_v51 = vadd.f32 %v3499_v33, %v2458_v34  ;;  %v3436_v58 = vpop.f32.mrb[112].mxu0 }
 0x1d7   :  { %v3500_v42 = vpop.f32.mrb[112].mxu1  ;;  %v3437_v19 = vpop.f32.mrb[113].mxu0 }
 0x1d8   :  { %v2628_v0 = vsel %vm2596_vm7, %v2552_v59, %v2612_v38  ;;  %vm2597_vm8 = vcmp.gt.f32.partialorder %v2555_v51, 0.0  ;;  %v2613_v43 = vmul.f32 0.2, %v2555_v51  ;;  %v3438_v44 = vadd.f32 %v3437_v19, %v3436_v58  ;;  %v3501_v1 = vpop.f32.mrb[113].mxu1  ;;  %v3439_v12 = vpop.f32.mrb[114].mxu0 }
 0x1d9   :  { %v3002_v47 = vpack.c.bf16 %v2628_v0, %v2628_v0  ;;  %v3502_v48 = vadd.f32 %v3501_v1, %v3500_v42  ;;  %v3503_v10 = vpop.f32.mrb[114].mxu1  ;;  %v3440_v14 = vpop.f32.mrb[115].mxu0 }
 0x1da   :  { %v2629_v56 = vsel %vm2597_vm8, %v2555_v51, %v2613_v43  ;;  %v2463_v6 = vadd.f32 %v3438_v44, %v4566_v7  ;;  %v3441_v53 = vadd.f32 %v3440_v14, %v3439_v12  ;;  %v3504_v54 = vpop.f32.mrb[115].mxu1 }
 0x1db   :  { %2709 = vst.msk [vmem:[%s4672_s3 + $0x18] sm:$0xf] %vm2702_vm1, %v3002_v47  ;;  %v3003_v57 = vpack.c.bf16 %v2629_v56, %v2629_v56  ;;  %v3505_v13 = vadd.f32 %v3504_v54, %v3503_v10 }
 0x1dc   :  { %v2560_v60 = vadd.f32 %v3502_v48, %v2463_v6  ;;  %v2466_v20 = vadd.f32 %v3441_v53, %v4569_v30 }
 0x1dd   :  { %2710 = vst.msk [vmem:[%s4672_s3 + $0x1c] sm:$0xf] %vm2702_vm1, %v3003_v57 }
 0x1de   :  { %vm2598_vm9 = vcmp.gt.f32.partialorder %v2560_v60, 0.0  ;;  %v2614_v61 = vmul.f32 0.2, %v2560_v60  ;;  %v2563_v7 = vadd.f32 %v3505_v13, %v2466_v20  ;;  %v3442_v62 = vpop.f32.mrb[116].mxu0 }
 0x1df   :  { %v3506_v35 = vpop.f32.mrb[116].mxu1  ;;  %v3443_v21 = vpop.f32.mrb[117].mxu0 }
 0x1e0   :  { %v2630_v37 = vsel %vm2598_vm9, %v2560_v60, %v2614_v61  ;;  %vm2599_vm10 = vcmp.gt.f32.partialorder %v2563_v7, 0.0  ;;  %v2615_v3 = vmul.f32 0.2, %v2563_v7  ;;  %v3444_v4 = vadd.f32 %v3443_v21, %v3442_v62  ;;  %v3507_v16 = vpop.f32.mrb[117].mxu1  ;;  %v3445_v26 = vpop.f32.mrb[118].mxu0 }
 0x1e1   :  { %v3004_v8 = vpack.c.bf16 %v2630_v37, %v2630_v37  ;;  %v3508_v9 = vadd.f32 %v3507_v16, %v3506_v35  ;;  %v3509_v30 = vpop.f32.mrb[118].mxu1  ;;  %v3446_v11 = vpop.f32.mrb[119].mxu0 }
 0x1e2   :  { %v2631_v31 = vsel %vm2599_vm10, %v2563_v7, %v2615_v3  ;;  %v2471_v32 = vadd.f32 %v3444_v4, %v4572_v27  ;;  %v3447_v15 = vadd.f32 %v3446_v11, %v3445_v26  ;;  %v3510_v40 = vpop.f32.mrb[119].mxu1 }
 0x1e3   :  { %2711 = vst.msk [vmem:[%s4672_s3 + $0x20] sm:$0xf] %vm2702_vm1, %v3004_v8  ;;  %v3005_v17 = vpack.c.bf16 %v2631_v31, %v2631_v31  ;;  %v3511_v18 = vadd.f32 %v3510_v40, %v3509_v30 }
 0x1e4   :  { %v2568_v39 = vadd.f32 %v3508_v9, %v2471_v32  ;;  %v2474_v22 = vadd.f32 %v3447_v15, %v4575_v49 }
 0x1e5   :  { %2712 = vst.msk [vmem:[%s4672_s3 + $0x24] sm:$0xf] %vm2702_vm1, %v3005_v17 }
 0x1e6   :  { %vm2600_vm11 = vcmp.gt.f32.partialorder %v2568_v39, 0.0  ;;  %v2616_v45 = vmul.f32 0.2, %v2568_v39  ;;  %v2571_v27 = vadd.f32 %v3511_v18, %v2474_v22  ;;  %v3448_v63 = vpop.f32.mrb[120].mxu0 }
 0x1e7   :  { %v3512_v23 = vpop.f32.mrb[120].mxu1  ;;  %v3449_v24 = vpop.f32.mrb[121].mxu0 }
 0x1e8   :  { %v2632_v55 = vsel %vm2600_vm11, %v2568_v39, %v2616_v45  ;;  %vm2601_vm12 = vcmp.gt.f32.partialorder %v2571_v27, 0.0  ;;  %v2617_v41 = vmul.f32 0.2, %v2571_v27  ;;  %v3450_v52 = vadd.f32 %v3449_v24, %v3448_v63  ;;  %v3513_v28 = vpop.f32.mrb[121].mxu1  ;;  %v3451_v29 = vpop.f32.mrb[122].mxu0 }
 0x1e9   :  { %v3006_v36 = vpack.c.bf16 %v2632_v55, %v2632_v55  ;;  %v3514_v50 = vadd.f32 %v3513_v28, %v3512_v23  ;;  %v3515_v49 = vpop.f32.mrb[122].mxu1  ;;  %v3452_v33 = vpop.f32.mrb[123].mxu0 }
 0x1ea   :  { %v2633_v59 = vsel %vm2601_vm12, %v2571_v27, %v2617_v41  ;;  %v2479_v34 = vadd.f32 %v3450_v52, %v4578_v46  ;;  %v3453_v38 = vadd.f32 %v3452_v33, %v3451_v29  ;;  %v3516_v51 = vpop.f32.mrb[123].mxu1 }
 0x1eb   :  { %2713 = vst.msk [vmem:[%s4672_s3 + $0x28] sm:$0xf] %vm2702_vm1, %v3006_v36  ;;  %v3007_v58 = vpack.c.bf16 %v2633_v59, %v2633_v59  ;;  %v3517_v42 = vadd.f32 %v3516_v51, %v3515_v49 }
 0x1ec   :  { %v2576_v19 = vadd.f32 %v3514_v50, %v2479_v34  ;;  %v2482_v0 = vadd.f32 %v3453_v38, %v4581_v5 }
 0x1ed   :  { %2714 = vst.msk [vmem:[%s4672_s3 + $0x2c] sm:$0xf] %vm2702_vm1, %v3007_v58 }
 0x1ee   :  { %vm2602_vm13 = vcmp.gt.f32.partialorder %v2576_v19, 0.0  ;;  %v2618_v43 = vmul.f32 0.2, %v2576_v19  ;;  %v2579_v46 = vadd.f32 %v3517_v42, %v2482_v0  ;;  %v3454_v44 = vpop.f32.mrb[124].mxu0 }
 0x1ef   :  { %v3518_v1 = vpop.f32.mrb[124].mxu1  ;;  %v3455_v12 = vpop.f32.mrb[125].mxu0 }
 0x1f0   :  { %v2634_v47 = vsel %vm2602_vm13, %v2576_v19, %v2618_v43  ;;  %vm2603_vm14 = vcmp.gt.f32.partialorder %v2579_v46, 0.0  ;;  %v2619_v48 = vmul.f32 0.2, %v2579_v46  ;;  %v3456_v10 = vadd.f32 %v3455_v12, %v3454_v44  ;;  %v3519_v14 = vpop.f32.mrb[125].mxu1  ;;  %v3457_v56 = vpop.f32.mrb[126].mxu0 }
 0x1f1   :  { %v3008_v6 = vpack.c.bf16 %v2634_v47, %v2634_v47  ;;  %v3520_v53 = vadd.f32 %v3519_v14, %v3518_v1  ;;  %v3521_v5 = vpop.f32.mrb[126].mxu1  ;;  %v3458_v54 = vpop.f32.mrb[127].mxu0 }
 0x1f2   :  { %v2635_v57 = vsel %vm2603_vm14, %v2579_v46, %v2619_v48  ;;  %v2487_v13 = vadd.f32 %v3456_v10, %v4584_v2  ;;  %v3459_v60 = vadd.f32 %v3458_v54, %v3457_v56  ;;  %v3522_v20 = vpop.f32.mrb[127].mxu1 }
 0x1f3   :  { %2715 = vst.msk [vmem:[%s4672_s3 + $0x30] sm:$0xf] %vm2702_vm1, %v3008_v6  ;;  %v3009_v61 = vpack.c.bf16 %v2635_v57, %v2635_v57  ;;  %v3523_v7 = vadd.f32 %v3522_v20, %v3521_v5 }
 0x1f4   :  { %v2584_v62 = vadd.f32 %v3520_v53, %v2487_v13  ;;  %v2490_v35 = vadd.f32 %v3459_v60, %v4587_v25 }
 0x1f5   :  { %2716 = vst.msk [vmem:[%s4672_s3 + $0x34] sm:$0xf] %vm2702_vm1, %v3009_v61 }
 0x1f6   :  { %vm2604_vm15 = vcmp.gt.f32.partialorder %v2584_v62, 0.0  ;;  %v2620_v21 = vmul.f32 0.2, %v2584_v62  ;;  %v2587_v2 = vadd.f32 %v3523_v7, %v2490_v35 }
 0x1f8   :  { %v2636_v37 = vsel %vm2604_vm15, %v2584_v62, %v2620_v21  ;;  %vm2605_vm0 = vcmp.gt.f32.partialorder %v2587_v2, 0.0  ;;  %v2621_v3 = vmul.f32 0.2, %v2587_v2 }
 0x1f9   :  { %v3010_v4 = vpack.c.bf16 %v2636_v37, %v2636_v37 }
 0x1fa   :  { %v2637_v16 = vsel %vm2605_vm0, %v2587_v2, %v2621_v3 }
 0x1fb   :  { %2717 = vst.msk [vmem:[%s4672_s3 + $0x38] sm:$0xf] %vm2702_vm1, %v3010_v4  ;;  %v3011_v26 = vpack.c.bf16 %v2637_v16, %v2637_v16 }
 0x1fd   :  { %2718 = vst.msk [vmem:[%s4672_s3 + $0x3c] sm:$0xf] %vm2702_vm1, %v3011_v26 }

// kernel: discriminator_forward.5
= control target key start
LH: loop header
LB: loop body
LE: loop exit
PB: predicated region body
PF: predicated region fallthrough
CT: control target
= control target key end

     0   :  { %vm5077_vm10 = vcmask 7168   ;;  %s8481_s1 = inlined_call_operand.vmem [shape: bf16[4096,128], index: 1, kind: input, shape index: {}]   ;;  %s8482_s0 = inlined_call_operand.vmem [shape: bf16[64,4096], index: 0, kind: input, shape index: {}]   ;;  %s8483_s2 = inlined_call_operand.vmem [shape: f32[1,128], index: 2, kind: input, shape index: {}]   ;;  %s8484_s3 = inlined_call_operand.vmem [shape: bf16[1024,256], index: 3, kind: input, shape index: {}]   ;;  %s8485_s4 = inlined_call_operand.vmem [shape: f32[1,256], index: 4, kind: input, shape index: {}]   ;;  %s8486_s5 = inlined_call_operand.vmem [shape: f32[1,256], index: 5, kind: input, shape index: {}]   ;;  %s8487_s6 = inlined_call_operand.<no memory space> [shape: f32[1,1], index: 6, kind: input, shape index: {}]   ;;  %s8488_s7 = inlined_call_operand.vmem [shape: f32[8,1], index: 7, kind: output, shape index: {}]  }
   0x1   :  { %v6237_v0 = vld [vmem:[%s8481_s1 + $0x40] sm:$0xff]   ;;  %v6241_v4 = vld [vmem:[%s8481_s1 + $0x48] sm:$0xff]   ;;  %v6245_v8 = vld [vmem:[%s8481_s1 + $0x50] sm:$0xff]  }
   0x2   :  { %v6238_v1 = vld [vmem:[%s8481_s1 + $0xc0] sm:$0xff]   ;;  %5596 = vmatprep.subr.bf16.mxu0 %v6237_v0  ;;  %v6242_v5 = vld [vmem:[%s8481_s1 + $0xc8] sm:$0xff]   ;;  %v6246_v9 = vld [vmem:[%s8481_s1 + $0xd0] sm:$0xff]  }
   0x3   :  { %v6239_v2 = vld [vmem:[%s8481_s1] sm:$0xff]   ;;  %5636 = vmatprep.subr.bf16.mxu1 %v6238_v1  ;;  %v6243_v6 = vld [vmem:[%s8481_s1 + $0x8] sm:$0xff]   ;;  %v6247_v10 = vld [vmem:[%s8481_s1 + $0x10] sm:$0xff]  }
   0x4   :  { %v6240_v3 = vld [vmem:[%s8481_s1 + $0x80] sm:$0xff]   ;;  %5597 = vmatpush3.bf16.msra.mxu0 %v6239_v2  ;;  %v6244_v7 = vld [vmem:[%s8481_s1 + $0x88] sm:$0xff]   ;;  %v6248_v11 = vld [vmem:[%s8481_s1 + $0x90] sm:$0xff]  }
   0x5   :  { %5637 = vmatpush3.bf16.msra.mxu1 %v6240_v3  ;;  %5598 = vmatprep.subr.bf16.mxu0 %v6241_v4  ;;  %v6249_v12 = vld [vmem:[%s8481_s1 + $0x58] sm:$0xff]   ;;  %v6253_v16 = vld [vmem:[%s8481_s1 + $0x60] sm:$0xff]   ;;  %v6257_v20 = vld [vmem:[%s8481_s1 + $0x68] sm:$0xff]  }
   0x6   :  { %5638 = vmatprep.subr.bf16.mxu1 %v6242_v5  ;;  %v6250_v13 = vld [vmem:[%s8481_s1 + $0xd8] sm:$0xff]   ;;  %v6254_v17 = vld [vmem:[%s8481_s1 + $0xe0] sm:$0xff]   ;;  %v6258_v21 = vld [vmem:[%s8481_s1 + $0xe8] sm:$0xff]  }
   0x7   :  { %v6251_v14 = vld [vmem:[%s8481_s1 + $0x18] sm:$0xff]   ;;  %v6255_v18 = vld [vmem:[%s8481_s1 + $0x20] sm:$0xff]   ;;  %v6259_v22 = vld [vmem:[%s8481_s1 + $0x28] sm:$0xff]  }
   0x8   :  { %5599 = vmatpush3.bf16.msra.mxu0 %v6243_v6  ;;  %v6252_v15 = vld [vmem:[%s8481_s1 + $0x98] sm:$0xff]   ;;  %v6256_v19 = vld [vmem:[%s8481_s1 + $0xa0] sm:$0xff]   ;;  %v6260_v23 = vld [vmem:[%s8481_s1 + $0xa8] sm:$0xff]  }
   0x9   :  { %5639 = vmatpush3.bf16.msra.mxu1 %v6244_v7  ;;  %5600 = vmatprep.subr.bf16.mxu0 %v6245_v8  ;;  %v6261_v24 = vld [vmem:[%s8481_s1 + $0x70] sm:$0xff]   ;;  %v6265_v28 = vld [vmem:[%s8481_s1 + $0x78] sm:$0xff]   ;;  %v28_v32 = vld [vmem:[%s8482_s0] sm:$0xff] }
   0xa   :  { %5640 = vmatprep.subr.bf16.mxu1 %v6246_v9  ;;  %v6262_v25 = vld [vmem:[%s8481_s1 + $0xf0] sm:$0xff]   ;;  %v6266_v29 = vld [vmem:[%s8481_s1 + $0xf8] sm:$0xff]   ;;  %v44_v33 = vld [vmem:[%s8482_s0 + $0x80] sm:$0xff] }
   0xb   :  { %v6263_v26 = vld [vmem:[%s8481_s1 + $0x30] sm:$0xff]   ;;  %v6267_v30 = vld [vmem:[%s8481_s1 + $0x38] sm:$0xff]   ;;  %v29_v34 = vld [vmem:[%s8482_s0 + $0x8] sm:$0xff]  ;;  %v5084_v35 = vcombine.low %v28_v32, %v44_v33  ;;  %v5085_v36 = vcombine.high %v28_v32, %v44_v33 }
   0xc   :  { %5601 = vmatpush3.bf16.msra.mxu0 %v6247_v10  ;;  %v6264_v27 = vld [vmem:[%s8481_s1 + $0xb0] sm:$0xff]   ;;  %v6268_v31 = vld [vmem:[%s8481_s1 + $0xb8] sm:$0xff]   ;;  %v45_v37 = vld [vmem:[%s8482_s0 + $0x88] sm:$0xff] }
   0xd   :  { %5641 = vmatpush3.bf16.msra.mxu1 %v6248_v11  ;;  %5602 = vmatprep.subr.bf16.mxu0 %v6249_v12  ;;  %v5086_v38 = vcombine.low %v29_v34, %v45_v37  ;;  %v5087_v39 = vcombine.high %v29_v34, %v45_v37  ;;  %v6269_v40 = vld [vmem:[%s8481_s1 + $0x140] sm:$0xff]   ;;  %v6273_v44 = vld [vmem:[%s8481_s1 + $0x148] sm:$0xff]   ;;  %v6277_v56 = vld [vmem:[%s8481_s1 + $0x150] sm:$0xff]  }
   0xe   :  { %5642 = vmatprep.subr.bf16.mxu1 %v6250_v13  ;;  %2883 = vmatprep.mubr.bf16.mxu0 %v5085_v36  ;;  %v6270_v41 = vld [vmem:[%s8481_s1 + $0x1c0] sm:$0xff]   ;;  %v6274_v45 = vld [vmem:[%s8481_s1 + $0x1c8] sm:$0xff]   ;;  %v6278_v57 = vld [vmem:[%s8481_s1 + $0x1d0] sm:$0xff]  }
   0xf   :  { %2948 = vmatprep.mubr.bf16.mxu1 %v5087_v39  ;;  %v6271_v42 = vld [vmem:[%s8481_s1 + $0x100] sm:$0xff]   ;;  %v6275_v46 = vld [vmem:[%s8481_s1 + $0x108] sm:$0xff]   ;;  %v6279_v58 = vld [vmem:[%s8481_s1 + $0x110] sm:$0xff]  }
  0x10   :  { %5603 = vmatpush3.bf16.msra.mxu0 %v6251_v14  ;;  %v6272_v43 = vld [vmem:[%s8481_s1 + $0x180] sm:$0xff]   ;;  %v6276_v47 = vld [vmem:[%s8481_s1 + $0x188] sm:$0xff]   ;;  %v6280_v59 = vld [vmem:[%s8481_s1 + $0x190] sm:$0xff]  }
  0x11   :  { %5643 = vmatpush3.bf16.msra.mxu1 %v6252_v15  ;;  %5604 = vmatprep.subr.bf16.mxu0 %v6253_v16  ;;  %v60_v48 = vld [vmem:[%s8482_s0 + $0x100] sm:$0xff]  ;;  %v61_v51 = vld [vmem:[%s8482_s0 + $0x108] sm:$0xff]  ;;  %v6281_v60 = vld [vmem:[%s8481_s1 + $0x158] sm:$0xff]  }
  0x12   :  { %5644 = vmatprep.subr.bf16.mxu1 %v6254_v17  ;;  %v76_v49 = vld [vmem:[%s8482_s0 + $0x180] sm:$0xff]  ;;  %v77_v52 = vld [vmem:[%s8482_s0 + $0x188] sm:$0xff]  ;;  %v6282_v61 = vld [vmem:[%s8481_s1 + $0x1d8] sm:$0xff]  }
  0x13   :  { %v5117_v50 = vcombine.high %v60_v48, %v76_v49  ;;  %v5116_v53 = vcombine.low %v60_v48, %v76_v49  ;;  %v5119_v54 = vcombine.high %v61_v51, %v77_v52  ;;  %v5118_v55 = vcombine.low %v61_v51, %v77_v52  ;;  %v6283_v62 = vld [vmem:[%s8481_s1 + $0x118] sm:$0xff]   ;;  %v92_v0 = vld [vmem:[%s8482_s0 + $0x200] sm:$0xff]  ;;  %v93_v2 = vld [vmem:[%s8482_s0 + $0x208] sm:$0xff] }
  0x14   :  { %5605 = vmatpush3.bf16.msra.mxu0 %v6255_v18  ;;  %v6284_v63 = vld [vmem:[%s8481_s1 + $0x198] sm:$0xff]   ;;  %v108_v1 = vld [vmem:[%s8482_s0 + $0x280] sm:$0xff]  ;;  %v109_v3 = vld [vmem:[%s8482_s0 + $0x288] sm:$0xff] }
  0x15   :  { %5645 = vmatpush3.bf16.msra.mxu1 %v6256_v19  ;;  %5606 = vmatprep.subr.bf16.mxu0 %v6257_v20  ;;  %v5149_v4 = vcombine.high %v92_v0, %v108_v1  ;;  %v5151_v5 = vcombine.high %v93_v2, %v109_v3  ;;  %v5148_v6 = vcombine.low %v92_v0, %v108_v1  ;;  %v6285_v8 = vld [vmem:[%s8481_s1 + $0x160] sm:$0xff]   ;;  %v6289_v12 = vld [vmem:[%s8481_s1 + $0x168] sm:$0xff]   ;;  %v30_v32 = vld [vmem:[%s8482_s0 + $0x10] sm:$0xff] }
  0x16   :  { %5646 = vmatprep.subr.bf16.mxu1 %v6258_v21  ;;  %v5150_v7 = vcombine.low %v93_v2, %v109_v3  ;;  %v6286_v9 = vld [vmem:[%s8481_s1 + $0x1e0] sm:$0xff]   ;;  %v6290_v13 = vld [vmem:[%s8481_s1 + $0x1e8] sm:$0xff]   ;;  %v46_v33 = vld [vmem:[%s8482_s0 + $0x90] sm:$0xff] }
  0x17   :  { %v6287_v10 = vld [vmem:[%s8481_s1 + $0x120] sm:$0xff]   ;;  %v6291_v14 = vld [vmem:[%s8481_s1 + $0x128] sm:$0xff]   ;;  %v5088_v34 = vcombine.low %v30_v32, %v46_v33  ;;  %v31_v36 = vld [vmem:[%s8482_s0 + $0x18] sm:$0xff] }
  0x18   :  { %5607 = vmatpush3.bf16.msra.mxu0 %v6259_v22  ;;  %v6288_v11 = vld [vmem:[%s8481_s1 + $0x1a0] sm:$0xff]   ;;  %v6292_v15 = vld [vmem:[%s8481_s1 + $0x1a8] sm:$0xff]   ;;  %v47_v37 = vld [vmem:[%s8482_s0 + $0x98] sm:$0xff] }
  0x19   :  { %5647 = vmatpush3.bf16.msra.mxu1 %v6260_v23  ;;  %5608 = vmatprep.subr.bf16.mxu0 %v6261_v24  ;;  %v124_v16 = vld [vmem:[%s8482_s0 + $0x300] sm:$0xff]  ;;  %v125_v18 = vld [vmem:[%s8482_s0 + $0x308] sm:$0xff]  ;;  %v6293_v24 = vld [vmem:[%s8481_s1 + $0x170] sm:$0xff]   ;;  %v5091_v39 = vcombine.high %v31_v36, %v47_v37 }
  0x1a   :  { %5648 = vmatprep.subr.bf16.mxu1 %v6262_v25  ;;  %v140_v17 = vld [vmem:[%s8482_s0 + $0x380] sm:$0xff]  ;;  %v141_v20 = vld [vmem:[%s8482_s0 + $0x388] sm:$0xff]  ;;  %v6294_v25 = vld [vmem:[%s8481_s1 + $0x1f0] sm:$0xff]  }
  0x1b   :  { %v5181_v19 = vcombine.high %v124_v16, %v140_v17  ;;  %v5180_v21 = vcombine.low %v124_v16, %v140_v17  ;;  %v5183_v22 = vcombine.high %v125_v18, %v141_v20  ;;  %v5182_v23 = vcombine.low %v125_v18, %v141_v20  ;;  %v62_v48 = vld [vmem:[%s8482_s0 + $0x110] sm:$0xff]  ;;  %v79_v51 = vld [vmem:[%s8482_s0 + $0x198] sm:$0xff] }
  0x1c   :  { %5609 = vmatpush3.bf16.msra.mxu0 %v6263_v26  ;;  %v6295_v26 = vld [vmem:[%s8481_s1 + $0x130] sm:$0xff]   ;;  %v95_v2 = vld [vmem:[%s8482_s0 + $0x218] sm:$0xff] }
  0x1d   :  { %5649 = vmatpush3.bf16.msra.mxu1 %v6264_v27  ;;  %5610 = vmatprep.subr.bf16.mxu0 %v6265_v28  ;;  %v6296_v27 = vld [vmem:[%s8481_s1 + $0x1b0] sm:$0xff]   ;;  %v6297_v28 = vld [vmem:[%s8481_s1 + $0x178] sm:$0xff]  }
  0x1e   :  { %5650 = vmatprep.subr.bf16.mxu1 %v6266_v29  ;;  %v6298_v29 = vld [vmem:[%s8481_s1 + $0x1f8] sm:$0xff]   ;;  %v78_v49 = vld [vmem:[%s8482_s0 + $0x190] sm:$0xff] }
  0x1f   :  { %v5121_v52 = vcombine.high %v62_v48, %v78_v49  ;;  %v94_v0 = vld [vmem:[%s8482_s0 + $0x210] sm:$0xff]  ;;  %v143_v20 = vld [vmem:[%s8482_s0 + $0x398] sm:$0xff] }
  0x20   :  { %5611 = vmatpush3.bf16.msra.mxu0 %v6267_v30  ;;  %v6299_v30 = vld [vmem:[%s8481_s1 + $0x138] sm:$0xff]   ;;  %v110_v1 = vld [vmem:[%s8482_s0 + $0x290] sm:$0xff] }
  0x21   :  { %5651 = vmatpush3.bf16.msra.mxu1 %v6268_v31  ;;  %5676 = vmatprep.subr.bf16.mxu0 %v6269_v40  ;;  %v6300_v31 = vld [vmem:[%s8481_s1 + $0x1b8] sm:$0xff]   ;;  %v6301_v40 = vld [vmem:[%s8481_s1 + $0x240] sm:$0xff]   ;;  %v5153_v3 = vcombine.high %v94_v0, %v110_v1  ;;  %v126_v16 = vld [vmem:[%s8482_s0 + $0x310] sm:$0xff] }
  0x22   :  { %5716 = vmatprep.subr.bf16.mxu1 %v6270_v41  ;;  %v6302_v41 = vld [vmem:[%s8481_s1 + $0x2c0] sm:$0xff]   ;;  %v142_v17 = vld [vmem:[%s8482_s0 + $0x390] sm:$0xff] }
  0x23   :  { %2884 = vmatmul.mubr.bf16.vlgmr.msra.gmra.mrb[0].mxu0 %v5084_v35  ;;  %v5089_v35 = vcombine.high %v30_v32, %v46_v33  ;;  %v5185_v18 = vcombine.high %v126_v16, %v142_v17  ;;  %v32_v32 = vld [vmem:[%s8482_s0 + $0x20] sm:$0xff] }
  0x24   :  { %2949 = vmatmul.mubr.bf16.vlgmr.msra.gmra.mrb[0].mxu1 %v5086_v38  ;;  %5677 = vmatpush3.bf16.msra.mxu0 %v6271_v42  ;;  %v5090_v38 = vcombine.low %v31_v36, %v47_v37  ;;  %v6303_v42 = vld [vmem:[%s8481_s1 + $0x200] sm:$0xff]  }
  0x25   :  { %5717 = vmatpush3.bf16.msra.mxu1 %v6272_v43  ;;  %5678 = vmatprep.subr.bf16.mxu0 %v6273_v44  ;;  %v6304_v43 = vld [vmem:[%s8481_s1 + $0x280] sm:$0xff]   ;;  %v6305_v44 = vld [vmem:[%s8481_s1 + $0x248] sm:$0xff]  }
  0x26   :  { %5718 = vmatprep.subr.bf16.mxu1 %v6274_v45  ;;  %2891 = vmatprep.mubr.bf16.mxu0 %v5117_v50  ;;  %v6306_v45 = vld [vmem:[%s8481_s1 + $0x2c8] sm:$0xff]   ;;  %v63_v50 = vld [vmem:[%s8482_s0 + $0x118] sm:$0xff]  ;;  %v48_v33 = vld [vmem:[%s8482_s0 + $0xa0] sm:$0xff] }
  0x27   :  { %2956 = vmatprep.mubr.bf16.mxu1 %v5119_v54  ;;  %v5120_v54 = vcombine.low %v62_v48, %v78_v49  ;;  %v5092_v36 = vcombine.low %v32_v32, %v48_v33  ;;  %v5093_v37 = vcombine.high %v32_v32, %v48_v33  ;;  %v64_v48 = vld [vmem:[%s8482_s0 + $0x120] sm:$0xff]  ;;  %v34_v32 = vld [vmem:[%s8482_s0 + $0x30] sm:$0xff] }
  0x28   :  { %5679 = vmatpush3.bf16.msra.mxu0 %v6275_v46  ;;  %v6307_v46 = vld [vmem:[%s8481_s1 + $0x208] sm:$0xff]   ;;  %v80_v49 = vld [vmem:[%s8482_s0 + $0x1a0] sm:$0xff]  ;;  %v50_v33 = vld [vmem:[%s8482_s0 + $0xb0] sm:$0xff] }
  0x29   :  { %5719 = vmatpush3.bf16.msra.mxu1 %v6276_v47  ;;  %5680 = vmatprep.subr.bf16.mxu0 %v6277_v56  ;;  %v6308_v47 = vld [vmem:[%s8481_s1 + $0x288] sm:$0xff]   ;;  %v6309_v56 = vld [vmem:[%s8481_s1 + $0x250] sm:$0xff]  }
  0x2a   :  { %5720 = vmatprep.subr.bf16.mxu1 %v6278_v57  ;;  %v6310_v57 = vld [vmem:[%s8481_s1 + $0x2d0] sm:$0xff]  }
  0x2b   :  { %2892 = vmatmul.mubr.bf16.gmra.mrb[4].mxu0 %v5116_v53  ;;  %v5123_v53 = vcombine.high %v63_v50, %v79_v51 }
  0x2c   :  { %2957 = vmatmul.mubr.bf16.gmra.mrb[4].mxu1 %v5118_v55  ;;  %5681 = vmatpush3.bf16.msra.mxu0 %v6279_v58  ;;  %v5122_v55 = vcombine.low %v63_v50, %v79_v51  ;;  %v6311_v58 = vld [vmem:[%s8481_s1 + $0x210] sm:$0xff]   ;;  %v65_v50 = vld [vmem:[%s8482_s0 + $0x128] sm:$0xff]  ;;  %v5125_v51 = vcombine.high %v64_v48, %v80_v49 }
  0x2d   :  { %5721 = vmatpush3.bf16.msra.mxu1 %v6280_v59  ;;  %5682 = vmatprep.subr.bf16.mxu0 %v6281_v60  ;;  %v6312_v59 = vld [vmem:[%s8481_s1 + $0x290] sm:$0xff]   ;;  %v6313_v60 = vld [vmem:[%s8481_s1 + $0x258] sm:$0xff]  }
  0x2e   :  { %5722 = vmatprep.subr.bf16.mxu1 %v6282_v61  ;;  %2899 = vmatprep.mubr.bf16.mxu0 %v5149_v4  ;;  %v6314_v61 = vld [vmem:[%s8481_s1 + $0x2d8] sm:$0xff]  }
  0x2f   :  { %2964 = vmatprep.mubr.bf16.mxu1 %v5151_v5  ;;  %v111_v4 = vld [vmem:[%s8482_s0 + $0x298] sm:$0xff]  ;;  %v5152_v5 = vcombine.low %v94_v0, %v110_v1  ;;  %v96_v0 = vld [vmem:[%s8482_s0 + $0x220] sm:$0xff] }
  0x30   :  { %5683 = vmatpush3.bf16.msra.mxu0 %v6283_v62  ;;  %v6315_v62 = vld [vmem:[%s8481_s1 + $0x218] sm:$0xff]   ;;  %v112_v1 = vld [vmem:[%s8482_s0 + $0x2a0] sm:$0xff] }
  0x31   :  { %5723 = vmatpush3.bf16.msra.mxu1 %v6284_v63  ;;  %5684 = vmatprep.subr.bf16.mxu0 %v6285_v8  ;;  %v6316_v63 = vld [vmem:[%s8481_s1 + $0x298] sm:$0xff]   ;;  %v6317_v8 = vld [vmem:[%s8481_s1 + $0x260] sm:$0xff]  }
  0x32   :  { %5724 = vmatprep.subr.bf16.mxu1 %v6286_v9  ;;  %v6318_v9 = vld [vmem:[%s8481_s1 + $0x2e0] sm:$0xff]  }
  0x33   :  { %2900 = vmatmul.mubr.bf16.gmra.mrb[8].mxu0 %v5148_v6  ;;  %v5155_v6 = vcombine.high %v95_v2, %v111_v4 }
  0x34   :  { %2965 = vmatmul.mubr.bf16.gmra.mrb[8].mxu1 %v5150_v7  ;;  %5685 = vmatpush3.bf16.msra.mxu0 %v6287_v10  ;;  %v5154_v7 = vcombine.low %v95_v2, %v111_v4  ;;  %v6319_v10 = vld [vmem:[%s8481_s1 + $0x220] sm:$0xff]   ;;  %v5157_v2 = vcombine.high %v96_v0, %v112_v1  ;;  %v113_v4 = vld [vmem:[%s8482_s0 + $0x2a8] sm:$0xff] }
  0x35   :  { %5725 = vmatpush3.bf16.msra.mxu1 %v6288_v11  ;;  %5686 = vmatprep.subr.bf16.mxu0 %v6289_v12  ;;  %v6320_v11 = vld [vmem:[%s8481_s1 + $0x2a0] sm:$0xff]   ;;  %v6321_v12 = vld [vmem:[%s8481_s1 + $0x268] sm:$0xff]  }
  0x36   :  { %5726 = vmatprep.subr.bf16.mxu1 %v6290_v13  ;;  %2907 = vmatprep.mubr.bf16.mxu0 %v5181_v19  ;;  %v6322_v13 = vld [vmem:[%s8481_s1 + $0x2e8] sm:$0xff]   ;;  %v127_v19 = vld [vmem:[%s8482_s0 + $0x318] sm:$0xff] }
  0x37   :  { %2972 = vmatprep.mubr.bf16.mxu1 %v5183_v22  ;;  %v5187_v22 = vcombine.high %v127_v19, %v143_v20 }
  0x38   :  { %5687 = vmatpush3.bf16.msra.mxu0 %v6291_v14  ;;  %v6323_v14 = vld [vmem:[%s8481_s1 + $0x228] sm:$0xff]  }
  0x39   :  { %5727 = vmatpush3.bf16.msra.mxu1 %v6292_v15  ;;  %5688 = vmatprep.subr.bf16.mxu0 %v6293_v24  ;;  %v6324_v15 = vld [vmem:[%s8481_s1 + $0x2a8] sm:$0xff]   ;;  %v6325_v24 = vld [vmem:[%s8481_s1 + $0x270] sm:$0xff]  }
  0x3a   :  { %5728 = vmatprep.subr.bf16.mxu1 %v6294_v25  ;;  %v6326_v25 = vld [vmem:[%s8481_s1 + $0x2f0] sm:$0xff]  }
  0x3b   :  { %2908 = vmatmul.mubr.bf16.gmra.mrb[12].mxu0 %v5180_v21  ;;  %v5184_v21 = vcombine.low %v126_v16, %v142_v17  ;;  %v128_v16 = vld [vmem:[%s8482_s0 + $0x320] sm:$0xff] }
  0x3c   :  { %2973 = vmatmul.mubr.bf16.gmra.mrb[12].mxu1 %v5182_v23  ;;  %5689 = vmatpush3.bf16.msra.mxu0 %v6295_v26  ;;  %v5186_v23 = vcombine.low %v127_v19, %v143_v20  ;;  %v6327_v26 = vld [vmem:[%s8481_s1 + $0x230] sm:$0xff]   ;;  %v144_v17 = vld [vmem:[%s8482_s0 + $0x3a0] sm:$0xff]  ;;  %v145_v19 = vld [vmem:[%s8482_s0 + $0x3a8] sm:$0xff] }
  0x3d   :  { %5729 = vmatpush3.bf16.msra.mxu1 %v6296_v27  ;;  %5690 = vmatprep.subr.bf16.mxu0 %v6297_v28  ;;  %v6328_v27 = vld [vmem:[%s8481_s1 + $0x2b0] sm:$0xff]   ;;  %v6329_v28 = vld [vmem:[%s8481_s1 + $0x278] sm:$0xff]   ;;  %v5189_v20 = vcombine.high %v128_v16, %v144_v17 }
  0x3e   :  { %5730 = vmatprep.subr.bf16.mxu1 %v6298_v29  ;;  %3013 = vmatprep.mubr.bf16.mxu0 %v5089_v35  ;;  %v6330_v29 = vld [vmem:[%s8481_s1 + $0x2f8] sm:$0xff]   ;;  %v49_v35 = vld [vmem:[%s8482_s0 + $0xa8] sm:$0xff] }
  0x3f   :  { %3078 = vmatprep.mubr.bf16.mxu1 %v5091_v39 }
  0x40   :  { %5691 = vmatpush3.bf16.msra.mxu0 %v6299_v30  ;;  %v6331_v30 = vld [vmem:[%s8481_s1 + $0x238] sm:$0xff]  }
  0x41   :  { %5731 = vmatpush3.bf16.msra.mxu1 %v6300_v31  ;;  %5756 = vmatprep.subr.bf16.mxu0 %v6301_v40  ;;  %v6332_v31 = vld [vmem:[%s8481_s1 + $0x2b8] sm:$0xff]   ;;  %v6333_v40 = vld [vmem:[%s8481_s1 + $0x340] sm:$0xff]  }
  0x42   :  { %5796 = vmatprep.subr.bf16.mxu1 %v6302_v41  ;;  %v6334_v41 = vld [vmem:[%s8481_s1 + $0x3c0] sm:$0xff]  }
  0x43   :  { %3014 = vmatmul.mubr.bf16.vlgmr.msra.gmra.mrb[16].mxu0 %v5088_v34  ;;  %v33_v34 = vld [vmem:[%s8482_s0 + $0x28] sm:$0xff] }
  0x44   :  { %3079 = vmatmul.mubr.bf16.vlgmr.msra.gmra.mrb[16].mxu1 %v5090_v38  ;;  %5757 = vmatpush3.bf16.msra.mxu0 %v6303_v42  ;;  %v5094_v38 = vcombine.low %v33_v34, %v49_v35  ;;  %v5095_v39 = vcombine.high %v33_v34, %v49_v35  ;;  %v6335_v42 = vld [vmem:[%s8481_s1 + $0x300] sm:$0xff]   ;;  %v35_v34 = vld [vmem:[%s8482_s0 + $0x38] sm:$0xff]  ;;  %v5096_v35 = vcombine.low %v34_v32, %v50_v33 }
  0x45   :  { %5797 = vmatpush3.bf16.msra.mxu1 %v6304_v43  ;;  %5758 = vmatprep.subr.bf16.mxu0 %v6305_v44  ;;  %v6336_v43 = vld [vmem:[%s8481_s1 + $0x380] sm:$0xff]   ;;  %v6337_v44 = vld [vmem:[%s8481_s1 + $0x348] sm:$0xff]  }
  0x46   :  { %5798 = vmatprep.subr.bf16.mxu1 %v6306_v45  ;;  %3021 = vmatprep.mubr.bf16.mxu0 %v5121_v52  ;;  %v6338_v45 = vld [vmem:[%s8481_s1 + $0x3c8] sm:$0xff]  }
  0x47   :  { %3086 = vmatprep.mubr.bf16.mxu1 %v5123_v53  ;;  %v81_v52 = vld [vmem:[%s8482_s0 + $0x1a8] sm:$0xff]  ;;  %v5124_v53 = vcombine.low %v64_v48, %v80_v49  ;;  %v66_v48 = vld [vmem:[%s8482_s0 + $0x130] sm:$0xff] }
  0x48   :  { %5759 = vmatpush3.bf16.msra.mxu0 %v6307_v46  ;;  %v6339_v46 = vld [vmem:[%s8481_s1 + $0x308] sm:$0xff]   ;;  %v82_v49 = vld [vmem:[%s8482_s0 + $0x1b0] sm:$0xff] }
  0x49   :  { %5799 = vmatpush3.bf16.msra.mxu1 %v6308_v47  ;;  %5760 = vmatprep.subr.bf16.mxu0 %v6309_v56  ;;  %v6340_v47 = vld [vmem:[%s8481_s1 + $0x388] sm:$0xff]   ;;  %v6341_v56 = vld [vmem:[%s8481_s1 + $0x350] sm:$0xff]  }
  0x4a   :  { %5800 = vmatprep.subr.bf16.mxu1 %v6310_v57  ;;  %v6342_v57 = vld [vmem:[%s8481_s1 + $0x3d0] sm:$0xff]  }
  0x4b   :  { %3022 = vmatmul.mubr.bf16.gmra.mrb[20].mxu0 %v5120_v54  ;;  %v5127_v54 = vcombine.high %v65_v50, %v81_v52 }
  0x4c   :  { %3087 = vmatmul.mubr.bf16.gmra.mrb[20].mxu1 %v5122_v55  ;;  %5761 = vmatpush3.bf16.msra.mxu0 %v6311_v58  ;;  %v5126_v55 = vcombine.low %v65_v50, %v81_v52  ;;  %v6343_v58 = vld [vmem:[%s8481_s1 + $0x310] sm:$0xff]   ;;  %v5129_v50 = vcombine.high %v66_v48, %v82_v49  ;;  %v83_v52 = vld [vmem:[%s8482_s0 + $0x1b8] sm:$0xff] }
  0x4d   :  { %5801 = vmatpush3.bf16.msra.mxu1 %v6312_v59  ;;  %5762 = vmatprep.subr.bf16.mxu0 %v6313_v60  ;;  %v6344_v59 = vld [vmem:[%s8481_s1 + $0x390] sm:$0xff]   ;;  %v6345_v60 = vld [vmem:[%s8481_s1 + $0x358] sm:$0xff]  }
  0x4e   :  { %5802 = vmatprep.subr.bf16.mxu1 %v6314_v61  ;;  %3029 = vmatprep.mubr.bf16.mxu0 %v5153_v3  ;;  %v6346_v61 = vld [vmem:[%s8481_s1 + $0x3d8] sm:$0xff]   ;;  %v97_v3 = vld [vmem:[%s8482_s0 + $0x228] sm:$0xff] }
  0x4f   :  { %3094 = vmatprep.mubr.bf16.mxu1 %v5155_v6  ;;  %v5159_v6 = vcombine.high %v97_v3, %v113_v4 }
  0x50   :  { %5763 = vmatpush3.bf16.msra.mxu0 %v6315_v62  ;;  %v6347_v62 = vld [vmem:[%s8481_s1 + $0x318] sm:$0xff]  }
  0x51   :  { %5803 = vmatpush3.bf16.msra.mxu1 %v6316_v63  ;;  %5764 = vmatprep.subr.bf16.mxu0 %v6317_v8  ;;  %v6348_v63 = vld [vmem:[%s8481_s1 + $0x398] sm:$0xff]   ;;  %v6349_v8 = vld [vmem:[%s8481_s1 + $0x360] sm:$0xff]  }
  0x52   :  { %5804 = vmatprep.subr.bf16.mxu1 %v6318_v9  ;;  %v6350_v9 = vld [vmem:[%s8481_s1 + $0x3e0] sm:$0xff]  }
  0x53   :  { %3030 = vmatmul.mubr.bf16.gmra.mrb[24].mxu0 %v5152_v5  ;;  %v5156_v5 = vcombine.low %v96_v0, %v112_v1  ;;  %v98_v0 = vld [vmem:[%s8482_s0 + $0x230] sm:$0xff] }
  0x54   :  { %3095 = vmatmul.mubr.bf16.gmra.mrb[24].mxu1 %v5154_v7  ;;  %5765 = vmatpush3.bf16.msra.mxu0 %v6319_v10  ;;  %v5158_v7 = vcombine.low %v97_v3, %v113_v4  ;;  %v6351_v10 = vld [vmem:[%s8481_s1 + $0x320] sm:$0xff]   ;;  %v114_v1 = vld [vmem:[%s8482_s0 + $0x2b0] sm:$0xff]  ;;  %v115_v3 = vld [vmem:[%s8482_s0 + $0x2b8] sm:$0xff] }
  0x55   :  { %5805 = vmatpush3.bf16.msra.mxu1 %v6320_v11  ;;  %5766 = vmatprep.subr.bf16.mxu0 %v6321_v12  ;;  %v6352_v11 = vld [vmem:[%s8481_s1 + $0x3a0] sm:$0xff]   ;;  %v6353_v12 = vld [vmem:[%s8481_s1 + $0x368] sm:$0xff]   ;;  %v5161_v4 = vcombine.high %v98_v0, %v114_v1 }
  0x56   :  { %5806 = vmatprep.subr.bf16.mxu1 %v6322_v13  ;;  %3037 = vmatprep.mubr.bf16.mxu0 %v5185_v18  ;;  %v6354_v13 = vld [vmem:[%s8481_s1 + $0x3e8] sm:$0xff]  }
  0x57   :  { %3102 = vmatprep.mubr.bf16.mxu1 %v5187_v22  ;;  %v129_v18 = vld [vmem:[%s8482_s0 + $0x328] sm:$0xff]  ;;  %v5188_v22 = vcombine.low %v128_v16, %v144_v17  ;;  %v130_v16 = vld [vmem:[%s8482_s0 + $0x330] sm:$0xff] }
  0x58   :  { %5767 = vmatpush3.bf16.msra.mxu0 %v6323_v14  ;;  %v6355_v14 = vld [vmem:[%s8481_s1 + $0x328] sm:$0xff]   ;;  %v146_v17 = vld [vmem:[%s8482_s0 + $0x3b0] sm:$0xff] }
  0x59   :  { %5807 = vmatpush3.bf16.msra.mxu1 %v6324_v15  ;;  %5768 = vmatprep.subr.bf16.mxu0 %v6325_v24  ;;  %v6356_v15 = vld [vmem:[%s8481_s1 + $0x3a8] sm:$0xff]   ;;  %v6357_v24 = vld [vmem:[%s8481_s1 + $0x370] sm:$0xff]  }
  0x5a   :  { %5808 = vmatprep.subr.bf16.mxu1 %v6326_v25  ;;  %v6358_v25 = vld [vmem:[%s8481_s1 + $0x3f0] sm:$0xff]  }
  0x5b   :  { %3038 = vmatmul.mubr.bf16.gmra.mrb[28].mxu0 %v5184_v21  ;;  %v5191_v21 = vcombine.high %v129_v18, %v145_v19 }
  0x5c   :  { %3103 = vmatmul.mubr.bf16.gmra.mrb[28].mxu1 %v5186_v23  ;;  %5769 = vmatpush3.bf16.msra.mxu0 %v6327_v26  ;;  %v5190_v23 = vcombine.low %v129_v18, %v145_v19  ;;  %v6359_v26 = vld [vmem:[%s8481_s1 + $0x330] sm:$0xff]   ;;  %v131_v18 = vld [vmem:[%s8482_s0 + $0x338] sm:$0xff]  ;;  %v5193_v19 = vcombine.high %v130_v16, %v146_v17 }
  0x5d   :  { %5809 = vmatpush3.bf16.msra.mxu1 %v6328_v27  ;;  %5770 = vmatprep.subr.bf16.mxu0 %v6329_v28  ;;  %v6360_v27 = vld [vmem:[%s8481_s1 + $0x3b0] sm:$0xff]   ;;  %v6361_v28 = vld [vmem:[%s8481_s1 + $0x378] sm:$0xff]  }
  0x5e   :  { %5810 = vmatprep.subr.bf16.mxu1 %v6330_v29  ;;  %3143 = vmatprep.mubr.bf16.mxu0 %v5093_v37  ;;  %v6362_v29 = vld [vmem:[%s8481_s1 + $0x3f8] sm:$0xff]  }
  0x5f   :  { %3208 = vmatprep.mubr.bf16.mxu1 %v5095_v39  ;;  %v51_v37 = vld [vmem:[%s8482_s0 + $0xb8] sm:$0xff] }
  0x60   :  { %5771 = vmatpush3.bf16.msra.mxu0 %v6331_v30  ;;  %v6363_v30 = vld [vmem:[%s8481_s1 + $0x338] sm:$0xff]   ;;  %v5099_v39 = vcombine.high %v35_v34, %v51_v37 }
  0x61   :  { %5811 = vmatpush3.bf16.msra.mxu1 %v6332_v31  ;;  %5836 = vmatprep.subr.bf16.mxu0 %v6333_v40  ;;  %v6364_v31 = vld [vmem:[%s8481_s1 + $0x3b8] sm:$0xff]   ;;  %v6365_v40 = vld [vmem:[%s8481_s1 + $0x440] sm:$0xff]  }
  0x62   :  { %5876 = vmatprep.subr.bf16.mxu1 %v6334_v41  ;;  %v6366_v41 = vld [vmem:[%s8481_s1 + $0x4c0] sm:$0xff]  }
  0x63   :  { %3144 = vmatmul.mubr.bf16.vlgmr.msra.gmra.mrb[32].mxu0 %v5092_v36  ;;  %v5097_v36 = vcombine.high %v34_v32, %v50_v33  ;;  %v36_v32 = vld [vmem:[%s8482_s0 + $0x40] sm:$0xff] }
  0x64   :  { %3209 = vmatmul.mubr.bf16.vlgmr.msra.gmra.mrb[32].mxu1 %v5094_v38  ;;  %5837 = vmatpush3.bf16.msra.mxu0 %v6335_v42  ;;  %v5098_v38 = vcombine.low %v35_v34, %v51_v37  ;;  %v6367_v42 = vld [vmem:[%s8481_s1 + $0x400] sm:$0xff]   ;;  %v53_v37 = vld [vmem:[%s8482_s0 + $0xc8] sm:$0xff] }
  0x65   :  { %5877 = vmatpush3.bf16.msra.mxu1 %v6336_v43  ;;  %5838 = vmatprep.subr.bf16.mxu0 %v6337_v44  ;;  %v6368_v43 = vld [vmem:[%s8481_s1 + $0x480] sm:$0xff]   ;;  %v6369_v44 = vld [vmem:[%s8481_s1 + $0x448] sm:$0xff]  }
  0x66   :  { %5878 = vmatprep.subr.bf16.mxu1 %v6338_v45  ;;  %3151 = vmatprep.mubr.bf16.mxu0 %v5125_v51  ;;  %v6370_v45 = vld [vmem:[%s8481_s1 + $0x4c8] sm:$0xff]   ;;  %v67_v51 = vld [vmem:[%s8482_s0 + $0x138] sm:$0xff]  ;;  %v52_v33 = vld [vmem:[%s8482_s0 + $0xc0] sm:$0xff] }
  0x67   :  { %3216 = vmatprep.mubr.bf16.mxu1 %v5127_v54  ;;  %v5131_v54 = vcombine.high %v67_v51, %v83_v52  ;;  %v5100_v34 = vcombine.low %v36_v32, %v52_v33 }
  0x68   :  { %5839 = vmatpush3.bf16.msra.mxu0 %v6339_v46  ;;  %v6371_v46 = vld [vmem:[%s8481_s1 + $0x408] sm:$0xff]  }
  0x69   :  { %5879 = vmatpush3.bf16.msra.mxu1 %v6340_v47  ;;  %5840 = vmatprep.subr.bf16.mxu0 %v6341_v56  ;;  %v6372_v47 = vld [vmem:[%s8481_s1 + $0x488] sm:$0xff]   ;;  %v6373_v56 = vld [vmem:[%s8481_s1 + $0x450] sm:$0xff]  }
  0x6a   :  { %5880 = vmatprep.subr.bf16.mxu1 %v6342_v57  ;;  %v6374_v57 = vld [vmem:[%s8481_s1 + $0x4d0] sm:$0xff]  }
  0x6b   :  { %3152 = vmatmul.mubr.bf16.gmra.mrb[36].mxu0 %v5124_v53  ;;  %v5128_v53 = vcombine.low %v66_v48, %v82_v49  ;;  %v68_v48 = vld [vmem:[%s8482_s0 + $0x140] sm:$0xff] }
  0x6c   :  { %3217 = vmatmul.mubr.bf16.gmra.mrb[36].mxu1 %v5126_v55  ;;  %5841 = vmatpush3.bf16.msra.mxu0 %v6343_v58  ;;  %v5130_v55 = vcombine.low %v67_v51, %v83_v52  ;;  %v6375_v58 = vld [vmem:[%s8481_s1 + $0x410] sm:$0xff]   ;;  %v84_v49 = vld [vmem:[%s8482_s0 + $0x1c0] sm:$0xff]  ;;  %v85_v51 = vld [vmem:[%s8482_s0 + $0x1c8] sm:$0xff] }
  0x6d   :  { %5881 = vmatpush3.bf16.msra.mxu1 %v6344_v59  ;;  %5842 = vmatprep.subr.bf16.mxu0 %v6345_v60  ;;  %v6376_v59 = vld [vmem:[%s8481_s1 + $0x490] sm:$0xff]   ;;  %v6377_v60 = vld [vmem:[%s8481_s1 + $0x458] sm:$0xff]   ;;  %v5133_v52 = vcombine.high %v68_v48, %v84_v49 }
  0x6e   :  { %5882 = vmatprep.subr.bf16.mxu1 %v6346_v61  ;;  %3159 = vmatprep.mubr.bf16.mxu0 %v5157_v2  ;;  %v6378_v61 = vld [vmem:[%s8481_s1 + $0x4d8] sm:$0xff]  }
  0x6f   :  { %3224 = vmatprep.mubr.bf16.mxu1 %v5159_v6  ;;  %v99_v2 = vld [vmem:[%s8482_s0 + $0x238] sm:$0xff]  ;;  %v5160_v6 = vcombine.low %v98_v0, %v114_v1  ;;  %v100_v0 = vld [vmem:[%s8482_s0 + $0x240] sm:$0xff] }
  0x70   :  { %5843 = vmatpush3.bf16.msra.mxu0 %v6347_v62  ;;  %v6379_v62 = vld [vmem:[%s8481_s1 + $0x418] sm:$0xff]   ;;  %v116_v1 = vld [vmem:[%s8482_s0 + $0x2c0] sm:$0xff] }
  0x71   :  { %5883 = vmatpush3.bf16.msra.mxu1 %v6348_v63  ;;  %5844 = vmatprep.subr.bf16.mxu0 %v6349_v8  ;;  %v6380_v63 = vld [vmem:[%s8481_s1 + $0x498] sm:$0xff]   ;;  %v6381_v8 = vld [vmem:[%s8481_s1 + $0x460] sm:$0xff]  }
  0x72   :  { %5884 = vmatprep.subr.bf16.mxu1 %v6350_v9  ;;  %v6382_v9 = vld [vmem:[%s8481_s1 + $0x4e0] sm:$0xff]  }
  0x73   :  { %3160 = vmatmul.mubr.bf16.gmra.mrb[40].mxu0 %v5156_v5  ;;  %v5163_v5 = vcombine.high %v99_v2, %v115_v3 }
  0x74   :  { %3225 = vmatmul.mubr.bf16.gmra.mrb[40].mxu1 %v5158_v7  ;;  %5845 = vmatpush3.bf16.msra.mxu0 %v6351_v10  ;;  %v5162_v7 = vcombine.low %v99_v2, %v115_v3  ;;  %v6383_v10 = vld [vmem:[%s8481_s1 + $0x420] sm:$0xff]   ;;  %v101_v2 = vld [vmem:[%s8482_s0 + $0x248] sm:$0xff]  ;;  %v5165_v3 = vcombine.high %v100_v0, %v116_v1 }
  0x75   :  { %5885 = vmatpush3.bf16.msra.mxu1 %v6352_v11  ;;  %5846 = vmatprep.subr.bf16.mxu0 %v6353_v12  ;;  %v6384_v11 = vld [vmem:[%s8481_s1 + $0x4a0] sm:$0xff]   ;;  %v6385_v12 = vld [vmem:[%s8481_s1 + $0x468] sm:$0xff]  }
  0x76   :  { %5886 = vmatprep.subr.bf16.mxu1 %v6354_v13  ;;  %3167 = vmatprep.mubr.bf16.mxu0 %v5189_v20  ;;  %v6386_v13 = vld [vmem:[%s8481_s1 + $0x4e8] sm:$0xff]   ;;  %v147_v20 = vld [vmem:[%s8482_s0 + $0x3b8] sm:$0xff] }
  0x77   :  { %3232 = vmatprep.mubr.bf16.mxu1 %v5191_v21  ;;  %v5192_v21 = vcombine.low %v130_v16, %v146_v17  ;;  %v132_v16 = vld [vmem:[%s8482_s0 + $0x340] sm:$0xff] }
  0x78   :  { %5847 = vmatpush3.bf16.msra.mxu0 %v6355_v14  ;;  %v6387_v14 = vld [vmem:[%s8481_s1 + $0x428] sm:$0xff]   ;;  %v148_v17 = vld [vmem:[%s8482_s0 + $0x3c0] sm:$0xff] }
  0x79   :  { %5887 = vmatpush3.bf16.msra.mxu1 %v6356_v15  ;;  %5848 = vmatprep.subr.bf16.mxu0 %v6357_v24  ;;  %v6388_v15 = vld [vmem:[%s8481_s1 + $0x4a8] sm:$0xff]   ;;  %v6389_v24 = vld [vmem:[%s8481_s1 + $0x470] sm:$0xff]  }
  0x7a   :  { %5888 = vmatprep.subr.bf16.mxu1 %v6358_v25  ;;  %v6390_v25 = vld [vmem:[%s8481_s1 + $0x4f0] sm:$0xff]  }
  0x7b   :  { %3168 = vmatmul.mubr.bf16.gmra.mrb[44].mxu0 %v5188_v22  ;;  %v5195_v22 = vcombine.high %v131_v18, %v147_v20 }
  0x7c   :  { %3233 = vmatmul.mubr.bf16.gmra.mrb[44].mxu1 %v5190_v23  ;;  %5849 = vmatpush3.bf16.msra.mxu0 %v6359_v26  ;;  %v5194_v23 = vcombine.low %v131_v18, %v147_v20  ;;  %v6391_v26 = vld [vmem:[%s8481_s1 + $0x430] sm:$0xff]   ;;  %v5197_v18 = vcombine.high %v132_v16, %v148_v17  ;;  %v149_v20 = vld [vmem:[%s8482_s0 + $0x3c8] sm:$0xff] }
  0x7d   :  { %5889 = vmatpush3.bf16.msra.mxu1 %v6360_v27  ;;  %5850 = vmatprep.subr.bf16.mxu0 %v6361_v28  ;;  %v6392_v27 = vld [vmem:[%s8481_s1 + $0x4b0] sm:$0xff]   ;;  %v6393_v28 = vld [vmem:[%s8481_s1 + $0x478] sm:$0xff]  }
  0x7e   :  { %5890 = vmatprep.subr.bf16.mxu1 %v6362_v29  ;;  %3273 = vmatprep.mubr.bf16.mxu0 %v5097_v36  ;;  %v6394_v29 = vld [vmem:[%s8481_s1 + $0x4f8] sm:$0xff]   ;;  %v37_v36 = vld [vmem:[%s8482_s0 + $0x48] sm:$0xff] }
  0x7f   :  { %3338 = vmatprep.mubr.bf16.mxu1 %v5099_v39  ;;  %v5103_v39 = vcombine.high %v37_v36, %v53_v37 }
  0x80   :  { %5851 = vmatpush3.bf16.msra.mxu0 %v6363_v30  ;;  %v6395_v30 = vld [vmem:[%s8481_s1 + $0x438] sm:$0xff]  }
  0x81   :  { %5891 = vmatpush3.bf16.msra.mxu1 %v6364_v31  ;;  %5916 = vmatprep.subr.bf16.mxu0 %v6365_v40  ;;  %v6396_v31 = vld [vmem:[%s8481_s1 + $0x4b8] sm:$0xff]   ;;  %v6397_v40 = vld [vmem:[%s8481_s1 + $0x540] sm:$0xff]  }
  0x82   :  { %5956 = vmatprep.subr.bf16.mxu1 %v6366_v41  ;;  %v6398_v41 = vld [vmem:[%s8481_s1 + $0x5c0] sm:$0xff]  }
  0x83   :  { %3274 = vmatmul.mubr.bf16.vlgmr.msra.gmra.mrb[48].mxu0 %v5096_v35  ;;  %v5101_v35 = vcombine.high %v36_v32, %v52_v33  ;;  %v38_v32 = vld [vmem:[%s8482_s0 + $0x50] sm:$0xff] }
  0x84   :  { %3339 = vmatmul.mubr.bf16.vlgmr.msra.gmra.mrb[48].mxu1 %v5098_v38  ;;  %5917 = vmatpush3.bf16.msra.mxu0 %v6367_v42  ;;  %v5102_v38 = vcombine.low %v37_v36, %v53_v37  ;;  %v6399_v42 = vld [vmem:[%s8481_s1 + $0x500] sm:$0xff]   ;;  %v54_v33 = vld [vmem:[%s8482_s0 + $0xd0] sm:$0xff] }
  0x85   :  { %5957 = vmatpush3.bf16.msra.mxu1 %v6368_v43  ;;  %5918 = vmatprep.subr.bf16.mxu0 %v6369_v44  ;;  %v6400_v43 = vld [vmem:[%s8481_s1 + $0x580] sm:$0xff]   ;;  %v6401_v44 = vld [vmem:[%s8481_s1 + $0x548] sm:$0xff]   ;;  %v5104_v36 = vcombine.low %v38_v32, %v54_v33  ;;  %v5105_v37 = vcombine.high %v38_v32, %v54_v33  ;;  %v6456_v32 = vld [vmem:[%s8481_s1 + $0x6b0] sm:$0xff]  }
  0x86   :  { %5958 = vmatprep.subr.bf16.mxu1 %v6370_v45  ;;  %3281 = vmatprep.mubr.bf16.mxu0 %v5129_v50  ;;  %v6402_v45 = vld [vmem:[%s8481_s1 + $0x5c8] sm:$0xff]  }
  0x87   :  { %3346 = vmatprep.mubr.bf16.mxu1 %v5131_v54  ;;  %v69_v50 = vld [vmem:[%s8482_s0 + $0x148] sm:$0xff]  ;;  %v5132_v54 = vcombine.low %v68_v48, %v84_v49  ;;  %v70_v48 = vld [vmem:[%s8482_s0 + $0x150] sm:$0xff] }
  0x88   :  { %5919 = vmatpush3.bf16.msra.mxu0 %v6371_v46  ;;  %v6403_v46 = vld [vmem:[%s8481_s1 + $0x508] sm:$0xff]   ;;  %v86_v49 = vld [vmem:[%s8482_s0 + $0x1d0] sm:$0xff] }
  0x89   :  { %5959 = vmatpush3.bf16.msra.mxu1 %v6372_v47  ;;  %5920 = vmatprep.subr.bf16.mxu0 %v6373_v56  ;;  %v6404_v47 = vld [vmem:[%s8481_s1 + $0x588] sm:$0xff]   ;;  %v6405_v56 = vld [vmem:[%s8481_s1 + $0x550] sm:$0xff]  }
  0x8a   :  { %5960 = vmatprep.subr.bf16.mxu1 %v6374_v57  ;;  %v6406_v57 = vld [vmem:[%s8481_s1 + $0x5d0] sm:$0xff]  }
  0x8b   :  { %3282 = vmatmul.mubr.bf16.gmra.mrb[52].mxu0 %v5128_v53  ;;  %v5135_v53 = vcombine.high %v69_v50, %v85_v51 }
  0x8c   :  { %3347 = vmatmul.mubr.bf16.gmra.mrb[52].mxu1 %v5130_v55  ;;  %5921 = vmatpush3.bf16.msra.mxu0 %v6375_v58  ;;  %v5134_v55 = vcombine.low %v69_v50, %v85_v51  ;;  %v6407_v58 = vld [vmem:[%s8481_s1 + $0x510] sm:$0xff]   ;;  %v71_v50 = vld [vmem:[%s8482_s0 + $0x158] sm:$0xff]  ;;  %v5137_v51 = vcombine.high %v70_v48, %v86_v49 }
  0x8d   :  { %5961 = vmatpush3.bf16.msra.mxu1 %v6376_v59  ;;  %5922 = vmatprep.subr.bf16.mxu0 %v6377_v60  ;;  %v6408_v59 = vld [vmem:[%s8481_s1 + $0x590] sm:$0xff]   ;;  %v6409_v60 = vld [vmem:[%s8481_s1 + $0x558] sm:$0xff]  }
  0x8e   :  { %5962 = vmatprep.subr.bf16.mxu1 %v6378_v61  ;;  %3289 = vmatprep.mubr.bf16.mxu0 %v5161_v4  ;;  %v6410_v61 = vld [vmem:[%s8481_s1 + $0x5d8] sm:$0xff]   ;;  %v117_v4 = vld [vmem:[%s8482_s0 + $0x2c8] sm:$0xff] }
  0x8f   :  { %3354 = vmatprep.mubr.bf16.mxu1 %v5163_v5  ;;  %v5164_v5 = vcombine.low %v100_v0, %v116_v1  ;;  %v102_v0 = vld [vmem:[%s8482_s0 + $0x250] sm:$0xff] }
  0x90   :  { %5923 = vmatpush3.bf16.msra.mxu0 %v6379_v62  ;;  %v6411_v62 = vld [vmem:[%s8481_s1 + $0x518] sm:$0xff]   ;;  %v118_v1 = vld [vmem:[%s8482_s0 + $0x2d0] sm:$0xff] }
  0x91   :  { %5963 = vmatpush3.bf16.msra.mxu1 %v6380_v63  ;;  %5924 = vmatprep.subr.bf16.mxu0 %v6381_v8  ;;  %v6412_v63 = vld [vmem:[%s8481_s1 + $0x598] sm:$0xff]   ;;  %v6413_v8 = vld [vmem:[%s8481_s1 + $0x560] sm:$0xff]  }
  0x92   :  { %5964 = vmatprep.subr.bf16.mxu1 %v6382_v9  ;;  %v6414_v9 = vld [vmem:[%s8481_s1 + $0x5e0] sm:$0xff]  }
  0x93   :  { %3290 = vmatmul.mubr.bf16.gmra.mrb[56].mxu0 %v5160_v6  ;;  %v5167_v6 = vcombine.high %v101_v2, %v117_v4 }
  0x94   :  { %3355 = vmatmul.mubr.bf16.gmra.mrb[56].mxu1 %v5162_v7  ;;  %5925 = vmatpush3.bf16.msra.mxu0 %v6383_v10  ;;  %v5166_v7 = vcombine.low %v101_v2, %v117_v4  ;;  %v6415_v10 = vld [vmem:[%s8481_s1 + $0x520] sm:$0xff]   ;;  %v5169_v2 = vcombine.high %v102_v0, %v118_v1  ;;  %v119_v4 = vld [vmem:[%s8482_s0 + $0x2d8] sm:$0xff] }
  0x95   :  { %5965 = vmatpush3.bf16.msra.mxu1 %v6384_v11  ;;  %5926 = vmatprep.subr.bf16.mxu0 %v6385_v12  ;;  %v6416_v11 = vld [vmem:[%s8481_s1 + $0x5a0] sm:$0xff]   ;;  %v6417_v12 = vld [vmem:[%s8481_s1 + $0x568] sm:$0xff]  }
  0x96   :  { %5966 = vmatprep.subr.bf16.mxu1 %v6386_v13  ;;  %3297 = vmatprep.mubr.bf16.mxu0 %v5193_v19  ;;  %v6418_v13 = vld [vmem:[%s8481_s1 + $0x5e8] sm:$0xff]  }
  0x97   :  { %3362 = vmatprep.mubr.bf16.mxu1 %v5195_v22  ;;  %v133_v19 = vld [vmem:[%s8482_s0 + $0x348] sm:$0xff] }
  0x98   :  { %5927 = vmatpush3.bf16.msra.mxu0 %v6387_v14  ;;  %v6419_v14 = vld [vmem:[%s8481_s1 + $0x528] sm:$0xff]   ;;  %v5199_v22 = vcombine.high %v133_v19, %v149_v20 }
  0x99   :  { %5967 = vmatpush3.bf16.msra.mxu1 %v6388_v15  ;;  %5928 = vmatprep.subr.bf16.mxu0 %v6389_v24  ;;  %v6420_v15 = vld [vmem:[%s8481_s1 + $0x5a8] sm:$0xff]   ;;  %v6421_v24 = vld [vmem:[%s8481_s1 + $0x570] sm:$0xff]  }
  0x9a   :  { %5968 = vmatprep.subr.bf16.mxu1 %v6390_v25  ;;  %v6422_v25 = vld [vmem:[%s8481_s1 + $0x5f0] sm:$0xff]  }
  0x9b   :  { %3298 = vmatmul.mubr.bf16.gmra.mrb[60].mxu0 %v5192_v21  ;;  %v5196_v21 = vcombine.low %v132_v16, %v148_v17  ;;  %v134_v16 = vld [vmem:[%s8482_s0 + $0x350] sm:$0xff] }
  0x9c   :  { %3363 = vmatmul.mubr.bf16.gmra.mrb[60].mxu1 %v5194_v23  ;;  %5929 = vmatpush3.bf16.msra.mxu0 %v6391_v26  ;;  %v5198_v23 = vcombine.low %v133_v19, %v149_v20  ;;  %v6423_v26 = vld [vmem:[%s8481_s1 + $0x530] sm:$0xff]   ;;  %v151_v19 = vld [vmem:[%s8482_s0 + $0x3d8] sm:$0xff] }
  0x9d   :  { %5969 = vmatpush3.bf16.msra.mxu1 %v6392_v27  ;;  %5930 = vmatprep.subr.bf16.mxu0 %v6393_v28  ;;  %v6424_v27 = vld [vmem:[%s8481_s1 + $0x5b0] sm:$0xff]   ;;  %v6425_v28 = vld [vmem:[%s8481_s1 + $0x578] sm:$0xff]  }
  0x9e   :  { %5970 = vmatprep.subr.bf16.mxu1 %v6394_v29  ;;  %3403 = vmatprep.mubr.bf16.mxu0 %v5101_v35  ;;  %v6426_v29 = vld [vmem:[%s8481_s1 + $0x5f8] sm:$0xff]   ;;  %v150_v17 = vld [vmem:[%s8482_s0 + $0x3d0] sm:$0xff] }
  0x9f   :  { %3468 = vmatprep.mubr.bf16.mxu1 %v5103_v39  ;;  %v55_v35 = vld [vmem:[%s8482_s0 + $0xd8] sm:$0xff] }
  0xa0   :  { %5931 = vmatpush3.bf16.msra.mxu0 %v6395_v30  ;;  %v6427_v30 = vld [vmem:[%s8481_s1 + $0x538] sm:$0xff]  }
  0xa1   :  { %5971 = vmatpush3.bf16.msra.mxu1 %v6396_v31  ;;  %5996 = vmatprep.subr.bf16.mxu0 %v6397_v40  ;;  %v6428_v31 = vld [vmem:[%s8481_s1 + $0x5b8] sm:$0xff]   ;;  %v6429_v40 = vld [vmem:[%s8481_s1 + $0x640] sm:$0xff]  }
  0xa2   :  { %6036 = vmatprep.subr.bf16.mxu1 %v6398_v41  ;;  %v6430_v41 = vld [vmem:[%s8481_s1 + $0x6c0] sm:$0xff]  }
  0xa3   :  { %3404 = vmatmul.mubr.bf16.vlgmr.msra.gmra.mrb[64].mxu0 %v5100_v34  ;;  %v39_v34 = vld [vmem:[%s8482_s0 + $0x58] sm:$0xff] }
  0xa4   :  { %3469 = vmatmul.mubr.bf16.vlgmr.msra.gmra.mrb[64].mxu1 %v5102_v38  ;;  %5997 = vmatpush3.bf16.msra.mxu0 %v6399_v42  ;;  %v5106_v38 = vcombine.low %v39_v34, %v55_v35  ;;  %v5107_v39 = vcombine.high %v39_v34, %v55_v35  ;;  %v6431_v42 = vld [vmem:[%s8481_s1 + $0x600] sm:$0xff]   ;;  %v6457_v35 = vld [vmem:[%s8481_s1 + $0x678] sm:$0xff]  }
  0xa5   :  { %6037 = vmatpush3.bf16.msra.mxu1 %v6400_v43  ;;  %5998 = vmatprep.subr.bf16.mxu0 %v6401_v44  ;;  %v6432_v43 = vld [vmem:[%s8481_s1 + $0x680] sm:$0xff]   ;;  %v6433_v44 = vld [vmem:[%s8481_s1 + $0x648] sm:$0xff]  }
  0xa6   :  { %6038 = vmatprep.subr.bf16.mxu1 %v6402_v45  ;;  %3411 = vmatprep.mubr.bf16.mxu0 %v5133_v52  ;;  %v6434_v45 = vld [vmem:[%s8481_s1 + $0x6c8] sm:$0xff]   ;;  %v87_v52 = vld [vmem:[%s8482_s0 + $0x1d8] sm:$0xff] }
  0xa7   :  { %3476 = vmatprep.mubr.bf16.mxu1 %v5135_v53  ;;  %v5136_v53 = vcombine.low %v70_v48, %v86_v49 }
  0xa8   :  { %5999 = vmatpush3.bf16.msra.mxu0 %v6403_v46  ;;  %v6435_v46 = vld [vmem:[%s8481_s1 + $0x608] sm:$0xff]  }
  0xa9   :  { %6039 = vmatpush3.bf16.msra.mxu1 %v6404_v47  ;;  %6000 = vmatprep.subr.bf16.mxu0 %v6405_v56  ;;  %v6436_v47 = vld [vmem:[%s8481_s1 + $0x688] sm:$0xff]   ;;  %v6437_v56 = vld [vmem:[%s8481_s1 + $0x650] sm:$0xff]  }
  0xaa   :  { %6040 = vmatprep.subr.bf16.mxu1 %v6406_v57  ;;  %v6438_v57 = vld [vmem:[%s8481_s1 + $0x6d0] sm:$0xff]  }
  0xab   :  { %3412 = vmatmul.mubr.bf16.gmra.mrb[68].mxu0 %v5132_v54  ;;  %v5139_v54 = vcombine.high %v71_v50, %v87_v52 }
  0xac   :  { %3477 = vmatmul.mubr.bf16.gmra.mrb[68].mxu1 %v5134_v55  ;;  %6001 = vmatpush3.bf16.msra.mxu0 %v6407_v58  ;;  %v5138_v55 = vcombine.low %v71_v50, %v87_v52  ;;  %v6439_v58 = vld [vmem:[%s8481_s1 + $0x610] sm:$0xff]   ;;  %v57_v50 = vld [vmem:[%s8482_s0 + $0xe8] sm:$0xff] }
  0xad   :  { %6041 = vmatpush3.bf16.msra.mxu1 %v6408_v59  ;;  %6002 = vmatprep.subr.bf16.mxu0 %v6409_v60  ;;  %v6440_v59 = vld [vmem:[%s8481_s1 + $0x690] sm:$0xff]   ;;  %v6441_v60 = vld [vmem:[%s8481_s1 + $0x658] sm:$0xff]  }
  0xae   :  { %6042 = vmatprep.subr.bf16.mxu1 %v6410_v61  ;;  %3419 = vmatprep.mubr.bf16.mxu0 %v5165_v3  ;;  %v6442_v61 = vld [vmem:[%s8481_s1 + $0x6d8] sm:$0xff]  }
  0xaf   :  { %3484 = vmatprep.mubr.bf16.mxu1 %v5167_v6  ;;  %v103_v3 = vld [vmem:[%s8482_s0 + $0x258] sm:$0xff] }
  0xb0   :  { %6003 = vmatpush3.bf16.msra.mxu0 %v6411_v62  ;;  %v6443_v62 = vld [vmem:[%s8481_s1 + $0x618] sm:$0xff]   ;;  %v5171_v6 = vcombine.high %v103_v3, %v119_v4 }
  0xb1   :  { %6043 = vmatpush3.bf16.msra.mxu1 %v6412_v63  ;;  %6004 = vmatprep.subr.bf16.mxu0 %v6413_v8  ;;  %v6444_v63 = vld [vmem:[%s8481_s1 + $0x698] sm:$0xff]   ;;  %v6445_v8 = vld [vmem:[%s8481_s1 + $0x660] sm:$0xff]  }
  0xb2   :  { %6044 = vmatprep.subr.bf16.mxu1 %v6414_v9  ;;  %v6446_v9 = vld [vmem:[%s8481_s1 + $0x6e0] sm:$0xff]  }
  0xb3   :  { %3420 = vmatmul.mubr.bf16.gmra.mrb[72].mxu0 %v5164_v5  ;;  %v5168_v5 = vcombine.low %v102_v0, %v118_v1  ;;  %v6465_v0 = vld [vmem:[%s8481_s1 + $0x748] sm:$0xff]  }
  0xb4   :  { %3485 = vmatmul.mubr.bf16.gmra.mrb[72].mxu1 %v5166_v7  ;;  %6005 = vmatpush3.bf16.msra.mxu0 %v6415_v10  ;;  %v5170_v7 = vcombine.low %v103_v3, %v119_v4  ;;  %v6447_v10 = vld [vmem:[%s8481_s1 + $0x620] sm:$0xff]  }
  0xb5   :  { %6045 = vmatpush3.bf16.msra.mxu1 %v6416_v11  ;;  %6006 = vmatprep.subr.bf16.mxu0 %v6417_v12  ;;  %v6448_v11 = vld [vmem:[%s8481_s1 + $0x6a0] sm:$0xff]   ;;  %v6449_v12 = vld [vmem:[%s8481_s1 + $0x668] sm:$0xff]  }
  0xb6   :  { %6046 = vmatprep.subr.bf16.mxu1 %v6418_v13  ;;  %3427 = vmatprep.mubr.bf16.mxu0 %v5197_v18  ;;  %v6450_v13 = vld [vmem:[%s8481_s1 + $0x6e8] sm:$0xff]   ;;  %v135_v18 = vld [vmem:[%s8482_s0 + $0x358] sm:$0xff] }
  0xb7   :  { %3492 = vmatprep.mubr.bf16.mxu1 %v5199_v22  ;;  %v5203_v22 = vcombine.high %v135_v18, %v151_v19 }
  0xb8   :  { %6007 = vmatpush3.bf16.msra.mxu0 %v6419_v14  ;;  %v6451_v14 = vld [vmem:[%s8481_s1 + $0x628] sm:$0xff]  }
  0xb9   :  { %6047 = vmatpush3.bf16.msra.mxu1 %v6420_v15  ;;  %6008 = vmatprep.subr.bf16.mxu0 %v6421_v24  ;;  %v6452_v15 = vld [vmem:[%s8481_s1 + $0x6a8] sm:$0xff]   ;;  %v5202_v24 = vcombine.low %v135_v18, %v151_v19  ;;  %v6469_v18 = vld [vmem:[%s8481_s1 + $0x750] sm:$0xff]  }
  0xba   :  { %6048 = vmatprep.subr.bf16.mxu1 %v6422_v25  ;;  %v6453_v25 = vld [vmem:[%s8481_s1 + $0x670] sm:$0xff]  }
  0xbb   :  { %3428 = vmatmul.mubr.bf16.gmra.mrb[76].mxu0 %v5196_v21  ;;  %v5201_v21 = vcombine.high %v134_v16, %v150_v17 }
  0xbc   :  { %3493 = vmatmul.mubr.bf16.gmra.mrb[76].mxu1 %v5198_v23  ;;  %6009 = vmatpush3.bf16.msra.mxu0 %v6423_v26  ;;  %v5200_v23 = vcombine.low %v134_v16, %v150_v17 }
  0xbd   :  { %6049 = vmatpush3.bf16.msra.mxu1 %v6424_v27  ;;  %6010 = vmatprep.subr.bf16.mxu0 %v6425_v28  ;;  %v6454_v27 = vld [vmem:[%s8481_s1 + $0x6f0] sm:$0xff]  }
  0xbe   :  { %6050 = vmatprep.subr.bf16.mxu1 %v6426_v29  ;;  %3533 = vmatprep.mubr.bf16.mxu0 %v5105_v37  ;;  %v6455_v29 = vld [vmem:[%s8481_s1 + $0x630] sm:$0xff]   ;;  %v6458_v37 = vld [vmem:[%s8481_s1 + $0x6f8] sm:$0xff]  }
  0xbf   :  { %3598 = vmatprep.mubr.bf16.mxu1 %v5107_v39  ;;  %v6459_v39 = vld [vmem:[%s8481_s1 + $0x638] sm:$0xff]  }
  0xc0   :  { %6011 = vmatpush3.bf16.msra.mxu0 %v6427_v30 }
  0xc1   :  { %6051 = vmatpush3.bf16.msra.mxu1 %v6428_v31  ;;  %6076 = vmatprep.subr.bf16.mxu0 %v6429_v40 }
  0xc2   :  { %6116 = vmatprep.subr.bf16.mxu1 %v6430_v41 }
  0xc3   :  { %3534 = vmatmul.mubr.bf16.vlgmr.msra.gmra.mrb[80].mxu0 %v5104_v36 }
  0xc4   :  { %3599 = vmatmul.mubr.bf16.vlgmr.msra.gmra.mrb[80].mxu1 %v5106_v38  ;;  %6077 = vmatpush3.bf16.msra.mxu0 %v6431_v42  ;;  %v6460_v42 = vld [vmem:[%s8481_s1 + $0x6b8] sm:$0xff]  }
  0xc5   :  { %6117 = vmatpush3.bf16.msra.mxu1 %v6432_v43  ;;  %6078 = vmatprep.subr.bf16.mxu0 %v6433_v44  ;;  %v40_v44 = vld [vmem:[%s8482_s0 + $0x60] sm:$0xff] }
  0xc6   :  { %6118 = vmatprep.subr.bf16.mxu1 %v6434_v45  ;;  %3541 = vmatprep.mubr.bf16.mxu0 %v5137_v51  ;;  %v56_v45 = vld [vmem:[%s8482_s0 + $0xe0] sm:$0xff] }
  0xc7   :  { %3606 = vmatprep.mubr.bf16.mxu1 %v5139_v54  ;;  %v5108_v48 = vcombine.low %v40_v44, %v56_v45  ;;  %v5109_v49 = vcombine.high %v40_v44, %v56_v45  ;;  %v6461_v54 = vld [vmem:[%s8481_s1 + $0x740] sm:$0xff]  }
  0xc8   :  { %6079 = vmatpush3.bf16.msra.mxu0 %v6435_v46  ;;  %v41_v46 = vld [vmem:[%s8482_s0 + $0x68] sm:$0xff] }
  0xc9   :  { %6119 = vmatpush3.bf16.msra.mxu1 %v6436_v47  ;;  %6080 = vmatprep.subr.bf16.mxu0 %v6437_v56  ;;  %v5110_v52 = vcombine.low %v41_v46, %v57_v50  ;;  %v6462_v56 = vld [vmem:[%s8481_s1 + $0x7c0] sm:$0xff]  }
  0xca   :  { %6120 = vmatprep.subr.bf16.mxu1 %v6438_v57 }
  0xcb   :  { %3542 = vmatmul.mubr.bf16.gmra.mrb[84].mxu0 %v5136_v53  ;;  %v5111_v53 = vcombine.high %v41_v46, %v57_v50 }
  0xcc   :  { %3607 = vmatmul.mubr.bf16.gmra.mrb[84].mxu1 %v5138_v55  ;;  %6081 = vmatpush3.bf16.msra.mxu0 %v6439_v58 }
  0xcd   :  { %6121 = vmatpush3.bf16.msra.mxu1 %v6440_v59  ;;  %6082 = vmatprep.subr.bf16.mxu0 %v6441_v60  ;;  %v6463_v59 = vld [vmem:[%s8481_s1 + $0x700] sm:$0xff]  }
  0xce   :  { %6122 = vmatprep.subr.bf16.mxu1 %v6442_v61  ;;  %3549 = vmatprep.mubr.bf16.mxu0 %v5169_v2  ;;  %v6466_v2 = vld [vmem:[%s8481_s1 + $0x7c8] sm:$0xff]  }
  0xcf   :  { %3614 = vmatprep.mubr.bf16.mxu1 %v5171_v6 }
  0xd0   :  { %6083 = vmatpush3.bf16.msra.mxu0 %v6443_v62  ;;  %v6464_v62 = vld [vmem:[%s8481_s1 + $0x780] sm:$0xff]  }
  0xd1   :  { %6123 = vmatpush3.bf16.msra.mxu1 %v6444_v63  ;;  %6084 = vmatprep.subr.bf16.mxu0 %v6445_v8  ;;  %v72_v8 = vld [vmem:[%s8482_s0 + $0x160] sm:$0xff] }
  0xd2   :  { %6124 = vmatprep.subr.bf16.mxu1 %v6446_v9  ;;  %v88_v9 = vld [vmem:[%s8482_s0 + $0x1e0] sm:$0xff] }
  0xd3   :  { %3550 = vmatmul.mubr.bf16.gmra.mrb[88].mxu0 %v5168_v5  ;;  %v6467_v5 = vld [vmem:[%s8481_s1 + $0x708] sm:$0xff]  }
  0xd4   :  { %3615 = vmatmul.mubr.bf16.gmra.mrb[88].mxu1 %v5170_v7  ;;  %6085 = vmatpush3.bf16.msra.mxu0 %v6447_v10  ;;  %v6468_v7 = vld [vmem:[%s8481_s1 + $0x788] sm:$0xff]   ;;  %v5141_v10 = vcombine.high %v72_v8, %v88_v9 }
  0xd5   :  { %6125 = vmatpush3.bf16.msra.mxu1 %v6448_v11  ;;  %6086 = vmatprep.subr.bf16.mxu0 %v6449_v12  ;;  %v73_v11 = vld [vmem:[%s8482_s0 + $0x168] sm:$0xff] }
  0xd6   :  { %6126 = vmatprep.subr.bf16.mxu1 %v6450_v13  ;;  %3557 = vmatprep.mubr.bf16.mxu0 %v5201_v21  ;;  %v89_v12 = vld [vmem:[%s8482_s0 + $0x1e8] sm:$0xff]  ;;  %v5140_v13 = vcombine.low %v72_v8, %v88_v9 }
  0xd7   :  { %3622 = vmatprep.mubr.bf16.mxu1 %v5203_v22  ;;  %v5143_v16 = vcombine.high %v73_v11, %v89_v12  ;;  %v5142_v17 = vcombine.low %v73_v11, %v89_v12 }
  0xd8   :  { %6087 = vmatpush3.bf16.msra.mxu0 %v6451_v14 }
  0xd9   :  { %6127 = vmatpush3.bf16.msra.mxu1 %v6452_v15  ;;  %6088 = vmatprep.subr.bf16.mxu0 %v6453_v25 }
  0xda   :  { %6128 = vmatprep.subr.bf16.mxu1 %v6454_v27 }
  0xdb   :  { %3558 = vmatmul.mubr.bf16.gmra.mrb[92].mxu0 %v5200_v23  ;;  %v6471_v23 = vld [vmem:[%s8481_s1 + $0x710] sm:$0xff]  }
  0xdc   :  { %3623 = vmatmul.mubr.bf16.gmra.mrb[92].mxu1 %v5202_v24  ;;  %6089 = vmatpush3.bf16.msra.mxu0 %v6455_v29 }
  0xdd   :  { %6129 = vmatpush3.bf16.msra.mxu1 %v6456_v32  ;;  %6090 = vmatprep.subr.bf16.mxu0 %v6457_v35  ;;  %v6475_v35 = vld [vmem:[%s8481_s1 + $0x718] sm:$0xff]  }
  0xde   :  { %6130 = vmatprep.subr.bf16.mxu1 %v6458_v37  ;;  %3663 = vmatprep.mubr.bf16.mxu0 %v5109_v49  ;;  %v6476_v37 = vld [vmem:[%s8481_s1 + $0x798] sm:$0xff]   ;;  %v6477_v49 = vld [vmem:[%s8481_s1 + $0x760] sm:$0xff]  }
  0xdf   :  { %3728 = vmatprep.mubr.bf16.mxu1 %v5111_v53  ;;  %v6479_v53 = vld [vmem:[%s8481_s1 + $0x720] sm:$0xff]  }
  0xe0   :  { %6091 = vmatpush3.bf16.msra.mxu0 %v6459_v39  ;;  %v120_v39 = vld [vmem:[%s8482_s0 + $0x2e0] sm:$0xff] }
  0xe1   :  { %6131 = vmatpush3.bf16.msra.mxu1 %v6460_v42  ;;  %6156 = vmatprep.subr.bf16.mxu0 %v6461_v54  ;;  %v121_v42 = vld [vmem:[%s8482_s0 + $0x2e8] sm:$0xff] }
  0xe2   :  { %6196 = vmatprep.subr.bf16.mxu1 %v6462_v56  ;;  %v6480_v56 = vld [vmem:[%s8481_s1 + $0x7a0] sm:$0xff]  }
  0xe3   :  { %3664 = vmatmul.mubr.bf16.vlgmr.msra.gmra.mrb[96].mxu0 %v5108_v48 }
  0xe4   :  { %3729 = vmatmul.mubr.bf16.vlgmr.msra.gmra.mrb[96].mxu1 %v5110_v52  ;;  %6157 = vmatpush3.bf16.msra.mxu0 %v6463_v59 }
  0xe5   :  { %6197 = vmatpush3.bf16.msra.mxu1 %v6464_v62  ;;  %6158 = vmatprep.subr.bf16.mxu0 %v6465_v0 }
  0xe6   :  { %6198 = vmatprep.subr.bf16.mxu1 %v6466_v2  ;;  %3671 = vmatprep.mubr.bf16.mxu0 %v5141_v10 }
  0xe7   :  { %3736 = vmatprep.mubr.bf16.mxu1 %v5143_v16 }
  0xe8   :  { %6159 = vmatpush3.bf16.msra.mxu0 %v6467_v5 }
  0xe9   :  { %6199 = vmatpush3.bf16.msra.mxu1 %v6468_v7  ;;  %6160 = vmatprep.subr.bf16.mxu0 %v6469_v18 }
  0xeb   :  { %3672 = vmatmul.mubr.bf16.gmra.mrb[100].mxu0 %v5140_v13 }
  0xec   :  { %3737 = vmatmul.mubr.bf16.gmra.mrb[100].mxu1 %v5142_v17  ;;  %6161 = vmatpush3.bf16.msra.mxu0 %v6471_v23 }
  0xf6   :  { %v5612_v20 = vpop.f32.mrb[0].mxu0 }
  0xf7   :  { %v5652_v26 = vpop.f32.mrb[0].mxu1  ;;  %v5613_v28 = vpop.f32.mrb[1].mxu0 }
  0xf8   :  { %v7675_v30 = vadd.f32 %v5613_v28, %v5612_v20  ;;  %v5653_v31 = vpop.f32.mrb[1].mxu1  ;;  %v5615_v34 = vpop.f32.mrb[2].mxu0  ;;  %v6470_v20 = vld [vmem:[%s8481_s1 + $0x7d0] sm:$0xff]   ;;  %v6473_v28 = vld [vmem:[%s8481_s1 + $0x758] sm:$0xff]  }
  0xf9   :  { %v7680_v33 = vadd.f32 %v5653_v31, %v5652_v26  ;;  %v5655_v36 = vpop.f32.mrb[2].mxu1  ;;  %v5616_v38 = vpop.f32.mrb[3].mxu0  ;;  %v6472_v26 = vld [vmem:[%s8481_s1 + $0x790] sm:$0xff]   ;;  %6200 = vmatprep.subr.bf16.mxu1 %v6470_v20  ;;  %v6474_v31 = vld [vmem:[%s8481_s1 + $0x7d8] sm:$0xff]   ;;  %6162 = vmatprep.subr.bf16.mxu0 %v6473_v28  ;;  %v153_v20 = vld [vmem:[%s8482_s0 + $0x3e8] sm:$0xff] }
  0xfa   :  { %v7691_v40 = vadd.f32 %v5616_v38, %v5615_v34  ;;  %v5656_v41 = vpop.f32.mrb[3].mxu1  ;;  %6201 = vmatpush3.bf16.msra.mxu1 %v6472_v26  ;;  %v104_v38 = vld [vmem:[%s8482_s0 + $0x260] sm:$0xff]  ;;  %6163 = vmatpush3.bf16.msra.mxu0 %v6475_v35 }
  0xfb   :  { %v7696_v43 = vadd.f32 %v5656_v41, %v5655_v36  ;;  %6202 = vmatprep.subr.bf16.mxu1 %v6474_v31  ;;  %v105_v41 = vld [vmem:[%s8482_s0 + $0x268] sm:$0xff]  ;;  %v5173_v45 = vcombine.high %v104_v38, %v120_v39  ;;  %6164 = vmatprep.subr.bf16.mxu0 %v6477_v49  ;;  %v6486_v31 = vld [vmem:[%s8481_s1 + $0x7f0] sm:$0xff]   ;;  %v6491_v49 = vld [vmem:[%s8481_s1 + $0x738] sm:$0xff]  }
  0xfc   :  { %v5175_v46 = vcombine.high %v105_v41, %v121_v42  ;;  %v5174_v48 = vcombine.low %v105_v41, %v121_v42  ;;  %v6489_v42 = vld [vmem:[%s8481_s1 + $0x778] sm:$0xff]  }
  0xfd   :  { %3679 = vmatprep.mubr.bf16.mxu0 %v5173_v45 }
  0xfe   :  { %v5618_v47 = vpop.f32.mrb[4].mxu0  ;;  %6203 = vmatpush3.bf16.msra.mxu1 %v6476_v37  ;;  %3744 = vmatprep.mubr.bf16.mxu1 %v5175_v46 }
  0xff   :  { %v5658_v51 = vpop.f32.mrb[4].mxu1  ;;  %v5619_v55 = vpop.f32.mrb[5].mxu0  ;;  %3745 = vmatmul.mubr.bf16.gmra.mrb[104].mxu1 %v5174_v48  ;;  %6165 = vmatpush3.bf16.msra.mxu0 %v6479_v53  ;;  %v58_v53 = vld [vmem:[%s8482_s0 + $0xf0] sm:$0xff] }
 0x100   :  { %v7716_v57 = vadd.f32 %v5619_v55, %v5618_v47  ;;  %v5659_v58 = vpop.f32.mrb[5].mxu1  ;;  %v5621_v61 = vpop.f32.mrb[6].mxu0  ;;  %v5172_v47 = vcombine.low %v104_v38, %v120_v39  ;;  %v6488_v39 = vld [vmem:[%s8481_s1 + $0x7b0] sm:$0xff]  }
 0x101   :  { %v7721_v60 = vadd.f32 %v5659_v58, %v5658_v51  ;;  %v5661_v63 = vpop.f32.mrb[6].mxu1  ;;  %v5622_v1 = vpop.f32.mrb[7].mxu0  ;;  %v6478_v51 = vld [vmem:[%s8481_s1 + $0x7e0] sm:$0xff]  }
 0x102   :  { %v7732_v3 = vadd.f32 %v5622_v1, %v5621_v61  ;;  %v5662_v4 = vpop.f32.mrb[7].mxu1  ;;  %3680 = vmatmul.mubr.bf16.gmra.mrb[104].mxu0 %v5172_v47  ;;  %6204 = vmatprep.subr.bf16.mxu1 %v6478_v51  ;;  %v5083_v61 = vld [vmem:[%s8483_s2] ss:$0 sm:$0xff]  ;;  %v6490_v47 = vld [vmem:[%s8481_s1 + $0x7f8] sm:$0xff]  }
 0x103   :  { %v7737_v6 = vadd.f32 %v5662_v4, %v5661_v63  ;;  %6205 = vmatpush3.bf16.msra.mxu1 %v6480_v56  ;;  %v2886_v62 = vadd.f32 %v7675_v30, %v5083_v61  ;;  %v6481_v63 = vld [vmem:[%s8481_s1 + $0x768] sm:$0xff]   ;;  %v2889_v0 = vadd.f32 %v7691_v40, %v5083_v61  ;;  %v2894_v1 = vadd.f32 %v7716_v57, %v5083_v61  ;;  %v6492_v51 = vld [vmem:[%s8481_s1 + $0x7b8] sm:$0xff]  }
 0x104   :  { %v6482_v4 = vld [vmem:[%s8481_s1 + $0x7e8] sm:$0xff]   ;;  %v2897_v5 = vadd.f32 %v7732_v3, %v5083_v61  ;;  %6166 = vmatprep.subr.bf16.mxu0 %v6481_v63 }
 0x105   :  { %v2951_v30 = vadd.f32 %v7680_v33, %v2886_v62  ;;  %v6483_v40 = vld [vmem:[%s8481_s1 + $0x728] sm:$0xff]   ;;  %v2954_v57 = vadd.f32 %v7696_v43, %v2889_v0  ;;  %v7823_v11 = vadd.f32 %v7721_v60, %v2894_v1  ;;  %6206 = vmatprep.subr.bf16.mxu1 %v6482_v4  ;;  %v136_v33 = vld [vmem:[%s8482_s0 + $0x360] sm:$0xff]  ;;  %v74_v1 = vld [vmem:[%s8482_s0 + $0x170] sm:$0xff] }
 0x106   :  { %v5624_v14 = vpop.f32.mrb[8].mxu0  ;;  %v6484_v3 = vld [vmem:[%s8481_s1 + $0x7a8] sm:$0xff]   ;;  %v7835_v43 = vadd.f32 %v7737_v6, %v2897_v5  ;;  %6167 = vmatpush3.bf16.msra.mxu0 %v6483_v40  ;;  %v75_v4 = vld [vmem:[%s8482_s0 + $0x178] sm:$0xff] }
 0x107   :  { %v5664_v15 = vpop.f32.mrb[8].mxu1  ;;  %v5625_v19 = vpop.f32.mrb[9].mxu0  ;;  %6207 = vmatpush3.bf16.msra.mxu1 %v6484_v3 }
 0x108   :  { %v5626_v21 = vadd.f32 %v5625_v19, %v5624_v14  ;;  %v5665_v22 = vpop.f32.mrb[9].mxu1  ;;  %v5627_v25 = vpop.f32.mrb[10].mxu0  ;;  %v152_v14 = vld [vmem:[%s8482_s0 + $0x3e0] sm:$0xff]  ;;  %v137_v19 = vld [vmem:[%s8482_s0 + $0x368] sm:$0xff]  ;;  %6208 = vmatprep.subr.bf16.mxu1 %v6486_v31 }
 0x109   :  { %v7763_v24 = vadd.f32 %v5665_v22, %v5664_v15  ;;  %v5667_v27 = vpop.f32.mrb[10].mxu1  ;;  %v5628_v29 = vpop.f32.mrb[11].mxu0  ;;  %v5205_v18 = vcombine.high %v136_v33, %v152_v14  ;;  %v5204_v6 = vcombine.low %v136_v33, %v152_v14  ;;  %v5206_v26 = vcombine.low %v137_v19, %v153_v20  ;;  %v106_v33 = vld [vmem:[%s8482_s0 + $0x270] sm:$0xff] }
 0x10a   :  { %v5629_v32 = vadd.f32 %v5628_v29, %v5627_v25  ;;  %v5668_v34 = vpop.f32.mrb[11].mxu1  ;;  %v2902_v7 = vadd.f32 %v5626_v21, %v5083_v61  ;;  %v5207_v25 = vcombine.high %v137_v19, %v153_v20  ;;  %v122_v14 = vld [vmem:[%s8482_s0 + $0x2f0] sm:$0xff] }
 0x10b   :  { %v5669_v36 = vadd.f32 %v5668_v34, %v5667_v27  ;;  %v6485_v27 = vld [vmem:[%s8481_s1 + $0x770] sm:$0xff]   ;;  %3687 = vmatprep.mubr.bf16.mxu0 %v5205_v18  ;;  %6209 = vmatpush3.bf16.msra.mxu1 %v6488_v39  ;;  %v123_v18 = vld [vmem:[%s8482_s0 + $0x2f8] sm:$0xff] }
 0x10c   :  { %v2905_v8 = vadd.f32 %v5629_v32, %v5083_v61  ;;  %v7838_v60 = vadd.f32 %v7763_v24, %v2902_v7  ;;  %3752 = vmatprep.mubr.bf16.mxu1 %v5207_v25  ;;  %3688 = vmatmul.mubr.bf16.gmra.mrb[108].mxu0 %v5204_v6  ;;  %v5177_v25 = vcombine.high %v106_v33, %v122_v14 }
 0x10d   :  { %3753 = vmatmul.mubr.bf16.gmra.mrb[108].mxu1 %v5206_v26  ;;  %6168 = vmatprep.subr.bf16.mxu0 %v6485_v27 }
 0x10e   :  { %v5630_v44 = vpop.f32.mrb[12].mxu0  ;;  %v7840_v15 = vadd.f32 %v5669_v36, %v2905_v8  ;;  %v6487_v36 = vld [vmem:[%s8481_s1 + $0x730] sm:$0xff]   ;;  %6210 = vmatprep.subr.bf16.mxu1 %v6490_v47  ;;  %v155_v47 = vld [vmem:[%s8482_s0 + $0x3f8] sm:$0xff] }
 0x10f   :  { %v5670_v50 = vpop.f32.mrb[12].mxu1  ;;  %v5631_v52 = vpop.f32.mrb[13].mxu0  ;;  %6169 = vmatpush3.bf16.msra.mxu0 %v6487_v36  ;;  %6211 = vmatpush3.bf16.msra.mxu1 %v6492_v51 }
 0x110   :  { %v5632_v54 = vadd.f32 %v5631_v52, %v5630_v44  ;;  %v5671_v55 = vpop.f32.mrb[13].mxu1  ;;  %v5633_v59 = vpop.f32.mrb[14].mxu0  ;;  %6170 = vmatprep.subr.bf16.mxu0 %v6489_v42  ;;  %v42_v52 = vld [vmem:[%s8482_s0 + $0x70] sm:$0xff] }
 0x111   :  { %v5672_v58 = vadd.f32 %v5671_v55, %v5670_v50  ;;  %v5673_v2 = vpop.f32.mrb[14].mxu1  ;;  %v5634_v10 = vpop.f32.mrb[15].mxu0  ;;  %v59_v55 = vld [vmem:[%s8482_s0 + $0xf8] sm:$0xff]  ;;  %v5113_v62 = vcombine.high %v42_v52, %v58_v53 }
 0x112   :  { %v2910_v9 = vadd.f32 %v5632_v54, %v5083_v61  ;;  %v5635_v12 = vadd.f32 %v5634_v10, %v5633_v59  ;;  %v5674_v13 = vpop.f32.mrb[15].mxu1  ;;  %v43_v54 = vld [vmem:[%s8482_s0 + $0x78] sm:$0xff] }
 0x113   :  { %v5675_v22 = vadd.f32 %v5674_v13, %v5673_v2  ;;  %6171 = vmatpush3.bf16.msra.mxu0 %v6491_v49  ;;  %v5114_v63 = vcombine.low %v43_v54, %v59_v55  ;;  %v5115_v0 = vcombine.high %v43_v54, %v59_v55  ;;  %v90_v2 = vld [vmem:[%s8482_s0 + $0x1f0] sm:$0xff]  ;;  %3793 = vmatprep.mubr.bf16.mxu0 %v5113_v62 }
 0x114   :  { %v7842_v16 = vadd.f32 %v5672_v58, %v2910_v9  ;;  %v2913_v21 = vadd.f32 %v5635_v12, %v5083_v61  ;;  %v5112_v61 = vcombine.low %v42_v52, %v58_v53  ;;  %v5145_v8 = vcombine.high %v74_v1, %v90_v2  ;;  %v91_v9 = vld [vmem:[%s8482_s0 + $0x1f8] sm:$0xff] }
 0x115   :  { %3858 = vmatprep.mubr.bf16.mxu1 %v5115_v0  ;;  %v5147_v12 = vcombine.high %v75_v4, %v91_v9 }
 0x116   :  { %v5692_v17 = vpop.f32.mrb[16].mxu0  ;;  %v7856_v32 = vadd.f32 %v5675_v22, %v2913_v21  ;;  %3794 = vmatmul.mubr.bf16.vlgmr.msra.gmra.mrb[112].mxu0 %v5112_v61  ;;  %3859 = vmatmul.mubr.bf16.vlgmr.msra.gmra.mrb[112].mxu1 %v5114_v63  ;;  %v5144_v21 = vcombine.low %v74_v1, %v90_v2  ;;  %v5146_v22 = vcombine.low %v75_v4, %v91_v9 }
 0x117   :  { %v5732_v23 = vpop.f32.mrb[16].mxu1  ;;  %v5693_v24 = vpop.f32.mrb[17].mxu0  ;;  %3801 = vmatprep.mubr.bf16.mxu0 %v5145_v8  ;;  %3866 = vmatprep.mubr.bf16.mxu1 %v5147_v12 }
 0x118   :  { %v5694_v28 = vadd.f32 %v5693_v24, %v5692_v17  ;;  %v5733_v29 = vpop.f32.mrb[17].mxu1  ;;  %v5695_v35 = vpop.f32.mrb[18].mxu0  ;;  %v107_v17 = vld [vmem:[%s8482_s0 + $0x278] sm:$0xff] }
 0x119   :  { %v5734_v34 = vadd.f32 %v5733_v29, %v5732_v23  ;;  %v5735_v38 = vpop.f32.mrb[18].mxu1  ;;  %v5696_v41 = vpop.f32.mrb[19].mxu0  ;;  %v5179_v26 = vcombine.high %v107_v17, %v123_v18  ;;  %v5178_v51 = vcombine.low %v107_v17, %v123_v18 }
 0x11a   :  { %v3016_v37 = vadd.f32 %v5694_v28, %v2951_v30  ;;  %v5697_v45 = vadd.f32 %v5696_v41, %v5695_v35  ;;  %v5736_v46 = vpop.f32.mrb[19].mxu1 }
 0x11b   :  { %v5737_v48 = vadd.f32 %v5736_v46, %v5735_v38  ;;  %v139_v46 = vld [vmem:[%s8482_s0 + $0x378] sm:$0xff] }
 0x11c   :  { %v7867_v44 = vadd.f32 %v5734_v34, %v3016_v37  ;;  %v3019_v50 = vadd.f32 %v5697_v45, %v2954_v57  ;;  %v154_v45 = vld [vmem:[%s8482_s0 + $0x3f0] sm:$0xff]  ;;  %v5211_v53 = vcombine.high %v139_v46, %v155_v47  ;;  %v5210_v9 = vcombine.low %v139_v46, %v155_v47 }
 0x11e   :  { %v7890_v56 = vadd.f32 %v5737_v48, %v3019_v50  ;;  %v5698_v58 = vpop.f32.mrb[20].mxu0  ;;  %3802 = vmatmul.mubr.bf16.gmra.mrb[116].mxu0 %v5144_v21  ;;  %3867 = vmatmul.mubr.bf16.gmra.mrb[116].mxu1 %v5146_v22 }
 0x11f   :  { %v5738_v59 = vpop.f32.mrb[20].mxu1  ;;  %v5699_v5 = vpop.f32.mrb[21].mxu0  ;;  %3809 = vmatprep.mubr.bf16.mxu0 %v5177_v25  ;;  %3874 = vmatprep.mubr.bf16.mxu1 %v5179_v26 }
 0x120   :  { %v5739_v7 = vpop.f32.mrb[21].mxu1  ;;  %v5700_v10 = vadd.f32 %v5699_v5, %v5698_v58  ;;  %v5701_v40 = vpop.f32.mrb[22].mxu0 }
 0x121   :  { %v5740_v30 = vadd.f32 %v5739_v7, %v5738_v59  ;;  %v5741_v57 = vpop.f32.mrb[22].mxu1  ;;  %v5702_v13 = vpop.f32.mrb[23].mxu0 }
 0x122   :  { %v5742_v3 = vpop.f32.mrb[23].mxu1  ;;  %v3024_v19 = vadd.f32 %v5700_v10, %v7823_v11  ;;  %v5703_v20 = vadd.f32 %v5702_v13, %v5701_v40 }
 0x123   :  { %v5743_v6 = vadd.f32 %v5742_v3, %v5741_v57 }
 0x124   :  { %v7917_v23 = vadd.f32 %v5740_v30, %v3024_v19  ;;  %v3027_v24 = vadd.f32 %v5703_v20, %v7835_v43  ;;  %v138_v43 = vld [vmem:[%s8482_s0 + $0x370] sm:$0xff] }
 0x125   :  { %v5209_v52 = vcombine.high %v138_v43, %v154_v45  ;;  %v5208_v8 = vcombine.low %v138_v43, %v154_v45 }
 0x126   :  { %v5704_v27 = vpop.f32.mrb[24].mxu0  ;;  %v7920_v28 = vadd.f32 %v5743_v6, %v3027_v24  ;;  %3875 = vmatmul.mubr.bf16.gmra.mrb[120].mxu1 %v5178_v51 }
 0x127   :  { %v5744_v29 = vpop.f32.mrb[24].mxu1  ;;  %v5705_v31 = vpop.f32.mrb[25].mxu0  ;;  %3882 = vmatprep.mubr.bf16.mxu1 %v5211_v53 }
 0x128   :  { %v5706_v34 = vadd.f32 %v5705_v31, %v5704_v27  ;;  %v5745_v35 = vpop.f32.mrb[25].mxu1  ;;  %v5707_v36 = vpop.f32.mrb[26].mxu0 }
 0x129   :  { %v5746_v11 = vadd.f32 %v5745_v35, %v5744_v29  ;;  %v5747_v37 = vpop.f32.mrb[26].mxu1  ;;  %v5708_v38 = vpop.f32.mrb[27].mxu0 }
 0x12a   :  { %v3032_v39 = vadd.f32 %v5706_v34, %v7838_v60  ;;  %v5709_v41 = vadd.f32 %v5708_v38, %v5707_v36  ;;  %v5748_v42 = vpop.f32.mrb[27].mxu1  ;;  %v5176_v60 = vcombine.low %v106_v33, %v122_v14 }
 0x12b   :  { %v5749_v48 = vadd.f32 %v5748_v42, %v5747_v37 }
 0x12c   :  { %v7935_v49 = vadd.f32 %v5746_v11, %v3032_v39  ;;  %v3035_v50 = vadd.f32 %v5709_v41, %v7840_v15  ;;  %3810 = vmatmul.mubr.bf16.gmra.mrb[120].mxu0 %v5176_v60 }
 0x12d   :  { %3817 = vmatprep.mubr.bf16.mxu0 %v5209_v52 }
 0x12e   :  { %v7938_v54 = vadd.f32 %v5749_v48, %v3035_v50  ;;  %v5710_v55 = vpop.f32.mrb[28].mxu0  ;;  %3883 = vmatmul.mubr.bf16.gmra.mrb[124].mxu1 %v5210_v9 }
 0x12f   :  { %v5750_v58 = vpop.f32.mrb[28].mxu1  ;;  %v5711_v59 = vpop.f32.mrb[29].mxu0 }
 0x130   :  { %v5712_v61 = vadd.f32 %v5711_v59, %v5710_v55  ;;  %v5751_v62 = vpop.f32.mrb[29].mxu1  ;;  %v5713_v63 = vpop.f32.mrb[30].mxu0 }
 0x131   :  { %v5752_v0 = vadd.f32 %v5751_v62, %v5750_v58  ;;  %v5753_v1 = vpop.f32.mrb[30].mxu1  ;;  %v5714_v2 = vpop.f32.mrb[31].mxu0 }
 0x132   :  { %v3040_v15 = vadd.f32 %v5712_v61, %v7842_v16  ;;  %v5715_v4 = vadd.f32 %v5714_v2, %v5713_v63  ;;  %v5754_v5 = vpop.f32.mrb[31].mxu1 }
 0x133   :  { %v5755_v7 = vadd.f32 %v5754_v5, %v5753_v1 }
 0x134   :  { %v7941_v10 = vadd.f32 %v5752_v0, %v3040_v15  ;;  %v3043_v30 = vadd.f32 %v5715_v4, %v7856_v32  ;;  %3818 = vmatmul.mubr.bf16.gmra.mrb[124].mxu0 %v5208_v8 }
 0x136   :  { %v7944_v40 = vadd.f32 %v5755_v7, %v3043_v30  ;;  %v5772_v57 = vpop.f32.mrb[32].mxu0 }
 0x137   :  { %v5812_v12 = vpop.f32.mrb[32].mxu1  ;;  %v5773_v13 = vpop.f32.mrb[33].mxu0 }
 0x138   :  { %v5813_v3 = vpop.f32.mrb[33].mxu1  ;;  %v5774_v33 = vadd.f32 %v5773_v13, %v5772_v57  ;;  %v5775_v16 = vpop.f32.mrb[34].mxu0 }
 0x139   :  { %v5814_v14 = vadd.f32 %v5813_v3, %v5812_v12  ;;  %v5815_v17 = vpop.f32.mrb[34].mxu1  ;;  %v5776_v18 = vpop.f32.mrb[35].mxu0  ;;  %v6495_v3 = vld [vmem:[%s8484_s3 + $0x4] ss:$8 sps:$4 sm:$0xff]  }
 0x13a   :  { %v5816_v19 = vpop.f32.mrb[35].mxu1  ;;  %v3146_v20 = vadd.f32 %v5774_v33, %v7867_v44  ;;  %v5777_v6 = vadd.f32 %v5776_v18, %v5775_v16  ;;  %v6493_v16 = vld [vmem:[%s8484_s3] ss:$8 sps:$4 sm:$0xff]   ;;  %4150 = vmatprep.subr.bf16.mxu1 %v6495_v3  ;;  %v6523_v3 = vld [vmem:[%s8484_s3 + $0x50] ss:$8 sps:$4 sm:$0xff]  }
 0x13b   :  { %v5817_v21 = vadd.f32 %v5816_v19, %v5815_v17  ;;  %v6498_v19 = vld [vmem:[%s8484_s3 + $0x84] ss:$8 sps:$4 sm:$0xff]   ;;  %4151 = vmatpush1.bf16.msra.mxu1 %v6493_v16  ;;  %v6528_v16 = vld [vmem:[%s8484_s3 + $0xd4] ss:$8 sps:$4 sm:$0xff]  }
 0x13c   :  { %v7947_v22 = vadd.f32 %v5814_v14, %v3146_v20  ;;  %v3149_v32 = vadd.f32 %v5777_v6, %v7890_v56  ;;  %4029 = vmatprep.subr.bf16.mxu0 %v6498_v19  ;;  %v6531_v19 = vld [vmem:[%s8484_s3 + $0x64] ss:$8 sps:$4 sm:$0xff]  }
 0x13e   :  { %v7950_v24 = vadd.f32 %v5817_v21, %v3149_v32  ;;  %v5778_v25 = vpop.f32.mrb[36].mxu0  ;;  %v6499_v32 = vld [vmem:[%s8484_s3 + $0x10] ss:$8 sps:$4 sm:$0xff]  }
 0x13f   :  { %v5818_v26 = vpop.f32.mrb[36].mxu1  ;;  %v5779_v27 = vpop.f32.mrb[37].mxu0 }
 0x140   :  { %v5780_v29 = vadd.f32 %v5779_v27, %v5778_v25  ;;  %v5819_v31 = vpop.f32.mrb[37].mxu1  ;;  %v5781_v34 = vpop.f32.mrb[38].mxu0 }
 0x141   :  { %v5820_v35 = vadd.f32 %v5819_v31, %v5818_v26  ;;  %v5821_v36 = vpop.f32.mrb[38].mxu1  ;;  %v5782_v11 = vpop.f32.mrb[39].mxu0 }
 0x142   :  { %v3154_v37 = vadd.f32 %v5780_v29, %v7917_v23  ;;  %v5783_v44 = vadd.f32 %v5782_v11, %v5781_v34  ;;  %v5822_v38 = vpop.f32.mrb[39].mxu1  ;;  %v6501_v29 = vld [vmem:[%s8484_s3 + $0x14] ss:$8 sps:$4 sm:$0xff]  }
 0x143   :  { %v5823_v43 = vadd.f32 %v5822_v38, %v5821_v36  ;;  %4152 = vmatprep.subr.bf16.mxu1 %v6501_v29  ;;  %v6504_v36 = vld [vmem:[%s8484_s3 + $0x94] ss:$8 sps:$4 sm:$0xff]  }
 0x144   :  { %v7953_v39 = vadd.f32 %v5820_v35, %v3154_v37  ;;  %v3157_v56 = vadd.f32 %v5783_v44, %v7920_v28  ;;  %4153 = vmatpush1.bf16.msra.mxu1 %v6499_v32  ;;  %v6507_v37 = vld [vmem:[%s8484_s3 + $0x24] ss:$8 sps:$4 sm:$0xff]  }
 0x145   :  { %4154 = vmatprep.subr.bf16.mxu1 %v6507_v37  ;;  %v6540_v37 = vld [vmem:[%s8484_s3 + $0xf4] ss:$8 sps:$4 sm:$0xff]  }
 0x146   :  { %v7956_v41 = vadd.f32 %v5823_v43, %v3157_v56  ;;  %v5784_v42 = vpop.f32.mrb[40].mxu0  ;;  %v6510_v56 = vld [vmem:[%s8484_s3 + $0xa4] ss:$8 sps:$4 sm:$0xff]  }
 0x147   :  { %v5824_v45 = vpop.f32.mrb[40].mxu1  ;;  %v5785_v46 = vpop.f32.mrb[41].mxu0 }
 0x148   :  { %v5786_v47 = vadd.f32 %v5785_v46, %v5784_v42  ;;  %v5825_v48 = vpop.f32.mrb[41].mxu1  ;;  %v5787_v50 = vpop.f32.mrb[42].mxu0 }
 0x149   :  { %v5826_v60 = vadd.f32 %v5825_v48, %v5824_v45  ;;  %v5827_v51 = vpop.f32.mrb[42].mxu1  ;;  %v5788_v52 = vpop.f32.mrb[43].mxu0 }
 0x14a   :  { %v3162_v23 = vadd.f32 %v5786_v47, %v7935_v49  ;;  %v5789_v53 = vadd.f32 %v5788_v52, %v5787_v50  ;;  %v5828_v55 = vpop.f32.mrb[43].mxu1  ;;  %v6508_v47 = vld [vmem:[%s8484_s3 + $0xa0] ss:$8 sps:$4 sm:$0xff]  }
 0x14b   :  { %v5829_v58 = vadd.f32 %v5828_v55, %v5827_v51  ;;  %v6513_v51 = vld [vmem:[%s8484_s3 + $0x34] ss:$8 sps:$4 sm:$0xff]   ;;  %v6511_v55 = vld [vmem:[%s8484_s3 + $0x30] ss:$8 sps:$4 sm:$0xff]  }
 0x14c   :  { %v7959_v59 = vadd.f32 %v5826_v60, %v3162_v23  ;;  %v3165_v28 = vadd.f32 %v5789_v53, %v7938_v54 }
 0x14e   :  { %v7962_v61 = vadd.f32 %v5829_v58, %v3165_v28  ;;  %v5790_v62 = vpop.f32.mrb[44].mxu0  ;;  %v6516_v28 = vld [vmem:[%s8484_s3 + $0xb4] ss:$8 sps:$4 sm:$0xff]  }
 0x14f   :  { %v5830_v63 = vpop.f32.mrb[44].mxu1  ;;  %v5791_v0 = vpop.f32.mrb[45].mxu0 }
 0x150   :  { %v5831_v1 = vpop.f32.mrb[45].mxu1  ;;  %v5792_v2 = vadd.f32 %v5791_v0, %v5790_v62  ;;  %v5793_v4 = vpop.f32.mrb[46].mxu0  ;;  %v6519_v0 = vld [vmem:[%s8484_s3 + $0x44] ss:$8 sps:$4 sm:$0xff]  }
 0x151   :  { %v5832_v15 = vadd.f32 %v5831_v1, %v5830_v63  ;;  %v5833_v5 = vpop.f32.mrb[46].mxu1  ;;  %v5794_v7 = vpop.f32.mrb[47].mxu0 }
 0x152   :  { %v5834_v8 = vpop.f32.mrb[47].mxu1  ;;  %v3170_v49 = vadd.f32 %v5792_v2, %v7941_v10  ;;  %v5795_v9 = vadd.f32 %v5794_v7, %v5793_v4  ;;  %v6517_v2 = vld [vmem:[%s8484_s3 + $0x40] ss:$8 sps:$4 sm:$0xff]  }
 0x153   :  { %v5835_v30 = vadd.f32 %v5834_v8, %v5833_v5  ;;  %v6520_v5 = vld [vmem:[%s8484_s3 + $0xc0] ss:$8 sps:$4 sm:$0xff]  }
 0x154   :  { %v7965_v57 = vadd.f32 %v5832_v15, %v3170_v49  ;;  %v3173_v54 = vadd.f32 %v5795_v9, %v7944_v40  ;;  %v6496_v40 = vld [vmem:[%s8484_s3 + $0x80] ss:$8 sps:$4 sm:$0xff]   ;;  %v6525_v49 = vld [vmem:[%s8484_s3 + $0x54] ss:$8 sps:$4 sm:$0xff]  }
 0x155   :  { %4030 = vmatpush1.bf16.msra.mxu0 %v6496_v40  ;;  %v6526_v40 = vld [vmem:[%s8484_s3 + $0xd0] ss:$8 sps:$4 sm:$0xff]  }
 0x156   :  { %v7968_v12 = vadd.f32 %v5835_v30, %v3173_v54  ;;  %v5852_v13 = vpop.f32.mrb[48].mxu0  ;;  %4031 = vmatprep.subr.bf16.mxu0 %v6504_v36 }
 0x157   :  { %v5892_v33 = vpop.f32.mrb[48].mxu1  ;;  %v5853_v14 = vpop.f32.mrb[49].mxu0 }
 0x158   :  { %v5854_v10 = vadd.f32 %v5853_v14, %v5852_v13  ;;  %v5893_v17 = vpop.f32.mrb[49].mxu1  ;;  %v5855_v18 = vpop.f32.mrb[50].mxu0 }
 0x159   :  { %v5894_v20 = vadd.f32 %v5893_v17, %v5892_v33  ;;  %v5895_v6 = vpop.f32.mrb[50].mxu1  ;;  %v5856_v21 = vpop.f32.mrb[51].mxu0 }
 0x15a   :  { %v3276_v25 = vadd.f32 %v5854_v10, %v7947_v22  ;;  %v5857_v26 = vadd.f32 %v5856_v21, %v5855_v18  ;;  %v5896_v27 = vpop.f32.mrb[51].mxu1  ;;  %v6502_v22 = vld [vmem:[%s8484_s3 + $0x90] ss:$8 sps:$4 sm:$0xff]   ;;  %v6534_v21 = vld [vmem:[%s8484_s3 + $0xe4] ss:$8 sps:$4 sm:$0xff]  }
 0x15b   :  { %v5897_v31 = vadd.f32 %v5896_v27, %v5895_v6  ;;  %4032 = vmatpush1.bf16.msra.mxu0 %v6502_v22 }
 0x15c   :  { %v7989_v34 = vadd.f32 %v5894_v20, %v3276_v25  ;;  %v3279_v35 = vadd.f32 %v5857_v26, %v7950_v24  ;;  %v6505_v24 = vld [vmem:[%s8484_s3 + $0x20] ss:$8 sps:$4 sm:$0xff]   ;;  %4033 = vmatprep.subr.bf16.mxu0 %v6510_v56 }
 0x15d   :  { %4155 = vmatpush1.bf16.msra.mxu1 %v6505_v24  ;;  %v6532_v25 = vld [vmem:[%s8484_s3 + $0xe0] ss:$8 sps:$4 sm:$0xff]  }
 0x15e   :  { %v7998_v11 = vadd.f32 %v5897_v31, %v3279_v35  ;;  %v5858_v44 = vpop.f32.mrb[52].mxu0  ;;  %4156 = vmatprep.subr.bf16.mxu1 %v6513_v51  ;;  %v6535_v31 = vld [vmem:[%s8484_s3 + $0x70] ss:$8 sps:$4 sm:$0xff]  }
 0x15f   :  { %v5898_v38 = vpop.f32.mrb[52].mxu1  ;;  %v5859_v43 = vpop.f32.mrb[53].mxu0  ;;  %4034 = vmatpush1.bf16.msra.mxu0 %v6508_v47 }
 0x160   :  { %v5860_v42 = vadd.f32 %v5859_v43, %v5858_v44  ;;  %v5899_v45 = vpop.f32.mrb[53].mxu1  ;;  %v5861_v46 = vpop.f32.mrb[54].mxu0  ;;  %4035 = vmatprep.subr.bf16.mxu0 %v6516_v28  ;;  %v6538_v43 = vld [vmem:[%s8484_s3 + $0xf0] ss:$8 sps:$4 sm:$0xff]  }
 0x161   :  { %v5900_v48 = vadd.f32 %v5899_v45, %v5898_v38  ;;  %v5901_v50 = vpop.f32.mrb[54].mxu1  ;;  %v5862_v60 = vpop.f32.mrb[55].mxu0  ;;  %4157 = vmatpush1.bf16.msra.mxu1 %v6511_v55 }
 0x162   :  { %v3284_v52 = vadd.f32 %v5860_v42, %v7953_v39  ;;  %v5863_v23 = vadd.f32 %v5862_v60, %v5861_v46  ;;  %v5902_v53 = vpop.f32.mrb[55].mxu1  ;;  %v6514_v39 = vld [vmem:[%s8484_s3 + $0xb0] ss:$8 sps:$4 sm:$0xff]   ;;  %4158 = vmatprep.subr.bf16.mxu1 %v6519_v0  ;;  %v6543_v46 = vld [vmem:[%s8484_s3 + $0x184] ss:$8 sps:$4 sm:$0xff]   ;;  %v6689_v60 = vmov 0  }
 0x163   :  { %v5903_v58 = vadd.f32 %v5902_v53, %v5901_v50  ;;  %4036 = vmatpush1.bf16.msra.mxu0 %v6514_v39  ;;  %4182 = vmatprep.mubr.bf16.mxu1 %v6689_v60 }
 0x164   :  { %v8022_v62 = vadd.f32 %v5900_v48, %v3284_v52  ;;  %v3287_v63 = vadd.f32 %v5863_v23, %v7956_v41  ;;  %v6522_v41 = vld [vmem:[%s8484_s3 + $0xc4] ss:$8 sps:$4 sm:$0xff]   ;;  %4061 = vmatprep.mubr.bf16.mxu0 %v6689_v60 }
 0x165   :  { %4159 = vmatpush1.bf16.msra.mxu1 %v6517_v2  ;;  %4037 = vmatprep.subr.bf16.mxu0 %v6522_v41 }
 0x166   :  { %v8031_v1 = vadd.f32 %v5903_v58, %v3287_v63  ;;  %v5864_v15 = vpop.f32.mrb[56].mxu0  ;;  %4160 = vmatprep.subr.bf16.mxu1 %v6525_v49 }
 0x167   :  { %v5904_v4 = vpop.f32.mrb[56].mxu1  ;;  %v5865_v7 = vpop.f32.mrb[57].mxu0  ;;  %4038 = vmatpush1.bf16.msra.mxu0 %v6520_v5 }
 0x168   :  { %v5905_v8 = vpop.f32.mrb[57].mxu1  ;;  %v5866_v9 = vadd.f32 %v5865_v7, %v5864_v15  ;;  %v5867_v54 = vpop.f32.mrb[58].mxu0  ;;  %4039 = vmatprep.subr.bf16.mxu0 %v6528_v16 }
 0x169   :  { %v5906_v30 = vadd.f32 %v5905_v8, %v5904_v4  ;;  %v5907_v13 = vpop.f32.mrb[58].mxu1  ;;  %v5868_v33 = vpop.f32.mrb[59].mxu0  ;;  %4161 = vmatpush1.bf16.msra.mxu1 %v6523_v3 }
 0x16a   :  { %v5908_v14 = vpop.f32.mrb[59].mxu1  ;;  %v3292_v10 = vadd.f32 %v5866_v9, %v7959_v59  ;;  %v5869_v17 = vadd.f32 %v5868_v33, %v5867_v54  ;;  %v6529_v59 = vld [vmem:[%s8484_s3 + $0x60] ss:$8 sps:$4 sm:$0xff]   ;;  %4162 = vmatprep.subr.bf16.mxu1 %v6531_v19 }
 0x16b   :  { %v5909_v18 = vadd.f32 %v5908_v14, %v5907_v13  ;;  %4040 = vmatpush1.bf16.msra.mxu0 %v6526_v40 }
 0x16c   :  { %v8058_v20 = vadd.f32 %v5906_v30, %v3292_v10  ;;  %v3295_v6 = vadd.f32 %v5869_v17, %v7962_v61  ;;  %4041 = vmatprep.subr.bf16.mxu0 %v6534_v21  ;;  %v6537_v61 = vld [vmem:[%s8484_s3 + $0x74] ss:$8 sps:$4 sm:$0xff]  }
 0x16d   :  { %4163 = vmatpush1.bf16.msra.mxu1 %v6529_v59 }
 0x16e   :  { %v8067_v32 = vadd.f32 %v5909_v18, %v3295_v6  ;;  %v5870_v26 = vpop.f32.mrb[60].mxu0  ;;  %4164 = vmatprep.subr.bf16.mxu1 %v6537_v61 }
 0x16f   :  { %v5910_v27 = vpop.f32.mrb[60].mxu1  ;;  %v5871_v29 = vpop.f32.mrb[61].mxu0  ;;  %4042 = vmatpush1.bf16.msra.mxu0 %v6532_v25 }
 0x170   :  { %v5872_v35 = vadd.f32 %v5871_v29, %v5870_v26  ;;  %v5911_v36 = vpop.f32.mrb[61].mxu1  ;;  %v5873_v22 = vpop.f32.mrb[62].mxu0  ;;  %4043 = vmatprep.subr.bf16.mxu0 %v6540_v37 }
 0x171   :  { %v5912_v44 = vadd.f32 %v5911_v36, %v5910_v27  ;;  %v5913_v24 = vpop.f32.mrb[62].mxu1  ;;  %v5874_v38 = vpop.f32.mrb[63].mxu0  ;;  %4165 = vmatpush1.bf16.msra.mxu1 %v6535_v31 }
 0x172   :  { %v3300_v56 = vadd.f32 %v5872_v35, %v7965_v57  ;;  %v5875_v42 = vadd.f32 %v5874_v38, %v5873_v22  ;;  %v5914_v45 = vpop.f32.mrb[63].mxu1  ;;  %4428 = vmatprep.subr.bf16.mxu1 %v6543_v46  ;;  %v6546_v57 = vld [vmem:[%s8484_s3 + $0x104] ss:$8 sps:$4 sm:$0xff]  }
 0x173   :  { %v5915_v47 = vadd.f32 %v5914_v45, %v5913_v24  ;;  %4044 = vmatpush1.bf16.msra.mxu0 %v6538_v43 }
 0x174   :  { %v8088_v48 = vadd.f32 %v5912_v44, %v3300_v56  ;;  %v3303_v50 = vadd.f32 %v5875_v42, %v7968_v12  ;;  %4288 = vmatprep.subr.bf16.mxu0 %v6546_v57 }
 0x176   :  { %v8096_v51 = vadd.f32 %v5915_v47, %v3303_v50  ;;  %v5932_v52 = vpop.f32.mrb[64].mxu0 }
 0x177   :  { %v5972_v23 = vpop.f32.mrb[64].mxu1  ;;  %v5933_v53 = vpop.f32.mrb[65].mxu0 }
 0x178   :  { %v5934_v55 = vadd.f32 %v5933_v53, %v5932_v52  ;;  %v5973_v58 = vpop.f32.mrb[65].mxu1  ;;  %v5935_v28 = vpop.f32.mrb[66].mxu0 }
 0x179   :  { %v5974_v12 = vadd.f32 %v5973_v58, %v5972_v23  ;;  %v5975_v63 = vpop.f32.mrb[66].mxu1  ;;  %v5936_v39 = vpop.f32.mrb[67].mxu0 }
 0x17a   :  { %v3406_v0 = vadd.f32 %v5934_v55, %v7989_v34  ;;  %v5937_v2 = vadd.f32 %v5936_v39, %v5935_v28  ;;  %v5976_v41 = vpop.f32.mrb[67].mxu1 }
 0x17b   :  { %v5977_v15 = vadd.f32 %v5976_v41, %v5975_v63 }
 0x17c   :  { %v3471_v4 = vadd.f32 %v5974_v12, %v3406_v0  ;;  %v3409_v5 = vadd.f32 %v5937_v2, %v7998_v11 }
 0x17e   :  { %v8100_v7 = vadd.f32 %v5977_v15, %v3409_v5  ;;  %v5938_v8 = vpop.f32.mrb[68].mxu0 }
 0x17f   :  { %v5978_v49 = vpop.f32.mrb[68].mxu1  ;;  %v5939_v9 = vpop.f32.mrb[69].mxu0 }
 0x180   :  { %v5979_v30 = vpop.f32.mrb[69].mxu1  ;;  %v5940_v54 = vadd.f32 %v5939_v9, %v5938_v8  ;;  %v5941_v3 = vpop.f32.mrb[70].mxu0 }
 0x181   :  { %v5980_v13 = vadd.f32 %v5979_v30, %v5978_v49  ;;  %v5981_v33 = vpop.f32.mrb[70].mxu1  ;;  %v5942_v14 = vpop.f32.mrb[71].mxu0 }
 0x182   :  { %v5982_v16 = vpop.f32.mrb[71].mxu1  ;;  %v3414_v34 = vadd.f32 %v5940_v54, %v8022_v62  ;;  %v5943_v10 = vadd.f32 %v5942_v14, %v5941_v3 }
 0x183   :  { %v5983_v17 = vadd.f32 %v5982_v16, %v5981_v33 }
 0x184   :  { %v3479_v18 = vadd.f32 %v5980_v13, %v3414_v34  ;;  %v3417_v40 = vadd.f32 %v5943_v10, %v8031_v1 }
 0x186   :  { %v8104_v11 = vadd.f32 %v5983_v17, %v3417_v40  ;;  %v5944_v19 = vpop.f32.mrb[72].mxu0 }
 0x187   :  { %v5984_v6 = vpop.f32.mrb[72].mxu1  ;;  %v5945_v59 = vpop.f32.mrb[73].mxu0 }
 0x188   :  { %v5946_v21 = vadd.f32 %v5945_v59, %v5944_v19  ;;  %v5985_v25 = vpop.f32.mrb[73].mxu1  ;;  %v5947_v26 = vpop.f32.mrb[74].mxu0 }
 0x189   :  { %v5986_v61 = vadd.f32 %v5985_v25, %v5984_v6  ;;  %v5987_v27 = vpop.f32.mrb[74].mxu1  ;;  %v5948_v29 = vpop.f32.mrb[75].mxu0 }
 0x18a   :  { %v3422_v31 = vadd.f32 %v5946_v21, %v8058_v20  ;;  %v5949_v35 = vadd.f32 %v5948_v29, %v5947_v26  ;;  %v5988_v62 = vpop.f32.mrb[75].mxu1 }
 0x18b   :  { %v5989_v36 = vadd.f32 %v5988_v62, %v5987_v27 }
 0x18c   :  { %v3487_v22 = vadd.f32 %v5986_v61, %v3422_v31  ;;  %v3425_v37 = vadd.f32 %v5949_v35, %v8067_v32 }
 0x18e   :  { %v8108_v1 = vadd.f32 %v5989_v36, %v3425_v37  ;;  %v5950_v44 = vpop.f32.mrb[76].mxu0 }
 0x18f   :  { %v5990_v24 = vpop.f32.mrb[76].mxu1  ;;  %v5951_v38 = vpop.f32.mrb[77].mxu0 }
 0x190   :  { %v5952_v43 = vadd.f32 %v5951_v38, %v5950_v44  ;;  %v5991_v56 = vpop.f32.mrb[77].mxu1  ;;  %v5953_v42 = vpop.f32.mrb[78].mxu0 }
 0x191   :  { %v5992_v45 = vadd.f32 %v5991_v56, %v5990_v24  ;;  %v5993_v46 = vpop.f32.mrb[78].mxu1  ;;  %v5954_v47 = vpop.f32.mrb[79].mxu0 }
 0x192   :  { %v3430_v50 = vadd.f32 %v5952_v43, %v8088_v48  ;;  %v5955_v20 = vadd.f32 %v5954_v47, %v5953_v42  ;;  %v5994_v57 = vpop.f32.mrb[79].mxu1 }
 0x193   :  { %v5995_v52 = vadd.f32 %v5994_v57, %v5993_v46 }
 0x194   :  { %v3495_v23 = vadd.f32 %v5992_v45, %v3430_v50  ;;  %v3433_v53 = vadd.f32 %v5955_v20, %v8096_v51 }
 0x196   :  { %v8112_v32 = vadd.f32 %v5995_v52, %v3433_v53  ;;  %v6012_v55 = vpop.f32.mrb[80].mxu0 }
 0x197   :  { %v6052_v58 = vpop.f32.mrb[80].mxu1  ;;  %v6013_v28 = vpop.f32.mrb[81].mxu0 }
 0x198   :  { %v6053_v12 = vpop.f32.mrb[81].mxu1  ;;  %v6014_v63 = vadd.f32 %v6013_v28, %v6012_v55  ;;  %v6015_v0 = vpop.f32.mrb[82].mxu0 }
 0x199   :  { %v6054_v39 = vadd.f32 %v6053_v12, %v6052_v58  ;;  %v6055_v2 = vpop.f32.mrb[82].mxu1  ;;  %v6016_v41 = vpop.f32.mrb[83].mxu0 }
 0x19a   :  { %v6056_v15 = vpop.f32.mrb[83].mxu1  ;;  %v3536_v5 = vadd.f32 %v6014_v63, %v3471_v4  ;;  %v6017_v48 = vadd.f32 %v6016_v41, %v6015_v0 }
 0x19b   :  { %v6057_v8 = vadd.f32 %v6056_v15, %v6055_v2 }
 0x19c   :  { %v3601_v49 = vadd.f32 %v6054_v39, %v3536_v5  ;;  %v3539_v9 = vadd.f32 %v6017_v48, %v8100_v7 }
 0x19e   :  { %v8115_v30 = vadd.f32 %v6057_v8, %v3539_v9  ;;  %v6018_v51 = vpop.f32.mrb[84].mxu0 }
 0x19f   :  { %v6058_v54 = vpop.f32.mrb[84].mxu1  ;;  %v6019_v13 = vpop.f32.mrb[85].mxu0 }
 0x1a0   :  { %v6020_v3 = vadd.f32 %v6019_v13, %v6018_v51  ;;  %v6059_v33 = vpop.f32.mrb[85].mxu1  ;;  %v6021_v14 = vpop.f32.mrb[86].mxu0 }
 0x1a1   :  { %v6060_v16 = vadd.f32 %v6059_v33, %v6058_v54  ;;  %v6061_v34 = vpop.f32.mrb[86].mxu1  ;;  %v6022_v10 = vpop.f32.mrb[87].mxu0 }
 0x1a2   :  { %v3544_v17 = vadd.f32 %v6020_v3, %v3479_v18  ;;  %v6023_v40 = vadd.f32 %v6022_v10, %v6021_v14  ;;  %v6062_v19 = vpop.f32.mrb[87].mxu1 }
 0x1a3   :  { %v6063_v4 = vadd.f32 %v6062_v19, %v6061_v34 }
 0x1a4   :  { %v3609_v6 = vadd.f32 %v6060_v16, %v3544_v17  ;;  %v3547_v59 = vadd.f32 %v6023_v40, %v8104_v11 }
 0x1a6   :  { %v8118_v21 = vadd.f32 %v6063_v4, %v3547_v59  ;;  %v6024_v7 = vpop.f32.mrb[88].mxu0 }
 0x1a7   :  { %v6064_v25 = vpop.f32.mrb[88].mxu1  ;;  %v6025_v26 = vpop.f32.mrb[89].mxu0 }
 0x1a8   :  { %v6026_v61 = vadd.f32 %v6025_v26, %v6024_v7  ;;  %v6065_v27 = vpop.f32.mrb[89].mxu1  ;;  %v6027_v29 = vpop.f32.mrb[90].mxu0 }
 0x1a9   :  { %v6066_v31 = vadd.f32 %v6065_v27, %v6064_v25  ;;  %v6067_v35 = vpop.f32.mrb[90].mxu1  ;;  %v6028_v62 = vpop.f32.mrb[91].mxu0 }
 0x1aa   :  { %v3552_v36 = vadd.f32 %v6026_v61, %v3487_v22  ;;  %v6029_v37 = vadd.f32 %v6028_v62, %v6027_v29  ;;  %v6068_v18 = vpop.f32.mrb[91].mxu1 }
 0x1ab   :  { %v6069_v44 = vadd.f32 %v6068_v18, %v6067_v35 }
 0x1ac   :  { %v3617_v24 = vadd.f32 %v6066_v31, %v3552_v36  ;;  %v3555_v38 = vadd.f32 %v6029_v37, %v8108_v1 }
 0x1ae   :  { %v8121_v43 = vadd.f32 %v6069_v44, %v3555_v38  ;;  %v6030_v11 = vpop.f32.mrb[92].mxu0 }
 0x1af   :  { %v6070_v56 = vpop.f32.mrb[92].mxu1  ;;  %v6031_v42 = vpop.f32.mrb[93].mxu0 }
 0x1b0   :  { %v6071_v45 = vpop.f32.mrb[93].mxu1  ;;  %v6032_v46 = vadd.f32 %v6031_v42, %v6030_v11  ;;  %v6033_v50 = vpop.f32.mrb[94].mxu0 }
 0x1b1   :  { %v6072_v47 = vadd.f32 %v6071_v45, %v6070_v56  ;;  %v6073_v20 = vpop.f32.mrb[94].mxu1  ;;  %v6034_v57 = vpop.f32.mrb[95].mxu0 }
 0x1b2   :  { %v6074_v52 = vpop.f32.mrb[95].mxu1  ;;  %v3560_v53 = vadd.f32 %v6032_v46, %v3495_v23  ;;  %v6035_v22 = vadd.f32 %v6034_v57, %v6033_v50 }
 0x1b3   :  { %v6075_v55 = vadd.f32 %v6074_v52, %v6073_v20 }
 0x1b4   :  { %v3625_v58 = vadd.f32 %v6072_v47, %v3560_v53  ;;  %v3563_v28 = vadd.f32 %v6035_v22, %v8112_v32 }
 0x1b6   :  { %v8124_v12 = vadd.f32 %v6075_v55, %v3563_v28  ;;  %v6092_v1 = vpop.f32.mrb[96].mxu0 }
 0x1b7   :  { %v6132_v63 = vpop.f32.mrb[96].mxu1  ;;  %v6093_v39 = vpop.f32.mrb[97].mxu0 }
 0x1b8   :  { %v6094_v0 = vadd.f32 %v6093_v39, %v6092_v1  ;;  %v6133_v2 = vpop.f32.mrb[97].mxu1  ;;  %v6095_v41 = vpop.f32.mrb[98].mxu0 }
 0x1b9   :  { %v6134_v15 = vadd.f32 %v6133_v2, %v6132_v63  ;;  %v6135_v5 = vpop.f32.mrb[98].mxu1  ;;  %v6096_v48 = vpop.f32.mrb[99].mxu0 }
 0x1ba   :  { %v3666_v8 = vadd.f32 %v6094_v0, %v3601_v49  ;;  %v6097_v9 = vadd.f32 %v6096_v48, %v6095_v41  ;;  %v6136_v51 = vpop.f32.mrb[99].mxu1 }
 0x1bb   :  { %v6137_v23 = vadd.f32 %v6136_v51, %v6135_v5 }
 0x1bc   :  { %v3731_v54 = vadd.f32 %v6134_v15, %v3666_v8  ;;  %v3669_v13 = vadd.f32 %v6097_v9, %v8115_v30 }
 0x1be   :  { %v8127_v3 = vadd.f32 %v6137_v23, %v3669_v13  ;;  %v6098_v32 = vpop.f32.mrb[100].mxu0 }
 0x1bf   :  { %v6138_v33 = vpop.f32.mrb[100].mxu1  ;;  %v6099_v14 = vpop.f32.mrb[101].mxu0 }
 0x1c0   :  { %v6100_v16 = vadd.f32 %v6099_v14, %v6098_v32  ;;  %v6139_v34 = vpop.f32.mrb[101].mxu1  ;;  %v6101_v10 = vpop.f32.mrb[102].mxu0 }
 0x1c1   :  { %v6140_v17 = vadd.f32 %v6139_v34, %v6138_v33  ;;  %v6141_v40 = vpop.f32.mrb[102].mxu1  ;;  %v6102_v19 = vpop.f32.mrb[103].mxu0 }
 0x1c2   :  { %v3674_v4 = vadd.f32 %v6100_v16, %v3609_v6  ;;  %v6103_v59 = vadd.f32 %v6102_v19, %v6101_v10  ;;  %v6142_v49 = vpop.f32.mrb[103].mxu1  ;;  %v6541_v19 = vld [vmem:[%s8484_s3 + $0x180] ss:$8 sps:$4 sm:$0xff]  }
 0x1c3   :  { %v6143_v7 = vadd.f32 %v6142_v49, %v6141_v40 }
 0x1c4   :  { %v8129_v25 = vadd.f32 %v6140_v17, %v3674_v4  ;;  %v3677_v26 = vadd.f32 %v6103_v59, %v8118_v21 }
 0x1c6   :  { %v8132_v30 = vadd.f32 %v6143_v7, %v3677_v26 }
 0x1d2   :  { %v6144_v27 = vpop.f32.mrb[104].mxu1 }
 0x1d3   :  { %v6145_v31 = vpop.f32.mrb[105].mxu1 }
 0x1d4   :  { %v6146_v62 = vadd.f32 %v6145_v31, %v6144_v27  ;;  %v6147_v37 = vpop.f32.mrb[106].mxu1 }
 0x1d5   :  { %v6104_v61 = vpop.f32.mrb[104].mxu0  ;;  %v6148_v44 = vpop.f32.mrb[107].mxu1 }
 0x1d6   :  { %v6105_v29 = vpop.f32.mrb[105].mxu0  ;;  %v6149_v11 = vadd.f32 %v6148_v44, %v6147_v37  ;;  %v6544_v37 = vld [vmem:[%s8484_s3 + $0x100] ss:$8 sps:$4 sm:$0xff]   ;;  %v6552_v44 = vld [vmem:[%s8484_s3 + $0x114] ss:$8 sps:$4 sm:$0xff]  }
 0x1d7   :  { %v6106_v35 = vadd.f32 %v6105_v29, %v6104_v61  ;;  %v6107_v36 = vpop.f32.mrb[106].mxu0  ;;  %v6549_v29 = vld [vmem:[%s8484_s3 + $0x194] ss:$8 sps:$4 sm:$0xff]  }
 0x1d8   :  { %v6108_v18 = vpop.f32.mrb[107].mxu0 }
 0x1d9   :  { %v3682_v6 = vadd.f32 %v6106_v35, %v3617_v24  ;;  %v6109_v38 = vadd.f32 %v6108_v18, %v6107_v36 }
 0x1db   :  { %v8134_v56 = vadd.f32 %v6146_v62, %v3682_v6  ;;  %v3685_v42 = vadd.f32 %v6109_v38, %v8121_v43 }
 0x1dd   :  { %v8137_v21 = vadd.f32 %v6149_v11, %v3685_v42  ;;  %v6555_v11 = vld [vmem:[%s8484_s3 + $0x1a4] ss:$8 sps:$4 sm:$0xff]  }
 0x1df   :  { %v6110_v45 = vpop.f32.mrb[108].mxu0 }
 0x1e0   :  { %v6150_v46 = vpop.f32.mrb[108].mxu1  ;;  %v6111_v47 = vpop.f32.mrb[109].mxu0 }
 0x1e1   :  { %v6112_v50 = vadd.f32 %v6111_v47, %v6110_v45  ;;  %v6151_v20 = vpop.f32.mrb[109].mxu1  ;;  %v6113_v57 = vpop.f32.mrb[110].mxu0 }
 0x1e2   :  { %v6152_v52 = vadd.f32 %v6151_v20, %v6150_v46  ;;  %v6153_v53 = vpop.f32.mrb[110].mxu1  ;;  %v6114_v22 = vpop.f32.mrb[111].mxu0  ;;  %v6550_v46 = vld [vmem:[%s8484_s3 + $0x110] ss:$8 sps:$4 sm:$0xff]   ;;  %v6558_v20 = vld [vmem:[%s8484_s3 + $0x124] ss:$8 sps:$4 sm:$0xff]  }
 0x1e3   :  { %v3690_v55 = vadd.f32 %v6112_v50, %v3625_v58  ;;  %v6115_v28 = vadd.f32 %v6114_v22, %v6113_v57  ;;  %v6154_v24 = vpop.f32.mrb[111].mxu1  ;;  %v6553_v22 = vld [vmem:[%s8484_s3 + $0x1a0] ss:$8 sps:$4 sm:$0xff]  }
 0x1e4   :  { %v6155_v1 = vadd.f32 %v6154_v24, %v6153_v53 }
 0x1e5   :  { %v8139_v63 = vadd.f32 %v6152_v52, %v3690_v55  ;;  %v3693_v39 = vadd.f32 %v6115_v28, %v8124_v12 }
 0x1e7   :  { %v8142_v43 = vadd.f32 %v6155_v1, %v3693_v39  ;;  %v6561_v1 = vld [vmem:[%s8484_s3 + $0x1b4] ss:$8 sps:$4 sm:$0xff]  }
 0x1e9   :  { %v6172_v0 = vpop.f32.mrb[112].mxu0  ;;  %v6212_v2 = vpop.f32.mrb[112].mxu1 }
 0x1ea   :  { %v6173_v41 = vpop.f32.mrb[113].mxu0  ;;  %v6213_v15 = vpop.f32.mrb[113].mxu1 }
 0x1eb   :  { %v6174_v5 = vadd.f32 %v6173_v41, %v6172_v0  ;;  %v6214_v48 = vadd.f32 %v6213_v15, %v6212_v2  ;;  %v6175_v8 = vpop.f32.mrb[114].mxu0  ;;  %v6215_v9 = vpop.f32.mrb[114].mxu1  ;;  %v6556_v41 = vld [vmem:[%s8484_s3 + $0x120] ss:$8 sps:$4 sm:$0xff]   ;;  %v6564_v15 = vld [vmem:[%s8484_s3 + $0x134] ss:$8 sps:$4 sm:$0xff]  }
 0x1ec   :  { %v6176_v51 = vpop.f32.mrb[115].mxu0  ;;  %v6216_v23 = vpop.f32.mrb[115].mxu1 }
 0x1ed   :  { %v3796_v58 = vadd.f32 %v6174_v5, %v3731_v54  ;;  %v6177_v13 = vadd.f32 %v6176_v51, %v6175_v8  ;;  %v6217_v32 = vadd.f32 %v6216_v23, %v6215_v9  ;;  %v6567_v8 = vld [vmem:[%s8484_s3 + $0x1c4] ss:$8 sps:$4 sm:$0xff]  }
 0x1ef   :  { %v3861_v33 = vadd.f32 %v6214_v48, %v3796_v58  ;;  %v3799_v14 = vadd.f32 %v6177_v13, %v8127_v3 }
 0x1f1   :  { %vm3891_vm0 = vcmp.gt.f32.partialorder %v3861_v33, 0.0  ;;  %v3899_v12 = vmul.f32 0.2, %v3861_v33  ;;  %v3864_v16 = vadd.f32 %v6217_v32, %v3799_v14  ;;  %v6178_v34 = vpop.f32.mrb[116].mxu0  ;;  %v6218_v10 = vpop.f32.mrb[116].mxu1 }
 0x1f2   :  { %v6179_v17 = vpop.f32.mrb[117].mxu0  ;;  %v6219_v40 = vpop.f32.mrb[117].mxu1  ;;  %v6570_v32 = vld [vmem:[%s8484_s3 + $0x144] ss:$8 sps:$4 sm:$0xff]  }
 0x1f3   :  { %v3907_v4 = vsel %vm3891_vm0, %v3861_v33, %v3899_v12  ;;  %vm3892_vm1 = vcmp.gt.f32.partialorder %v3864_v16, 0.0  ;;  %v3900_v59 = vmul.f32 0.2, %v3864_v16  ;;  %v6180_v54 = vadd.f32 %v6179_v17, %v6178_v34  ;;  %v6181_v49 = vpop.f32.mrb[118].mxu0  ;;  %v6221_v7 = vpop.f32.mrb[118].mxu1 }
 0x1f4   :  { %v3915_v26 = vpack.c.bf16 %v3907_v4, %v3907_v4  ;;  %v6182_v61 = vpop.f32.mrb[119].mxu0  ;;  %v6220_v3 = vadd.f32 %v6219_v40, %v6218_v10  ;;  %v6222_v27 = vpop.f32.mrb[119].mxu1  ;;  %v6573_v40 = vld [vmem:[%s8484_s3 + $0x1d4] ss:$8 sps:$4 sm:$0xff]  }
 0x1f5   :  { %v3908_v31 = vsel %vm3892_vm1, %v3864_v16, %v3900_v59  ;;  %v3804_v35 = vadd.f32 %v6180_v54, %v8129_v25  ;;  %v6183_v62 = vadd.f32 %v6182_v61, %v6181_v49  ;;  %v6223_v36 = vadd.f32 %v6222_v27, %v6221_v7  ;;  %v6547_v25 = vld [vmem:[%s8484_s3 + $0x190] ss:$8 sps:$4 sm:$0xff]   ;;  %v6565_v16 = vld [vmem:[%s8484_s3 + $0x1c0] ss:$8 sps:$4 sm:$0xff]   ;;  %v6576_v49 = vld [vmem:[%s8484_s3 + $0x154] ss:$8 sps:$4 sm:$0xff]  }
 0x1f6   :  { %v3932_v18 = vpack.c.bf16 %v3908_v31, %v3908_v31  ;;  %4183 = vmatmul.mubr.bf16.vlgmr.msra.gmra.mrb[128].mxu1 %v3915_v26  ;;  %v6568_v54 = vld [vmem:[%s8484_s3 + $0x140] ss:$8 sps:$4 sm:$0xff]   ;;  %v6579_v61 = vld [vmem:[%s8484_s3 + $0x1e4] ss:$8 sps:$4 sm:$0xff]   ;;  %v6574_v27 = vld [vmem:[%s8484_s3 + $0x150] ss:$8 sps:$4 sm:$0xff]  }
 0x1f7   :  { %v3807_v6 = vadd.f32 %v6183_v62, %v8132_v30  ;;  %v8159_v38 = vadd.f32 %v6220_v3, %v3804_v35  ;;  %4429 = vmatpush1.bf16.msra.mxu1 %v6541_v19  ;;  %4460 = vmatprep.mubr.bf16.mxu1 %v6689_v60  ;;  %v6585_v31 = vld [vmem:[%s8484_s3 + $0x1f4] ss:$8 sps:$4 sm:$0xff]   ;;  %v6580_v62 = vld [vmem:[%s8484_s3 + $0x160] ss:$8 sps:$4 sm:$0xff]  }
 0x1f8   :  { %4062 = vmatmul.mubr.bf16.vlgmr.msra.gmra.mrb[128].mxu0 %v3932_v18  ;;  %4430 = vmatprep.subr.bf16.mxu1 %v6549_v29  ;;  %v6577_v29 = vld [vmem:[%s8484_s3 + $0x1e0] ss:$8 sps:$4 sm:$0xff]   ;;  %v6583_v18 = vld [vmem:[%s8484_s3 + $0x1f0] ss:$8 sps:$4 sm:$0xff]  }
 0x1f9   :  { %v8168_v42 = vadd.f32 %v6223_v36, %v3807_v6  ;;  %4289 = vmatpush1.bf16.msra.mxu0 %v6544_v37  ;;  %v6224_v30 = vpop.f32.mrb[120].mxu1  ;;  %4320 = vmatprep.mubr.bf16.mxu0 %v6689_v60  ;;  %v6588_v36 = vld [vmem:[%s8484_s3 + $0x174] ss:$8 sps:$4 sm:$0xff]   ;;  %v3901_v37 = vmul.f32 0.2, %v8159_v38  ;;  %vm3893_vm3 = vcmp.gt.f32.partialorder %v8159_v38, 0.0 }
 0x1fa   :  { %4290 = vmatprep.subr.bf16.mxu0 %v6552_v44  ;;  %v6225_v50 = vpop.f32.mrb[121].mxu1  ;;  %v6591_v44 = vld [vmem:[%s8484_s3 + $0x284] ss:$8 sps:$4 sm:$0xff]  }
 0x1fb   :  { %4431 = vmatpush1.bf16.msra.mxu1 %v6547_v25  ;;  %v6227_v53 = vpop.f32.mrb[122].mxu1  ;;  %v6226_v28 = vadd.f32 %v6225_v50, %v6224_v30  ;;  %v3902_v35 = vmul.f32 0.2, %v8168_v42  ;;  %vm3894_vm2 = vcmp.gt.f32.partialorder %v8168_v42, 0.0  ;;  %v6586_v25 = vld [vmem:[%s8484_s3 + $0x170] ss:$8 sps:$4 sm:$0xff]  }
 0x1fc   :  { %4432 = vmatprep.subr.bf16.mxu1 %v6555_v11  ;;  %v6228_v24 = vpop.f32.mrb[123].mxu1  ;;  %v6594_v11 = vld [vmem:[%s8484_s3 + $0x204] ss:$8 sps:$4 sm:$0xff]   ;;  %v6589_v30 = vld [vmem:[%s8484_s3 + $0x280] ss:$8 sps:$4 sm:$0xff]  }
 0x1fd   :  { %4291 = vmatpush1.bf16.msra.mxu0 %v6550_v46  ;;  %v6229_v2 = vadd.f32 %v6228_v24, %v6227_v53  ;;  %v3910_v6 = vsel %vm3894_vm2, %v8168_v42, %v3902_v35  ;;  %v6597_v42 = vld [vmem:[%s8484_s3 + $0x294] ss:$8 sps:$4 sm:$0xff]   ;;  %v6606_v53 = vld [vmem:[%s8484_s3 + $0x224] ss:$8 sps:$4 sm:$0xff]   ;;  %v6655_v35 = vld [vmem:[%s8484_s3 + $0x3b0] ss:$8 sps:$4 sm:$0xff]  }
 0x1fe   :  { %4292 = vmatprep.subr.bf16.mxu0 %v6558_v20  ;;  %v4331_v46 = vpack.c.bf16 %v3910_v6, %v3910_v6  ;;  %v6595_v20 = vld [vmem:[%s8484_s3 + $0x290] ss:$8 sps:$4 sm:$0xff]   ;;  %v6612_v24 = vld [vmem:[%s8484_s3 + $0x234] ss:$8 sps:$4 sm:$0xff]   ;;  %v6664_v6 = vld [vmem:[%s8484_s3 + $0x340] ss:$8 sps:$4 sm:$0xff]  }
 0x1ff   :  { %v6184_v45 = vpop.f32.mrb[120].mxu0  ;;  %4433 = vmatpush1.bf16.msra.mxu1 %v6553_v22  ;;  %v6601_v22 = vld [vmem:[%s8484_s3 + $0x2a0] ss:$8 sps:$4 sm:$0xff]  }
 0x200   :  { %v6185_v47 = vpop.f32.mrb[121].mxu0  ;;  %4434 = vmatprep.subr.bf16.mxu1 %v6561_v1  ;;  %v6607_v1 = vld [vmem:[%s8484_s3 + $0x2b0] ss:$8 sps:$4 sm:$0xff]  }
 0x201   :  { %v6186_v57 = vadd.f32 %v6185_v47, %v6184_v45  ;;  %v6187_v52 = vpop.f32.mrb[122].mxu0  ;;  %4293 = vmatpush1.bf16.msra.mxu0 %v6556_v41  ;;  %v6230_v23 = vpop.f32.mrb[124].mxu1  ;;  %v3909_v45 = vsel %vm3893_vm3, %v8159_v38, %v3901_v37  ;;  %v6592_v47 = vld [vmem:[%s8484_s3 + $0x200] ss:$8 sps:$4 sm:$0xff]   ;;  %v6600_v38 = vld [vmem:[%s8484_s3 + $0x214] ss:$8 sps:$4 sm:$0xff]  }
 0x202   :  { %v6188_v55 = vpop.f32.mrb[123].mxu0  ;;  %4294 = vmatprep.subr.bf16.mxu0 %v6564_v15  ;;  %v6231_v13 = vpop.f32.mrb[125].mxu1  ;;  %v4191_v50 = vpack.c.bf16 %v3909_v45, %v3909_v45  ;;  %v6613_v41 = vld [vmem:[%s8484_s3 + $0x2c0] ss:$8 sps:$4 sm:$0xff]   ;;  %v6621_v15 = vld [vmem:[%s8484_s3 + $0x2d4] ss:$8 sps:$4 sm:$0xff]  }
 0x203   :  { %v3812_v39 = vadd.f32 %v6186_v57, %v8134_v56  ;;  %v6189_v0 = vadd.f32 %v6188_v55, %v6187_v52  ;;  %v6559_v56 = vld [vmem:[%s8484_s3 + $0x1b0] ss:$8 sps:$4 sm:$0xff]   ;;  %v6233_v12 = vpop.f32.mrb[126].mxu1  ;;  %v6232_v10 = vadd.f32 %v6231_v13, %v6230_v23  ;;  %v6603_v57 = vld [vmem:[%s8484_s3 + $0x2a4] ss:$8 sps:$4 sm:$0xff]  }
 0x204   :  { %4435 = vmatpush1.bf16.msra.mxu1 %v6559_v56  ;;  %v6234_v17 = vpop.f32.mrb[127].mxu1  ;;  %v6598_v52 = vld [vmem:[%s8484_s3 + $0x210] ss:$8 sps:$4 sm:$0xff]   ;;  %v6609_v55 = vld [vmem:[%s8484_s3 + $0x2b4] ss:$8 sps:$4 sm:$0xff]  }
 0x205   :  { %v3815_v5 = vadd.f32 %v6189_v0, %v8137_v21  ;;  %v8191_v48 = vadd.f32 %v6226_v28, %v3812_v39  ;;  %v6562_v21 = vld [vmem:[%s8484_s3 + $0x130] ss:$8 sps:$4 sm:$0xff]   ;;  %4436 = vmatprep.subr.bf16.mxu1 %v6567_v8  ;;  %v6235_v59 = vadd.f32 %v6234_v17, %v6233_v12  ;;  %v6604_v28 = vld [vmem:[%s8484_s3 + $0x220] ss:$8 sps:$4 sm:$0xff]   ;;  %v6615_v39 = vld [vmem:[%s8484_s3 + $0x2c4] ss:$8 sps:$4 sm:$0xff]  }
 0x206   :  { %4295 = vmatpush1.bf16.msra.mxu0 %v6562_v21  ;;  %v6610_v0 = vld [vmem:[%s8484_s3 + $0x230] ss:$8 sps:$4 sm:$0xff]   ;;  %v6624_v56 = vld [vmem:[%s8484_s3 + $0x254] ss:$8 sps:$4 sm:$0xff]   ;;  %v6630_v21 = vld [vmem:[%s8484_s3 + $0x264] ss:$8 sps:$4 sm:$0xff]  }
 0x207   :  { %v8199_v9 = vadd.f32 %v6229_v2, %v3815_v5  ;;  %v6190_v51 = vpop.f32.mrb[124].mxu0  ;;  %4296 = vmatprep.subr.bf16.mxu0 %v6570_v32  ;;  %v6618_v2 = vld [vmem:[%s8484_s3 + $0x244] ss:$8 sps:$4 sm:$0xff]   ;;  %v6616_v5 = vld [vmem:[%s8484_s3 + $0x240] ss:$8 sps:$4 sm:$0xff]   ;;  %vm3895_vm5 = vcmp.gt.f32.partialorder %v8191_v48, 0.0 }
 0x208   :  { %v6191_v58 = vpop.f32.mrb[125].mxu0  ;;  %4437 = vmatpush1.bf16.msra.mxu1 %v6565_v16  ;;  %v6619_v8 = vld [vmem:[%s8484_s3 + $0x2d0] ss:$8 sps:$4 sm:$0xff]   ;;  %v6633_v13 = vld [vmem:[%s8484_s3 + $0x2f4] ss:$8 sps:$4 sm:$0xff]  }
 0x209   :  { %v6192_v33 = vadd.f32 %v6191_v58, %v6190_v51  ;;  %v6193_v14 = vpop.f32.mrb[126].mxu0  ;;  %4438 = vmatprep.subr.bf16.mxu1 %v6573_v40  ;;  %v6627_v51 = vld [vmem:[%s8484_s3 + $0x2e4] ss:$8 sps:$4 sm:$0xff]   ;;  %v6622_v23 = vld [vmem:[%s8484_s3 + $0x250] ss:$8 sps:$4 sm:$0xff]   ;;  %vm3896_vm4 = vcmp.gt.f32.partialorder %v8199_v9, 0.0 }
 0x20a   :  { %v6194_v34 = vpop.f32.mrb[127].mxu0  ;;  %4297 = vmatpush1.bf16.msra.mxu0 %v6568_v54  ;;  %v6625_v58 = vld [vmem:[%s8484_s3 + $0x2e0] ss:$8 sps:$4 sm:$0xff]   ;;  %v3904_v32 = vmul.f32 0.2, %v8199_v9 }
 0x20b   :  { %v3820_v19 = vadd.f32 %v6192_v33, %v8139_v63  ;;  %v6195_v4 = vadd.f32 %v6194_v34, %v6193_v14  ;;  %v6571_v63 = vld [vmem:[%s8484_s3 + $0x1d0] ss:$8 sps:$4 sm:$0xff]   ;;  %4298 = vmatprep.subr.bf16.mxu0 %v6576_v49  ;;  %v6628_v33 = vld [vmem:[%s8484_s3 + $0x260] ss:$8 sps:$4 sm:$0xff]   ;;  %v6636_v14 = vld [vmem:[%s8484_s3 + $0x274] ss:$8 sps:$4 sm:$0xff]  }
 0x20c   :  { %4439 = vmatpush1.bf16.msra.mxu1 %v6571_v63  ;;  %v3903_v12 = vmul.f32 0.2, %v8191_v48  ;;  %v6631_v16 = vld [vmem:[%s8484_s3 + $0x2f0] ss:$8 sps:$4 sm:$0xff]   ;;  %v6639_v34 = vld [vmem:[%s8484_s3 + $0x384] ss:$8 sps:$4 sm:$0xff]  }
 0x20d   :  { %v3823_v7 = vadd.f32 %v6195_v4, %v8142_v43  ;;  %v8221_v26 = vadd.f32 %v6232_v10, %v3820_v19  ;;  %v6582_v43 = vld [vmem:[%s8484_s3 + $0x164] ss:$8 sps:$4 sm:$0xff]   ;;  %4440 = vmatprep.subr.bf16.mxu1 %v6579_v61  ;;  %v3912_v10 = vsel %vm3896_vm4, %v8199_v9, %v3904_v32  ;;  %v6634_v17 = vld [vmem:[%s8484_s3 + $0x270] ss:$8 sps:$4 sm:$0xff]   ;;  %v6637_v4 = vld [vmem:[%s8484_s3 + $0x380] ss:$8 sps:$4 sm:$0xff]  }
 0x20e   :  { %4299 = vmatpush1.bf16.msra.mxu0 %v6574_v27  ;;  %v6642_v40 = vld [vmem:[%s8484_s3 + $0x304] ss:$8 sps:$4 sm:$0xff]   ;;  %v3911_v19 = vsel %vm3895_vm5, %v8191_v48, %v3903_v12  ;;  %v6645_v9 = vld [vmem:[%s8484_s3 + $0x394] ss:$8 sps:$4 sm:$0xff]   ;;  %v6640_v54 = vld [vmem:[%s8484_s3 + $0x300] ss:$8 sps:$4 sm:$0xff]  }
 0x20f   :  { %v8229_v3 = vadd.f32 %v6235_v59, %v3823_v7  ;;  %4300 = vmatprep.subr.bf16.mxu0 %v6582_v43  ;;  %v4611_v59 = vpack.c.bf16 %v3912_v10, %v3912_v10  ;;  %v4471_v49 = vpack.c.bf16 %v3911_v19, %v3911_v19  ;;  %v6648_v48 = vld [vmem:[%s8484_s3 + $0x314] ss:$8 sps:$4 sm:$0xff]   ;;  %v6643_v7 = vld [vmem:[%s8484_s3 + $0x390] ss:$8 sps:$4 sm:$0xff]   ;;  %v6651_v63 = vld [vmem:[%s8484_s3 + $0x3a4] ss:$8 sps:$4 sm:$0xff]  }
 0x210   :  { %4441 = vmatpush1.bf16.msra.mxu1 %v6577_v29  ;;  %v6646_v61 = vld [vmem:[%s8484_s3 + $0x310] ss:$8 sps:$4 sm:$0xff]   ;;  %v6654_v27 = vld [vmem:[%s8484_s3 + $0x324] ss:$8 sps:$4 sm:$0xff]   ;;  %v6649_v43 = vld [vmem:[%s8484_s3 + $0x3a0] ss:$8 sps:$4 sm:$0xff]  }
 0x211   :  { %4442 = vmatprep.subr.bf16.mxu1 %v6585_v31  ;;  %v6657_v29 = vld [vmem:[%s8484_s3 + $0x3b4] ss:$8 sps:$4 sm:$0xff]   ;;  %v6666_v37 = vld [vmem:[%s8484_s3 + $0x344] ss:$8 sps:$4 sm:$0xff]   ;;  %vm3898_vm6 = vcmp.gt.f32.partialorder %v8229_v3, 0.0  ;;  %vm3897_vm7 = vcmp.gt.f32.partialorder %v8221_v26, 0.0 }
 0x212   :  { %4301 = vmatpush1.bf16.msra.mxu0 %v6580_v62  ;;  %v6660_v31 = vld [vmem:[%s8484_s3 + $0x334] ss:$8 sps:$4 sm:$0xff]   ;;  %v6663_v62 = vld [vmem:[%s8484_s3 + $0x3c4] ss:$8 sps:$4 sm:$0xff]  }
 0x213   :  { %4302 = vmatprep.subr.bf16.mxu0 %v6588_v36  ;;  %v6658_v36 = vld [vmem:[%s8484_s3 + $0x330] ss:$8 sps:$4 sm:$0xff]   ;;  %v6675_v45 = vld [vmem:[%s8484_s3 + $0x3e4] ss:$8 sps:$4 sm:$0xff]  }
 0x214   :  { %4443 = vmatpush1.bf16.msra.mxu1 %v6583_v18  ;;  %v6661_v18 = vld [vmem:[%s8484_s3 + $0x3c0] ss:$8 sps:$4 sm:$0xff]  }
 0x215   :  { %4708 = vmatprep.subr.bf16.mxu1 %v6591_v44  ;;  %v6669_v44 = vld [vmem:[%s8484_s3 + $0x3d4] ss:$8 sps:$4 sm:$0xff]  }
 0x216   :  { %4303 = vmatpush1.bf16.msra.mxu0 %v6586_v25  ;;  %v6672_v25 = vld [vmem:[%s8484_s3 + $0x354] ss:$8 sps:$4 sm:$0xff]  }
 0x217   :  { %4461 = vmatmul.mubr.bf16.vlgmr.msra.gmra.mrb[132].mxu1 %v4331_v46  ;;  %4568 = vmatprep.subr.bf16.mxu0 %v6594_v11  ;;  %v6667_v11 = vld [vmem:[%s8484_s3 + $0x3d0] ss:$8 sps:$4 sm:$0xff]   ;;  %v6678_v46 = vld [vmem:[%s8484_s3 + $0x364] ss:$8 sps:$4 sm:$0xff]  }
 0x218   :  { %4709 = vmatpush1.bf16.msra.mxu1 %v6589_v30  ;;  %4740 = vmatprep.mubr.bf16.mxu1 %v6689_v60  ;;  %v6670_v30 = vld [vmem:[%s8484_s3 + $0x350] ss:$8 sps:$4 sm:$0xff]  }
 0x219   :  { %4321 = vmatmul.mubr.bf16.vlgmr.msra.gmra.mrb[132].mxu0 %v4191_v50  ;;  %4710 = vmatprep.subr.bf16.mxu1 %v6597_v42  ;;  %v6673_v42 = vld [vmem:[%s8484_s3 + $0x3e0] ss:$8 sps:$4 sm:$0xff]   ;;  %v3906_v50 = vmul.f32 0.2, %v8229_v3 }
 0x21a   :  { %4569 = vmatpush1.bf16.msra.mxu0 %v6592_v47  ;;  %4600 = vmatprep.mubr.bf16.mxu0 %v6689_v60  ;;  %v6681_v47 = vld [vmem:[%s8484_s3 + $0x3f4] ss:$8 sps:$4 sm:$0xff]  }
 0x21b   :  { %4570 = vmatprep.subr.bf16.mxu0 %v6600_v38  ;;  %v6676_v38 = vld [vmem:[%s8484_s3 + $0x360] ss:$8 sps:$4 sm:$0xff]  }
 0x21c   :  { %4711 = vmatpush1.bf16.msra.mxu1 %v6595_v20  ;;  %v6684_v20 = vld [vmem:[%s8484_s3 + $0x374] ss:$8 sps:$4 sm:$0xff]  }
 0x21d   :  { %4712 = vmatprep.subr.bf16.mxu1 %v6603_v57  ;;  %v3905_v57 = vmul.f32 0.2, %v8221_v26 }
 0x21e   :  { %4571 = vmatpush1.bf16.msra.mxu0 %v6598_v52  ;;  %v6679_v52 = vld [vmem:[%s8484_s3 + $0x3f0] ss:$8 sps:$4 sm:$0xff]  }
 0x21f   :  { %4572 = vmatprep.subr.bf16.mxu0 %v6606_v53  ;;  %v3914_v53 = vsel %vm3898_vm6, %v8229_v3, %v3906_v50 }
 0x220   :  { %4713 = vmatpush1.bf16.msra.mxu1 %v6601_v22  ;;  %v6682_v22 = vld [vmem:[%s8484_s3 + $0x370] ss:$8 sps:$4 sm:$0xff]  }
 0x221   :  { %4714 = vmatprep.subr.bf16.mxu1 %v6609_v55  ;;  %v3913_v55 = vsel %vm3897_vm7, %v8221_v26, %v3905_v57 }
 0x222   :  { %4573 = vmatpush1.bf16.msra.mxu0 %v6604_v28  ;;  %v4891_v28 = vpack.c.bf16 %v3914_v53, %v3914_v53 }
 0x223   :  { %4574 = vmatprep.subr.bf16.mxu0 %v6612_v24  ;;  %v4751_v24 = vpack.c.bf16 %v3913_v55, %v3913_v55 }
 0x224   :  { %4715 = vmatpush1.bf16.msra.mxu1 %v6607_v1 }
 0x225   :  { %4716 = vmatprep.subr.bf16.mxu1 %v6615_v39 }
 0x226   :  { %4575 = vmatpush1.bf16.msra.mxu0 %v6610_v0 }
 0x227   :  { %4576 = vmatprep.subr.bf16.mxu0 %v6618_v2 }
 0x228   :  { %4717 = vmatpush1.bf16.msra.mxu1 %v6613_v41 }
 0x229   :  { %4718 = vmatprep.subr.bf16.mxu1 %v6621_v15 }
 0x22a   :  { %4577 = vmatpush1.bf16.msra.mxu0 %v6616_v5 }
 0x22b   :  { %4578 = vmatprep.subr.bf16.mxu0 %v6624_v56 }
 0x22c   :  { %4719 = vmatpush1.bf16.msra.mxu1 %v6619_v8 }
 0x22d   :  { %4720 = vmatprep.subr.bf16.mxu1 %v6627_v51 }
 0x22e   :  { %4579 = vmatpush1.bf16.msra.mxu0 %v6622_v23 }
 0x22f   :  { %4580 = vmatprep.subr.bf16.mxu0 %v6630_v21 }
 0x230   :  { %4721 = vmatpush1.bf16.msra.mxu1 %v6625_v58 }
 0x231   :  { %4722 = vmatprep.subr.bf16.mxu1 %v6633_v13 }
 0x232   :  { %4581 = vmatpush1.bf16.msra.mxu0 %v6628_v33 }
 0x233   :  { %4582 = vmatprep.subr.bf16.mxu0 %v6636_v14 }
 0x234   :  { %4723 = vmatpush1.bf16.msra.mxu1 %v6631_v16 }
 0x235   :  { %4988 = vmatprep.subr.bf16.mxu1 %v6639_v34 }
 0x236   :  { %4583 = vmatpush1.bf16.msra.mxu0 %v6634_v17 }
 0x237   :  { %4741 = vmatmul.mubr.bf16.vlgmr.msra.gmra.mrb[136].mxu1 %v4611_v59  ;;  %4848 = vmatprep.subr.bf16.mxu0 %v6642_v40 }
 0x238   :  { %4989 = vmatpush1.bf16.msra.mxu1 %v6637_v4  ;;  %5020 = vmatprep.mubr.bf16.mxu1 %v6689_v60 }
 0x239   :  { %4601 = vmatmul.mubr.bf16.vlgmr.msra.gmra.mrb[136].mxu0 %v4471_v49  ;;  %4990 = vmatprep.subr.bf16.mxu1 %v6645_v9 }
 0x23a   :  { %4849 = vmatpush1.bf16.msra.mxu0 %v6640_v54  ;;  %4880 = vmatprep.mubr.bf16.mxu0 %v6689_v60  ;;  %v6652_v60 = vld [vmem:[%s8484_s3 + $0x320] ss:$8 sps:$4 sm:$0xff]  }
 0x23b   :  { %4850 = vmatprep.subr.bf16.mxu0 %v6648_v48 }
 0x23c   :  { %4991 = vmatpush1.bf16.msra.mxu1 %v6643_v7 }
 0x23d   :  { %4992 = vmatprep.subr.bf16.mxu1 %v6651_v63 }
 0x23e   :  { %4851 = vmatpush1.bf16.msra.mxu0 %v6646_v61  ;;  %v5033_v61 = vlaneseq }
 0x23f   :  { %4852 = vmatprep.subr.bf16.mxu0 %v6654_v27 }
 0x240   :  { %4993 = vmatpush1.bf16.msra.mxu1 %v6649_v43  ;;  %v5034_v27 = vshrl.u32 %v5033_v61, 7 }
 0x241   :  { %4994 = vmatprep.subr.bf16.mxu1 %v6657_v29 }
 0x242   :  { %4853 = vmatpush1.bf16.msra.mxu0 %v6652_v60  ;;  %v5035_v43 = vsub.s32 0, %v5034_v27  ;;  %v5031_v60 = vld [vmem:[%s8485_s4] sm:$0x3] }
 0x243   :  { %4854 = vmatprep.subr.bf16.mxu0 %v6660_v31  ;;  %v5039_v31 = vsub.s32 1, %v5034_v27 }
 0x244   :  { %4995 = vmatpush1.bf16.msra.mxu1 %v6655_v35 }
 0x245   :  { %4996 = vmatprep.subr.bf16.mxu1 %v6663_v62 }
 0x246   :  { %4855 = vmatpush1.bf16.msra.mxu0 %v6658_v36 }
 0x247   :  { %4856 = vmatprep.subr.bf16.mxu0 %v6666_v37 }
 0x248   :  { %4997 = vmatpush1.bf16.msra.mxu1 %v6661_v18  ;;  %v5036_v18 = vrot.slane %v5031_v60, %v5035_v43 }
 0x249   :  { %4998 = vmatprep.subr.bf16.mxu1 %v6669_v44 }
 0x24a   :  { %4857 = vmatpush1.bf16.msra.mxu0 %v6664_v6 }
 0x24b   :  { %4858 = vmatprep.subr.bf16.mxu0 %v6672_v25 }
 0x24c   :  { %4999 = vmatpush1.bf16.msra.mxu1 %v6667_v11  ;;  %v5040_v11 = vrot.slane %v5031_v60, %v5039_v31 }
 0x24d   :  { %5000 = vmatprep.subr.bf16.mxu1 %v6675_v45 }
 0x24e   :  { %4859 = vmatpush1.bf16.msra.mxu0 %v6670_v30 }
 0x24f   :  { %4860 = vmatprep.subr.bf16.mxu0 %v6678_v46 }
 0x250   :  { %5001 = vmatpush1.bf16.msra.mxu1 %v6673_v42  ;;  %v5051_v42 = vld [vmem:[%s8486_s5] sm:$0x3] }
 0x251   :  { %5002 = vmatprep.subr.bf16.mxu1 %v6681_v47 }
 0x252   :  { %4861 = vmatpush1.bf16.msra.mxu0 %v6676_v38 }
 0x253   :  { %4862 = vmatprep.subr.bf16.mxu0 %v6684_v20  ;;  %v5056_v20 = vrot.slane %v5051_v42, %v5035_v43 }
 0x254   :  { %5003 = vmatpush1.bf16.msra.mxu1 %v6679_v52  ;;  %v5060_v52 = vrot.slane %v5051_v42, %v5039_v31 }
 0x256   :  { %4863 = vmatpush1.bf16.msra.mxu0 %v6682_v22 }
 0x257   :  { %5021 = vmatmul.mubr.bf16.vlgmr.msra.gmra.mrb[140].mxu1 %v4891_v28 }
 0x259   :  { %4881 = vmatmul.mubr.bf16.vlgmr.msra.gmra.mrb[140].mxu0 %v4751_v24 }
 0x2c9   :  { %v4184_v1 = vpop.f32.mrb[128].mxu1 }
 0x2ca   :  { %v4186_v39 = vpop.f32.mrb[129].mxu1 }
 0x2cb   :  { %v4063_v0 = vpop.f32.mrb[128].mxu0  ;;  %v4188_v2 = vpop.f32.mrb[130].mxu1 }
 0x2cc   :  { %v4185_v41 = vadd.f32 %v4184_v1, %v4063_v0  ;;  %v4065_v3 = vpop.f32.mrb[129].mxu0  ;;  %v4189_v15 = vpop.f32.mrb[131].mxu1 }
 0x2cd   :  { %v4187_v5 = vadd.f32 %v4186_v39, %v4065_v3  ;;  %v4067_v56 = vpop.f32.mrb[130].mxu0  ;;  %v5069_v39 = vstv %s8487_s6 }
 0x2ce   :  { %v4068_v8 = vpop.f32.mrb[131].mxu0 }
 0x2ea   :  { %v4462_v51 = vpop.f32.mrb[132].mxu1 }
 0x2eb   :  { %v4464_v23 = vpop.f32.mrb[133].mxu1 }
 0x2ec   :  { %v4322_v21 = vpop.f32.mrb[132].mxu0  ;;  %v4466_v26 = vpop.f32.mrb[134].mxu1 }
 0x2ed   :  { %v4329_v58 = vadd.f32 %v4322_v21, %v4185_v41  ;;  %v4324_v13 = vpop.f32.mrb[133].mxu0  ;;  %v4467_v32 = vpop.f32.mrb[135].mxu1 }
 0x2ee   :  { %v4330_v33 = vadd.f32 %v4324_v13, %v4187_v5  ;;  %v4326_v14 = vpop.f32.mrb[134].mxu0 }
 0x2ef   :  { %v4327_v12 = vpop.f32.mrb[135].mxu0  ;;  %v4469_v16 = vadd.f32 %v4462_v51, %v4329_v58 }
 0x2f0   :  { %v4470_v34 = vadd.f32 %v4464_v23, %v4330_v33 }
 0x30a   :  { %v4742_v10 = vpop.f32.mrb[136].mxu1 }
 0x30b   :  { %v4744_v17 = vpop.f32.mrb[137].mxu1 }
 0x30c   :  { %v4602_v40 = vpop.f32.mrb[136].mxu0  ;;  %v4746_v19 = vpop.f32.mrb[138].mxu1 }
 0x30d   :  { %v4609_v4 = vadd.f32 %v4602_v40, %v4469_v16  ;;  %v4604_v59 = vpop.f32.mrb[137].mxu0  ;;  %v4747_v9 = vpop.f32.mrb[139].mxu1 }
 0x30e   :  { %v4610_v54 = vadd.f32 %v4604_v59, %v4470_v34  ;;  %v4606_v49 = vpop.f32.mrb[138].mxu0 }
 0x30f   :  { %v4607_v48 = vpop.f32.mrb[139].mxu0  ;;  %v4749_v7 = vadd.f32 %v4742_v10, %v4609_v4 }
 0x310   :  { %v4750_v63 = vadd.f32 %v4744_v17, %v4610_v54 }
 0x32a   :  { %v5022_v29 = vpop.f32.mrb[140].mxu1 }
 0x32b   :  { %v5024_v35 = vpop.f32.mrb[141].mxu1 }
 0x32c   :  { %v4882_v62 = vpop.f32.mrb[140].mxu0  ;;  %v5026_v36 = vpop.f32.mrb[142].mxu1 }
 0x32d   :  { %v4889_v37 = vadd.f32 %v4882_v62, %v4749_v7  ;;  %v4884_v44 = vpop.f32.mrb[141].mxu0  ;;  %v5027_v6 = vpop.f32.mrb[143].mxu1 }
 0x32e   :  { %v4890_v25 = vadd.f32 %v4884_v44, %v4750_v63  ;;  %v4886_v45 = vpop.f32.mrb[142].mxu0 }
 0x32f   :  { %v5029_v30 = vadd.f32 %v5022_v29, %v4889_v37  ;;  %v4887_v46 = vpop.f32.mrb[143].mxu0 }
 0x330   :  { %v5030_v47 = vadd.f32 %v5024_v35, %v4890_v25 }
 0x331   :  { %v5043_v50 = vadd.f32 %v5036_v18, %v5029_v30 }
 0x332   :  { %v5044_v38 = vadd.f32 %v5040_v11, %v5030_v47 }
 0x333   :  { %vm5045_vm8 = vcmp.gt.f32.partialorder %v5043_v50, 0.0  ;;  %v5047_v57 = vmul.f32 0.2, %v5043_v50 }
 0x334   :  { %vm5046_vm9 = vcmp.gt.f32.partialorder %v5044_v38, 0.0  ;;  %v5048_v53 = vmul.f32 0.2, %v5044_v38 }
 0x335   :  { %v5049_v22 = vsel %vm5045_vm8, %v5043_v50, %v5047_v57 }
 0x336   :  { %v5050_v55 = vsel %vm5046_vm9, %v5044_v38, %v5048_v53  ;;  %v5063_v28 = vmul.f32 %v5056_v20, %v5049_v22 }
 0x337   :  { %v5064_v24 = vmul.f32 %v5060_v52, %v5050_v55 }
 0x339   :  { %v5065_v1 = vadd.f32 %v5064_v24, %v5063_v28 }
 0x33b   :  { %5066 = vadd.xlane.f32.xlu0 %v5065_v1 }
 0x3c8   :  { %v5067_v0 = vpop.xlane.xlu0 %5066 }
 0x3c9   :  { %v5070_v2 = vadd.f32 %v5069_v39, %v5067_v0 }
 0x3cb   :  { %v5071_v41 = vsub.f32 0.0, %v5070_v2 }
 0x3cd   :  { %v5072_v3 = vmul.f32 1.442695, %v5071_v41 }
 0x3cf   :  { %6685 = vpow2.f32 %v5072_v3 }
 0x3d9   :  { %v6686_v15 = vpop.eup %6685 }
 0x3da   :  { %v5074_v5 = vadd.f32 1.0, %v6686_v15 }
 0x3dc   :  { %6687 = vrcp.f32 %v5074_v5 }
 0x3e6   :  { %v6688_v56 = vpop.eup %6687 }
 0x3e7   :  { %5078 = vst.msk [vmem:[%s8488_s7] sm:$0xff] %vm5077_vm10, %v6688_v56 }

</bundles_post_ra>
